<compile_context>
chip_gen: v6e
topology: v6e:2x2x1
jax: 0.10.0
libtpu: 0.0.40
codegen_flags: <defaults>
</compile_context>

<pallas_src>
import jax
import jax.numpy as jnp
from jax.experimental import pallas as pl
from jax.experimental.pallas import tpu as pltpu


def _round_up(x: int, m: int) -> int:
    return ((x + m - 1) // m) * m


def _concat_message_kernel(z_src_ref, z_dst_ref, raw_msg_ref, t_enc_ref, out_ref):
    # Build the concatenated row tile in registers and write the whole
    # (tr, out_dim) block with a single lane-dense store.  Any dtype casts
    # happen on the VPU under the shadow of the next tile's DMAs.
    dt = out_ref.dtype
    out_ref[...] = jnp.concatenate(
        [
            z_src_ref[...].astype(dt),
            z_dst_ref[...].astype(dt),
            raw_msg_ref[...].astype(dt),
            t_enc_ref[...].astype(dt),
        ],
        axis=-1,
    )


def concat_message(z_src, z_dst, raw_msg, t_enc, *,
                   tile_rows: int = 2048,
                   min_pallas_rows: int = 4096):
    """Pallas equivalent of ConcatMessage.forward.

    All inputs must share the leading (row) dimension.  Output dtype follows
    jnp.result_type of the inputs (note: slightly more permissive than
    torch.cat, which requires a common dtype).

    tile_rows is sweepable (2048..8192); VMEM limits are raised automatically
    when the double-buffered footprint needs it.
    """
    n, memory_dim = z_src.shape
    assert z_dst.shape == (n, memory_dim)
    raw_msg_dim = raw_msg.shape[-1]
    time_dim = t_enc.shape[-1]
    assert raw_msg.shape[0] == n and t_enc.shape[0] == n
    out_dim = raw_msg_dim + 2 * memory_dim + time_dim
    out_dtype = jnp.result_type(z_src.dtype, z_dst.dtype, raw_msg.dtype, t_enc.dtype)

    # Tiny inputs: launch + per-step overhead dominates and XLA's native
    # concat is already at the HBM roofline, so skip the Pallas path.
    if n < min_pallas_rows:
        return jnp.concatenate(
            [z_src.astype(out_dtype), z_dst.astype(out_dtype),
             raw_msg.astype(out_dtype), t_enc.astype(out_dtype)], axis=-1)

    # Row tile:
    #   * as large as requested (default 2048) to amortize the ~0.35 us
    #     per-grid-step pipeline overhead,
    #   * multiple of 32 rows (covers sublane packing of f32/bf16/int8/fp8),
    #   * clamped so the grid keeps >= 4 steps, preserving the 2-TC split on
    #     v7x (no-op on single-TC v5e/v6e).
    tr = max(32, _round_up(min(int(tile_rows), n), 32))
    tr = min(tr, max(32, _round_up(pl.cdiv(n, 4), 32)))
    grid = (pl.cdiv(n, tr),)

    # Estimate double-buffered VMEM footprint (narrow blocks are lane-padded
    # to 128 in VMEM) and raise the scoped VMEM limit only when needed
    # (v5e default is 16 MiB, v6e/v7x 32 MiB; cap under v7x's 64 MiB physical).
    def _block_bytes(width, dtype):
        return 2 * tr * _round_up(width, 128) * jnp.dtype(dtype).itemsize

    vmem_need = (
        _block_bytes(memory_dim, z_src.dtype)
        + _block_bytes(memory_dim, z_dst.dtype)
        + _block_bytes(raw_msg_dim, raw_msg.dtype)
        + _block_bytes(time_dim, t_enc.dtype)
        + _block_bytes(out_dim, out_dtype)
    )
    compiler_kwargs = dict(dimension_semantics=("parallel",))
    if vmem_need > (12 << 20):
        compiler_kwargs["vmem_limit_bytes"] = min(
            _round_up(vmem_need + (4 << 20), 1 << 20), 48 << 20)

    bytes_accessed = (
        z_src.size * jnp.dtype(z_src.dtype).itemsize
        + z_dst.size * jnp.dtype(z_dst.dtype).itemsize
        + raw_msg.size * jnp.dtype(raw_msg.dtype).itemsize
        + t_enc.size * jnp.dtype(t_enc.dtype).itemsize
        + n * out_dim * jnp.dtype(out_dtype).itemsize
    )

    return pl.pallas_call(
        _concat_message_kernel,
        out_shape=jax.ShapeDtypeStruct((n, out_dim), out_dtype),
        grid=grid,
        in_specs=[
            pl.BlockSpec((tr, memory_dim), lambda i: (i, 0)),
            pl.BlockSpec((tr, memory_dim), lambda i: (i, 0)),
            pl.BlockSpec((tr, raw_msg_dim), lambda i: (i, 0)),
            pl.BlockSpec((tr, time_dim), lambda i: (i, 0)),
        ],
        out_specs=pl.BlockSpec((tr, out_dim), lambda i: (i, 0)),
        compiler_params=pltpu.CompilerParams(**compiler_kwargs),
        cost_estimate=pl.CostEstimate(
            flops=0, transcendentals=0, bytes_accessed=bytes_accessed),
    )(z_src, z_dst, raw_msg, t_enc)


if __name__ == "__main__":
    # ConcatMessage(raw_msg_dim=16, memory_dim=32, time_dim=16).
    # n chosen above the small-n fallback threshold so the Pallas path runs,
    # with a multi-step grid (4 steps) including a partial last row tile.
    raw_msg_dim, memory_dim, time_dim, n = 16, 32, 16, 6000

    key = jax.random.PRNGKey(0)
    k1, k2, k3, k4 = jax.random.split(key, 4)
    z_src = jax.random.normal(k1, (n, memory_dim), dtype=jnp.float32)
    z_dst = jax.random.normal(k2, (n, memory_dim), dtype=jnp.float32)
    raw_msg = jax.random.normal(k3, (n, raw_msg_dim), dtype=jnp.float32)
    t_enc = jax.random.normal(k4, (n, time_dim), dtype=jnp.float32)

    ref = jnp.concatenate([z_src, z_dst, raw_msg, t_enc], axis=-1)

    # Pallas path.
    out = concat_message(z_src, z_dst, raw_msg, t_enc)
    out = jax.block_until_ready(out)
    assert out.shape == (n, raw_msg_dim + 2 * memory_dim + time_dim)
    assert jnp.array_equal(out, ref)

    # Small-n fallback path (XLA native concat) stays semantically identical.
    small = concat_message(z_src[:100], z_dst[:100], raw_msg[:100], t_enc[:100])
    small = jax.block_until_ready(small)
    assert jnp.array_equal(small, ref[:100])

    print("KERNEL_OK")
</pallas_src>

<mosaic_0001>
module attributes {stable_mosaic.version = 11 : i64} {
  func.func @_concat_message_kernel(%arg0: i32, %arg1: memref<1504x32xf32, #tpu.memory_space<vmem>>, %arg2: memref<1504x32xf32, #tpu.memory_space<vmem>>, %arg3: memref<1504x16xf32, #tpu.memory_space<vmem>>, %arg4: memref<1504x16xf32, #tpu.memory_space<vmem>>, %arg5: memref<1504x96xf32, #tpu.memory_space<vmem>>) attributes {dimension_semantics = [#tpu.dimension_semantics<parallel>], iteration_bounds = array<i64: 4>, scalar_prefetch = 0 : i64, scratch_operands = 0 : i64, tpu.core_type = #tpu.core_type<tc>, window_params = [{transform_indices = @transform_0, window_bounds = array<i64: 1504, 32>}, {transform_indices = @transform_1, window_bounds = array<i64: 1504, 32>}, {transform_indices = @transform_2, window_bounds = array<i64: 1504, 16>}, {transform_indices = @transform_3, window_bounds = array<i64: 1504, 16>}, {transform_indices = @transform_4, window_bounds = array<i64: 1504, 96>}]} {
    %c0 = arith.constant 0 : index
    %c0_0 = arith.constant 0 : index
    %0 = vector.load %arg1[%c0, %c0_0] : memref<1504x32xf32, #tpu.memory_space<vmem>>, vector<1504x32xf32>
    %c0_1 = arith.constant 0 : index
    %c0_2 = arith.constant 0 : index
    %1 = vector.load %arg2[%c0_1, %c0_2] : memref<1504x32xf32, #tpu.memory_space<vmem>>, vector<1504x32xf32>
    %c0_3 = arith.constant 0 : index
    %c0_4 = arith.constant 0 : index
    %2 = vector.load %arg3[%c0_3, %c0_4] : memref<1504x16xf32, #tpu.memory_space<vmem>>, vector<1504x16xf32>
    %c0_5 = arith.constant 0 : index
    %c0_6 = arith.constant 0 : index
    %3 = vector.load %arg4[%c0_5, %c0_6] : memref<1504x16xf32, #tpu.memory_space<vmem>>, vector<1504x16xf32>
    %4 = tpu.concatenate %0, %1, %2, %3 in 1 : vector<1504x32xf32>, vector<1504x32xf32>, vector<1504x16xf32>, vector<1504x16xf32> -> vector<1504x96xf32>
    %c0_7 = arith.constant 0 : index
    %c0_8 = arith.constant 0 : index
    %5 = vector.load %arg5[%c0_7, %c0_8] : memref<1504x96xf32, #tpu.memory_space<vmem>>, vector<1504x96xf32>
    tpu.vector_store %arg5[%c0_7, %c0_8], %4 {strides = array<i32>} : memref<1504x96xf32, #tpu.memory_space<vmem>>, vector<1504x96xf32>,
    return
  }
  func.func @transform_0(%arg0: i32) -> (i32, i32) {
    %c0_i32 = arith.constant 0 : i32
    %c0_i32_0 = arith.constant 0 : i32
    return %arg0, %c0_i32 : i32, i32
  }
  func.func @transform_1(%arg0: i32) -> (i32, i32) {
    %c0_i32 = arith.constant 0 : i32
    %c0_i32_0 = arith.constant 0 : i32
    return %arg0, %c0_i32 : i32, i32
  }
  func.func @transform_2(%arg0: i32) -> (i32, i32) {
    %c0_i32 = arith.constant 0 : i32
    %c0_i32_0 = arith.constant 0 : i32
    return %arg0, %c0_i32 : i32, i32
  }
  func.func @transform_3(%arg0: i32) -> (i32, i32) {
    %c0_i32 = arith.constant 0 : i32
    %c0_i32_0 = arith.constant 0 : i32
    return %arg0, %c0_i32 : i32, i32
  }
  func.func @transform_4(%arg0: i32) -> (i32, i32) {
    %c0_i32 = arith.constant 0 : i32
    %c0_i32_0 = arith.constant 0 : i32
    return %arg0, %c0_i32 : i32, i32
  }
}

</mosaic_0001>

<bundles_post_ra>
// kernel: tpu_custom_call.1
= control target key start
LH: loop header
LB: loop body
LE: loop exit
PB: predicated region body
PF: predicated region fallthrough
CT: control target
= control target key end

     0   :  { %s4847_s15 = smov 0   ;;  %s4849_s16 = smov 0   ;;  %s8500_s0 = inlined_call_operand.vmem [shape: f32[6000,32], index: 0, kind: input, shape index: {}]   ;;  %s8501_s1 = inlined_call_operand.vmem [shape: f32[6000,32], index: 1, kind: input, shape index: {}]   ;;  %s8502_s2 = inlined_call_operand.vmem [shape: f32[6000,16], index: 2, kind: input, shape index: {}]   ;;  %s8503_s3 = inlined_call_operand.vmem [shape: f32[6000,16], index: 3, kind: input, shape index: {}]   ;;  %s8504_s4 = inlined_call_operand.vmem [shape: f32[6000,96], index: 4, kind: output, shape index: {}]  }
   0x1   :  { %s4851_s17 = smov 0  }
   0x2 LB: > { %s4860_s18 = sadd.s32 4294967295, %s4785_s17   ;;  %s4862_s19 = sadd.s32 1, %s4785_s17   ;;  %s4785_s17 = sphi %s4851_s17, %s9159_s17   ;;  %s4781_s16 = sphi %s4849_s16, %s9158_s16   ;;  %s4777_s15 = sphi %s4847_s15, %s9157_s15  }
   0x3   : > { %s122_s20 = ssub.s32 %s4785_s17, %s4862_s19  ;;  %s125_s21 = sadd.s32 1, %s4781_s16 }
   0x4   : > { %p123_p0 = scmp.eq.s32.totalorder %s122_s20, 0  ;;  %p135_p1 = scmp.ne.s32.totalorder %s4781_s16, %s4777_s15 }
   0x5   : > { %p136_p2 = scmp.eq.s32.totalorder %s4860_s18, 3  ;;  %p4616_p3 = scmp.ge.s32.totalorder %s4785_s17, 1 }
   0x6   : > { %s4870_s22 = scalar_select %p123_p0, %s4781_s16, %s125_s21  }
   0x7   : > { %p4872_p4 = por %p136_p2, %p135_p1  ;;  %p228_p5 = scmp.lt.s32.totalorder %s4785_s17, 5 }
   0x9   : > { %p229_p6 = pnand %p4616_p3, %p228_p5 }
   0xb   : > { %232 = sbr.rel (%p229_p6) target bundleno = 1330 (0x532), region = 36 }
  0x10   : > { %s4877_s24 = smul.u32 188, %s4860_s18  ;;  %s4819_s30 = smov 32   ;;  %vm3353_vm0 = vcmask 261120   ;;  %vm3542_vm1 = vcmask 523264   ;;  %vm3731_vm2 = vcmask 654336   ;;  %vm3920_vm3 = vcmask 785408  }
  0x11   : > { %s4820_s8 = smov 64   ;;  %s4821_s12 = smov 80  }
  0x12   : > { %p289_p7 = scmp.lt.s32.totalorder %s4877_s24, 749  ;;  %s281_s13 = sand.u32 1, %s4777_s15  }
  0x13   : > { %s4639_s21 = smul.u32 1504, %s281_s13 }
  0x14   : > { %s290_s25 = scalar_select %p289_p7, %s4877_s24, 749 }
  0x15   : > { %s6544_s15 = scalar_lea.vmem [#allocation2], %s4639_s21  }
  0x16   : > { %s4881_s26 = sshll.u32 %s290_s25, 3  ;;  %s4117_s25 = ssub.s32 (%p4872_p4), 750, %s4877_s24 }
  0x17   : > { %s4887_s29 = scalar_lea.vmem %s8501_s1, %s4881_s26  ;;  %s5527_s7 = scalar_lea.vmem %s8502_s2, %s4881_s26 }
  0x18   : > { %v535_v0 = vld [vmem:[%s4887_s29 + $0x10] sm:$0xff]  ;;  %v533_v1 = vld [vmem:[%s4887_s29] sm:$0xff]  ;;  %v536_v2 = vld [vmem:[%s4887_s29 + $0x18] sm:$0xff]  ;;  %s6285_s11 = scalar_lea.vmem %s8503_s3, %s4881_s26  ;;  %s6516_s20 = scalar_lea.vmem %s8500_s0, %s4881_s26 }
  0x19   : > { %1289 = vrot.lane.b32.xlu1 %v535_v0, %s4819_s30  ;;  %1285 = vrot.lane.b32.xlu0 %v533_v1, %s4819_s30  ;;  %v534_v3 = vld [vmem:[%s4887_s29 + $0x8] sm:$0xff]  ;;  %v537_v5 = vld [vmem:[%s4887_s29 + $0x20] sm:$0xff]  ;;  %s4636_s26 = smul.u32 (%p4872_p4), 1504, %s4860_s18  ;;  %p4118_p8 = scmp.lt.s32.totalorder (%p4872_p4), %s4117_s25, 188 }
  0x1a   : > { %v538_v4 = vld [vmem:[%s4887_s29 + $0x28] sm:$0xff]  ;;  %v540_v6 = vld [vmem:[%s4887_s29 + $0x38] sm:$0xff]  ;;  %v539_v7 = vld [vmem:[%s4887_s29 + $0x30] sm:$0xff] }
  0x1b   : > { %v542_v8 = vld [vmem:[%s4887_s29 + $0x48] sm:$0xff]  ;;  %v541_v9 = vld [vmem:[%s4887_s29 + $0x40] sm:$0xff]  ;;  %v544_v10 = vld [vmem:[%s4887_s29 + $0x58] sm:$0xff] }
  0x1c   : > { %v543_v11 = vld [vmem:[%s4887_s29 + $0x50] sm:$0xff]  ;;  %v546_v12 = vld [vmem:[%s4887_s29 + $0x68] sm:$0xff]  ;;  %v545_v13 = vld [vmem:[%s4887_s29 + $0x60] sm:$0xff] }
  0x1d   : > { %1291 = vrot.lane.b32.xlu1 %v536_v2, %s4819_s30  ;;  %1287 = vrot.lane.b32.xlu0 %v534_v3, %s4819_s30  ;;  %v548_v14 = vld [vmem:[%s4887_s29 + $0x78] sm:$0xff]  ;;  %v547_v15 = vld [vmem:[%s4887_s29 + $0x70] sm:$0xff] }
  0x1e   : > { %v550_v16 = vld [vmem:[%s4887_s29 + $0x88] sm:$0xff]  ;;  %v549_v17 = vld [vmem:[%s4887_s29 + $0x80] sm:$0xff]  ;;  %v552_v18 = vld [vmem:[%s4887_s29 + $0x98] sm:$0xff] }
  0x1f   : > { %v551_v19 = vld [vmem:[%s4887_s29 + $0x90] sm:$0xff]  ;;  %v554_v20 = vld [vmem:[%s4887_s29 + $0xa8] sm:$0xff]  ;;  %v553_v21 = vld [vmem:[%s4887_s29 + $0xa0] sm:$0xff] }
  0x20   : > { %v556_v22 = vld [vmem:[%s4887_s29 + $0xb8] sm:$0xff]  ;;  %v555_v23 = vld [vmem:[%s4887_s29 + $0xb0] sm:$0xff]  ;;  %v558_v24 = vld [vmem:[%s4887_s29 + $0xc8] sm:$0xff] }
  0x21   : > { %1295 = vrot.lane.b32.xlu1 %v538_v4, %s4819_s30  ;;  %1293 = vrot.lane.b32.xlu0 %v537_v5, %s4819_s30  ;;  %v557_v25 = vld [vmem:[%s4887_s29 + $0xc0] sm:$0xff]  ;;  %v560_v26 = vld [vmem:[%s4887_s29 + $0xd8] sm:$0xff] }
  0x22   : > { %v559_v27 = vld [vmem:[%s4887_s29 + $0xd0] sm:$0xff]  ;;  %v562_v28 = vld [vmem:[%s4887_s29 + $0xe8] sm:$0xff]  ;;  %v561_v29 = vld [vmem:[%s4887_s29 + $0xe0] sm:$0xff] }
  0x23   : > { %v564_v30 = vld [vmem:[%s4887_s29 + $0xf8] sm:$0xff]  ;;  %v563_v31 = vld [vmem:[%s4887_s29 + $0xf0] sm:$0xff]  ;;  %v566_v32 = vld [vmem:[%s4887_s29 + $0x108] sm:$0xff] }
  0x24   : > { %v565_v33 = vld [vmem:[%s4887_s29 + $0x100] sm:$0xff]  ;;  %v568_v34 = vld [vmem:[%s4887_s29 + $0x118] sm:$0xff]  ;;  %v567_v35 = vld [vmem:[%s4887_s29 + $0x110] sm:$0xff] }
  0x25   : > { %1299 = vrot.lane.b32.xlu1 %v540_v6, %s4819_s30  ;;  %1297 = vrot.lane.b32.xlu0 %v539_v7, %s4819_s30  ;;  %v570_v36 = vld [vmem:[%s4887_s29 + $0x128] sm:$0xff]  ;;  %v569_v37 = vld [vmem:[%s4887_s29 + $0x120] sm:$0xff] }
  0x26   : > { %v572_v38 = vld [vmem:[%s4887_s29 + $0x138] sm:$0xff]  ;;  %v571_v39 = vld [vmem:[%s4887_s29 + $0x130] sm:$0xff]  ;;  %v574_v40 = vld [vmem:[%s4887_s29 + $0x148] sm:$0xff] }
  0x27   : > { %v573_v41 = vld [vmem:[%s4887_s29 + $0x140] sm:$0xff]  ;;  %v576_v42 = vld [vmem:[%s4887_s29 + $0x158] sm:$0xff]  ;;  %v575_v43 = vld [vmem:[%s4887_s29 + $0x150] sm:$0xff] }
  0x28   : > { %v578_v44 = vld [vmem:[%s4887_s29 + $0x168] sm:$0xff]  ;;  %v577_v45 = vld [vmem:[%s4887_s29 + $0x160] sm:$0xff]  ;;  %v580_v46 = vld [vmem:[%s4887_s29 + $0x178] sm:$0xff] }
  0x29   : > { %1303 = vrot.lane.b32.xlu1 %v542_v8, %s4819_s30  ;;  %1301 = vrot.lane.b32.xlu0 %v541_v9, %s4819_s30  ;;  %v579_v47 = vld [vmem:[%s4887_s29 + $0x170] sm:$0xff]  ;;  %v582_v48 = vld [vmem:[%s4887_s29 + $0x188] sm:$0xff] }
  0x2a   : > { %v581_v49 = vld [vmem:[%s4887_s29 + $0x180] sm:$0xff]  ;;  %v584_v50 = vld [vmem:[%s4887_s29 + $0x198] sm:$0xff]  ;;  %v583_v51 = vld [vmem:[%s4887_s29 + $0x190] sm:$0xff] }
  0x2b   : > { %v586_v52 = vld [vmem:[%s4887_s29 + $0x1a8] sm:$0xff]  ;;  %v585_v53 = vld [vmem:[%s4887_s29 + $0x1a0] sm:$0xff]  ;;  %v588_v54 = vld [vmem:[%s4887_s29 + $0x1b8] sm:$0xff] }
  0x2c   : > { %v587_v55 = vld [vmem:[%s4887_s29 + $0x1b0] sm:$0xff]  ;;  %v590_v56 = vld [vmem:[%s4887_s29 + $0x1c8] sm:$0xff]  ;;  %v589_v57 = vld [vmem:[%s4887_s29 + $0x1c0] sm:$0xff] }
  0x2d   : > { %1307 = vrot.lane.b32.xlu1 %v544_v10, %s4819_s30  ;;  %1305 = vrot.lane.b32.xlu0 %v543_v11, %s4819_s30  ;;  %v592_v58 = vld [vmem:[%s4887_s29 + $0x1d8] sm:$0xff]  ;;  %v591_v59 = vld [vmem:[%s4887_s29 + $0x1d0] sm:$0xff] }
  0x2e   : > { %v594_v62 = vld [vmem:[%s4887_s29 + $0x1e8] sm:$0xff]  ;;  %v593_v63 = vld [vmem:[%s4887_s29 + $0x1e0] sm:$0xff]  ;;  %v596_v2 = vld [vmem:[%s4887_s29 + $0x1f8] sm:$0xff] }
  0x2f   : > { %v595_v3 = vld [vmem:[%s4887_s29 + $0x1f0] sm:$0xff]  ;;  %v598_v6 = vld [vmem:[%s4887_s29 + $0x208] sm:$0xff]  ;;  %v597_v7 = vld [vmem:[%s4887_s29 + $0x200] sm:$0xff] }
  0x30   : > { %v600_v10 = vld [vmem:[%s4887_s29 + $0x218] sm:$0xff]  ;;  %v599_v11 = vld [vmem:[%s4887_s29 + $0x210] sm:$0xff] }
  0x31   : > { %1311 = vrot.lane.b32.xlu1 %v546_v12, %s4819_s30  ;;  %1309 = vrot.lane.b32.xlu0 %v545_v13, %s4819_s30 }
  0x35   : > { %1315 = vrot.lane.b32.xlu1 %v548_v14, %s4819_s30  ;;  %1313 = vrot.lane.b32.xlu0 %v547_v15, %s4819_s30  ;;  %v602_v14 = vld [vmem:[%s4887_s29 + $0x228] sm:$0xff]  ;;  %v601_v15 = vld [vmem:[%s4887_s29 + $0x220] sm:$0xff] }
  0x39   : > { %1319 = vrot.lane.b32.xlu1 %v550_v16, %s4819_s30  ;;  %1317 = vrot.lane.b32.xlu0 %v549_v17, %s4819_s30 }
  0x3d   : > { %1323 = vrot.lane.b32.xlu1 %v552_v18, %s4819_s30  ;;  %1321 = vrot.lane.b32.xlu0 %v551_v19, %s4819_s30  ;;  %v604_v18 = vld [vmem:[%s4887_s29 + $0x238] sm:$0xff]  ;;  %v603_v19 = vld [vmem:[%s4887_s29 + $0x230] sm:$0xff] }
  0x41   : > { %1327 = vrot.lane.b32.xlu1 %v554_v20, %s4819_s30  ;;  %1325 = vrot.lane.b32.xlu0 %v553_v21, %s4819_s30 }
  0x45   : > { %1331 = vrot.lane.b32.xlu1 %v556_v22, %s4819_s30  ;;  %1329 = vrot.lane.b32.xlu0 %v555_v23, %s4819_s30  ;;  %v606_v22 = vld [vmem:[%s4887_s29 + $0x248] sm:$0xff]  ;;  %v605_v23 = vld [vmem:[%s4887_s29 + $0x240] sm:$0xff] }
  0x49   : > { %1335 = vrot.lane.b32.xlu1 %v558_v24, %s4819_s30  ;;  %1333 = vrot.lane.b32.xlu0 %v557_v25, %s4819_s30 }
  0x4d   : > { %1339 = vrot.lane.b32.xlu1 %v560_v26, %s4819_s30  ;;  %1337 = vrot.lane.b32.xlu0 %v559_v27, %s4819_s30  ;;  %v608_v26 = vld [vmem:[%s4887_s29 + $0x258] sm:$0xff]  ;;  %v607_v27 = vld [vmem:[%s4887_s29 + $0x250] sm:$0xff] }
  0x51   : > { %1343 = vrot.lane.b32.xlu1 %v562_v28, %s4819_s30  ;;  %1341 = vrot.lane.b32.xlu0 %v561_v29, %s4819_s30 }
  0x55   : > { %1347 = vrot.lane.b32.xlu1 %v564_v30, %s4819_s30  ;;  %1345 = vrot.lane.b32.xlu0 %v563_v31, %s4819_s30  ;;  %v610_v30 = vld [vmem:[%s4887_s29 + $0x268] sm:$0xff]  ;;  %v609_v31 = vld [vmem:[%s4887_s29 + $0x260] sm:$0xff] }
  0x59   : > { %1351 = vrot.lane.b32.xlu1 %v566_v32, %s4819_s30  ;;  %1349 = vrot.lane.b32.xlu0 %v565_v33, %s4819_s30 }
  0x5d   : > { %1355 = vrot.lane.b32.xlu1 %v568_v34, %s4819_s30  ;;  %1353 = vrot.lane.b32.xlu0 %v567_v35, %s4819_s30  ;;  %v612_v34 = vld [vmem:[%s4887_s29 + $0x278] sm:$0xff]  ;;  %v611_v35 = vld [vmem:[%s4887_s29 + $0x270] sm:$0xff] }
  0x61   : > { %1359 = vrot.lane.b32.xlu1 %v570_v36, %s4819_s30  ;;  %1357 = vrot.lane.b32.xlu0 %v569_v37, %s4819_s30 }
  0x65   : > { %1363 = vrot.lane.b32.xlu1 %v572_v38, %s4819_s30  ;;  %1361 = vrot.lane.b32.xlu0 %v571_v39, %s4819_s30  ;;  %v614_v38 = vld [vmem:[%s4887_s29 + $0x288] sm:$0xff]  ;;  %v613_v39 = vld [vmem:[%s4887_s29 + $0x280] sm:$0xff] }
  0x69   : > { %1367 = vrot.lane.b32.xlu1 %v574_v40, %s4819_s30  ;;  %1365 = vrot.lane.b32.xlu0 %v573_v41, %s4819_s30 }
  0x6d   : > { %1371 = vrot.lane.b32.xlu1 %v576_v42, %s4819_s30  ;;  %1369 = vrot.lane.b32.xlu0 %v575_v43, %s4819_s30  ;;  %v616_v42 = vld [vmem:[%s4887_s29 + $0x298] sm:$0xff]  ;;  %v615_v43 = vld [vmem:[%s4887_s29 + $0x290] sm:$0xff] }
  0x71   : > { %1375 = vrot.lane.b32.xlu1 %v578_v44, %s4819_s30  ;;  %1373 = vrot.lane.b32.xlu0 %v577_v45, %s4819_s30 }
  0x75   : > { %1379 = vrot.lane.b32.xlu1 %v580_v46, %s4819_s30  ;;  %1377 = vrot.lane.b32.xlu0 %v579_v47, %s4819_s30  ;;  %v618_v46 = vld [vmem:[%s4887_s29 + $0x2a8] sm:$0xff]  ;;  %v617_v47 = vld [vmem:[%s4887_s29 + $0x2a0] sm:$0xff] }
  0x79   : > { %1383 = vrot.lane.b32.xlu1 %v582_v48, %s4819_s30  ;;  %1381 = vrot.lane.b32.xlu0 %v581_v49, %s4819_s30 }
  0x7d   : > { %1387 = vrot.lane.b32.xlu1 %v584_v50, %s4819_s30  ;;  %1385 = vrot.lane.b32.xlu0 %v583_v51, %s4819_s30  ;;  %v620_v50 = vld [vmem:[%s4887_s29 + $0x2b8] sm:$0xff]  ;;  %v619_v51 = vld [vmem:[%s4887_s29 + $0x2b0] sm:$0xff] }
  0x81   : > { %1391 = vrot.lane.b32.xlu1 %v586_v52, %s4819_s30  ;;  %1389 = vrot.lane.b32.xlu0 %v585_v53, %s4819_s30 }
  0x85   : > { %1395 = vrot.lane.b32.xlu1 %v588_v54, %s4819_s30  ;;  %1393 = vrot.lane.b32.xlu0 %v587_v55, %s4819_s30  ;;  %v622_v54 = vld [vmem:[%s4887_s29 + $0x2c8] sm:$0xff]  ;;  %v621_v55 = vld [vmem:[%s4887_s29 + $0x2c0] sm:$0xff] }
  0x89   : > { %1399 = vrot.lane.b32.xlu1 %v590_v56, %s4819_s30  ;;  %1397 = vrot.lane.b32.xlu0 %v589_v57, %s4819_s30 }
  0x8b   : > { %v5007_v60 = vpop.permute.xlu1 %1289  ;;  %v5009_v61 = vpop.permute.xlu0 %1285 }
  0x8d   : > { %1403 = vrot.lane.b32.xlu1 %v592_v58, %s4819_s30  ;;  %1401 = vrot.lane.b32.xlu0 %v591_v59, %s4819_s30  ;;  %v624_v58 = vld [vmem:[%s4887_s29 + $0x2d8] sm:$0xff]  ;;  %v623_v59 = vld [vmem:[%s4887_s29 + $0x2d0] sm:$0xff] }
  0x8f   : > { %v5015_v0 = vpop.permute.xlu1 %1291  ;;  %v5017_v1 = vpop.permute.xlu0 %1287 }
  0x91   : > { %1407 = vrot.lane.b32.xlu1 %v594_v62, %s4819_s30  ;;  %1405 = vrot.lane.b32.xlu0 %v593_v63, %s4819_s30 }
  0x93   : > { %v5023_v4 = vpop.permute.xlu1 %1295  ;;  %v5025_v5 = vpop.permute.xlu0 %1293 }
  0x95   : > { %1411 = vrot.lane.b32.xlu1 %v596_v2, %s4819_s30  ;;  %1409 = vrot.lane.b32.xlu0 %v595_v3, %s4819_s30  ;;  %v626_v2 = vld [vmem:[%s4887_s29 + $0x2e8] sm:$0xff]  ;;  %v625_v3 = vld [vmem:[%s4887_s29 + $0x2e0] sm:$0xff] }
  0x97   : > { %v5031_v8 = vpop.permute.xlu1 %1299  ;;  %v5033_v9 = vpop.permute.xlu0 %1297 }
  0x99   : > { %1415 = vrot.lane.b32.xlu1 %v598_v6, %s4819_s30  ;;  %1413 = vrot.lane.b32.xlu0 %v597_v7, %s4819_s30 }
  0x9b   : > { %v5039_v12 = vpop.permute.xlu1 %1303  ;;  %v5041_v13 = vpop.permute.xlu0 %1301 }
  0x9d   : > { %1419 = vrot.lane.b32.xlu1 %v600_v10, %s4819_s30  ;;  %1417 = vrot.lane.b32.xlu0 %v599_v11, %s4819_s30  ;;  %v628_v10 = vld [vmem:[%s4887_s29 + $0x2f8] sm:$0xff]  ;;  %v627_v11 = vld [vmem:[%s4887_s29 + $0x2f0] sm:$0xff] }
  0x9f   : > { %v5047_v16 = vpop.permute.xlu1 %1307  ;;  %v5049_v17 = vpop.permute.xlu0 %1305 }
  0xa1   : > { %1423 = vrot.lane.b32.xlu1 %v602_v14, %s4819_s30  ;;  %1421 = vrot.lane.b32.xlu0 %v601_v15, %s4819_s30 }
  0xa3   : > { %v5055_v20 = vpop.permute.xlu1 %1311  ;;  %v5057_v21 = vpop.permute.xlu0 %1309 }
  0xa5   : > { %1427 = vrot.lane.b32.xlu1 %v604_v18, %s4819_s30  ;;  %1425 = vrot.lane.b32.xlu0 %v603_v19, %s4819_s30  ;;  %v630_v18 = vld [vmem:[%s4887_s29 + $0x308] sm:$0xff]  ;;  %v629_v19 = vld [vmem:[%s4887_s29 + $0x300] sm:$0xff] }
  0xa7   : > { %v5063_v24 = vpop.permute.xlu1 %1315  ;;  %v5065_v25 = vpop.permute.xlu0 %1313 }
  0xa9   : > { %1431 = vrot.lane.b32.xlu1 %v606_v22, %s4819_s30  ;;  %1429 = vrot.lane.b32.xlu0 %v605_v23, %s4819_s30 }
  0xab   : > { %v5071_v28 = vpop.permute.xlu1 %1319  ;;  %v5073_v29 = vpop.permute.xlu0 %1317 }
  0xad   : > { %1435 = vrot.lane.b32.xlu1 %v608_v26, %s4819_s30  ;;  %1433 = vrot.lane.b32.xlu0 %v607_v27, %s4819_s30  ;;  %v632_v26 = vld [vmem:[%s4887_s29 + $0x318] sm:$0xff]  ;;  %v631_v27 = vld [vmem:[%s4887_s29 + $0x310] sm:$0xff] }
  0xaf   : > { %v5079_v32 = vpop.permute.xlu1 %1323  ;;  %v5081_v33 = vpop.permute.xlu0 %1321 }
  0xb1   : > { %1439 = vrot.lane.b32.xlu1 %v610_v30, %s4819_s30  ;;  %1437 = vrot.lane.b32.xlu0 %v609_v31, %s4819_s30 }
  0xb3   : > { %v5087_v36 = vpop.permute.xlu1 %1327  ;;  %v5089_v37 = vpop.permute.xlu0 %1325 }
  0xb5   : > { %1443 = vrot.lane.b32.xlu1 %v612_v34, %s4819_s30  ;;  %1441 = vrot.lane.b32.xlu0 %v611_v35, %s4819_s30  ;;  %v634_v34 = vld [vmem:[%s4887_s29 + $0x328] sm:$0xff]  ;;  %v633_v35 = vld [vmem:[%s4887_s29 + $0x320] sm:$0xff] }
  0xb7   : > { %v5095_v40 = vpop.permute.xlu1 %1331  ;;  %v5097_v41 = vpop.permute.xlu0 %1329 }
  0xb9   : > { %1447 = vrot.lane.b32.xlu1 %v614_v38, %s4819_s30  ;;  %1445 = vrot.lane.b32.xlu0 %v613_v39, %s4819_s30 }
  0xbb   : > { %v5103_v44 = vpop.permute.xlu1 %1335  ;;  %v5105_v45 = vpop.permute.xlu0 %1333 }
  0xbd   : > { %1451 = vrot.lane.b32.xlu1 %v616_v42, %s4819_s30  ;;  %1449 = vrot.lane.b32.xlu0 %v615_v43, %s4819_s30  ;;  %v636_v42 = vld [vmem:[%s4887_s29 + $0x338] sm:$0xff]  ;;  %v635_v43 = vld [vmem:[%s4887_s29 + $0x330] sm:$0xff] }
  0xbf   : > { %v5111_v48 = vpop.permute.xlu1 %1339  ;;  %v5113_v49 = vpop.permute.xlu0 %1337 }
  0xc0   : > { %8506 = vst [vmem:[#allocation3_spill] sm:$0xff] %v5113_v49 }
  0xc1   : > { %1455 = vrot.lane.b32.xlu1 %v618_v46, %s4819_s30  ;;  %1453 = vrot.lane.b32.xlu0 %v617_v47, %s4819_s30 }
  0xc3   : > { %v5119_v52 = vpop.permute.xlu1 %1343  ;;  %v5121_v53 = vpop.permute.xlu0 %1341 }
  0xc4   : > { %8507 = vst [vmem:[#allocation4_spill] sm:$0xff] %v5119_v52  ;;  %8508 = vst [vmem:[#allocation5_spill] sm:$0xff] %v5121_v53  ;;  %v809_v52 = vld [vmem:[%s5527_s7 + $0x2c0] sm:$0xff] }
  0xc5   : > { %1459 = vrot.lane.b32.xlu1 %v620_v50, %s4819_s30  ;;  %1457 = vrot.lane.b32.xlu0 %v619_v51, %s4819_s30  ;;  %v638_v50 = vld [vmem:[%s4887_s29 + $0x348] sm:$0xff]  ;;  %v637_v51 = vld [vmem:[%s4887_s29 + $0x340] sm:$0xff] }
  0xc7   : > { %v5127_v56 = vpop.permute.xlu1 %1347  ;;  %v5129_v57 = vpop.permute.xlu0 %1345 }
  0xc8   : > { %8509 = vst [vmem:[#allocation6_spill] sm:$0xff] %v5127_v56  ;;  %8510 = vst [vmem:[#allocation7_spill] sm:$0xff] %v5129_v57  ;;  %v807_v56 = vld [vmem:[%s5527_s7 + $0x2b0] sm:$0xff] }
  0xc9   : > { %1463 = vrot.lane.b32.xlu1 %v622_v54, %s4819_s30  ;;  %1461 = vrot.lane.b32.xlu0 %v621_v55, %s4819_s30 }
  0xcb   : > { %v5135_v62 = vpop.permute.xlu1 %1351  ;;  %v5137_v63 = vpop.permute.xlu0 %1349 }
  0xcc   : > { %8511 = vst [vmem:[#allocation8_spill] sm:$0xff] %v5135_v62  ;;  %8512 = vst [vmem:[#allocation9_spill] sm:$0xff] %v5137_v63  ;;  %v805_v62 = vld [vmem:[%s5527_s7 + $0x2a0] sm:$0xff] }
  0xcd   : > { %1467 = vrot.lane.b32.xlu1 %v624_v58, %s4819_s30  ;;  %1465 = vrot.lane.b32.xlu0 %v623_v59, %s4819_s30  ;;  %v640_v58 = vld [vmem:[%s4887_s29 + $0x358] sm:$0xff]  ;;  %v639_v59 = vld [vmem:[%s4887_s29 + $0x350] sm:$0xff] }
  0xcf   : > { %v5143_v6 = vpop.permute.xlu1 %1355  ;;  %v5145_v7 = vpop.permute.xlu0 %1353 }
  0xd0   : > { %8513 = vst [vmem:[#allocation10_spill] sm:$0xff] %v5143_v6  ;;  %8514 = vst [vmem:[#allocation11_spill] sm:$0xff] %v5145_v7  ;;  %v803_v6 = vld [vmem:[%s5527_s7 + $0x290] sm:$0xff] }
  0xd1   : > { %1471 = vrot.lane.b32.xlu1 %v626_v2, %s4819_s30  ;;  %1469 = vrot.lane.b32.xlu0 %v625_v3, %s4819_s30 }
  0xd3   : > { %v5151_v14 = vpop.permute.xlu1 %1359  ;;  %v5153_v15 = vpop.permute.xlu0 %1357 }
  0xd4   : > { %8515 = vst [vmem:[#allocation12_spill] sm:$0xff] %v5151_v14  ;;  %8516 = vst [vmem:[#allocation13_spill] sm:$0xff] %v5153_v15  ;;  %v801_v14 = vld [vmem:[%s5527_s7 + $0x280] sm:$0xff] }
  0xd5   : > { %1475 = vrot.lane.b32.xlu1 %v628_v10, %s4819_s30  ;;  %1473 = vrot.lane.b32.xlu0 %v627_v11, %s4819_s30  ;;  %v642_v10 = vld [vmem:[%s4887_s29 + $0x368] sm:$0xff]  ;;  %v641_v11 = vld [vmem:[%s4887_s29 + $0x360] sm:$0xff] }
  0xd7   : > { %v5159_v22 = vpop.permute.xlu1 %1363  ;;  %v5161_v23 = vpop.permute.xlu0 %1361 }
  0xd8   : > { %8517 = vst [vmem:[#allocation14_spill] sm:$0xff] %v5159_v22  ;;  %8518 = vst [vmem:[#allocation15_spill] sm:$0xff] %v5161_v23  ;;  %v799_v22 = vld [vmem:[%s5527_s7 + $0x270] sm:$0xff] }
  0xd9   : > { %1479 = vrot.lane.b32.xlu1 %v630_v18, %s4819_s30  ;;  %1477 = vrot.lane.b32.xlu0 %v629_v19, %s4819_s30 }
  0xdb   : > { %v5167_v30 = vpop.permute.xlu1 %1367  ;;  %v5169_v31 = vpop.permute.xlu0 %1365 }
  0xdc   : > { %8519 = vst [vmem:[#allocation16_spill] sm:$0xff] %v5167_v30  ;;  %8520 = vst [vmem:[#allocation17_spill] sm:$0xff] %v5169_v31  ;;  %v797_v30 = vld [vmem:[%s5527_s7 + $0x260] sm:$0xff] }
  0xdd   : > { %1483 = vrot.lane.b32.xlu1 %v632_v26, %s4819_s30  ;;  %1481 = vrot.lane.b32.xlu0 %v631_v27, %s4819_s30  ;;  %v644_v26 = vld [vmem:[%s4887_s29 + $0x378] sm:$0xff]  ;;  %v643_v27 = vld [vmem:[%s4887_s29 + $0x370] sm:$0xff] }
  0xdf   : > { %v5175_v38 = vpop.permute.xlu1 %1371  ;;  %v5177_v39 = vpop.permute.xlu0 %1369 }
  0xe0   : > { %8521 = vst [vmem:[#allocation18_spill] sm:$0xff] %v5175_v38  ;;  %8522 = vst [vmem:[#allocation19_spill] sm:$0xff] %v5177_v39  ;;  %v795_v38 = vld [vmem:[%s5527_s7 + $0x250] sm:$0xff] }
  0xe1   : > { %1487 = vrot.lane.b32.xlu1 %v634_v34, %s4819_s30  ;;  %1485 = vrot.lane.b32.xlu0 %v633_v35, %s4819_s30 }
  0xe3   : > { %v5183_v46 = vpop.permute.xlu1 %1375  ;;  %v5185_v47 = vpop.permute.xlu0 %1373 }
  0xe4   : > { %8523 = vst [vmem:[#allocation20_spill] sm:$0xff] %v5183_v46  ;;  %8524 = vst [vmem:[#allocation21_spill] sm:$0xff] %v5185_v47  ;;  %v793_v46 = vld [vmem:[%s5527_s7 + $0x240] sm:$0xff] }
  0xe5   : > { %1491 = vrot.lane.b32.xlu1 %v636_v42, %s4819_s30  ;;  %1489 = vrot.lane.b32.xlu0 %v635_v43, %s4819_s30  ;;  %v646_v42 = vld [vmem:[%s4887_s29 + $0x388] sm:$0xff]  ;;  %v645_v43 = vld [vmem:[%s4887_s29 + $0x380] sm:$0xff] }
  0xe7   : > { %v5191_v54 = vpop.permute.xlu1 %1379  ;;  %v5193_v55 = vpop.permute.xlu0 %1377 }
  0xe8   : > { %8525 = vst [vmem:[#allocation22_spill] sm:$0xff] %v5191_v54  ;;  %8526 = vst [vmem:[#allocation23_spill] sm:$0xff] %v5193_v55  ;;  %v791_v54 = vld [vmem:[%s5527_s7 + $0x230] sm:$0xff] }
  0xe9   : > { %1495 = vrot.lane.b32.xlu1 %v638_v50, %s4819_s30  ;;  %1493 = vrot.lane.b32.xlu0 %v637_v51, %s4819_s30 }
  0xeb   : > { %v5199_v2 = vpop.permute.xlu1 %1383  ;;  %v5201_v3 = vpop.permute.xlu0 %1381 }
  0xec   : > { %8527 = vst [vmem:[#allocation24_spill] sm:$0xff] %v5199_v2  ;;  %8528 = vst [vmem:[#allocation25_spill] sm:$0xff] %v5201_v3  ;;  %v789_v2 = vld [vmem:[%s5527_s7 + $0x220] sm:$0xff] }
  0xed   : > { %1499 = vrot.lane.b32.xlu1 %v640_v58, %s4819_s30  ;;  %1497 = vrot.lane.b32.xlu0 %v639_v59, %s4819_s30  ;;  %v648_v58 = vld [vmem:[%s4887_s29 + $0x398] sm:$0xff]  ;;  %v647_v59 = vld [vmem:[%s4887_s29 + $0x390] sm:$0xff] }
  0xef   : > { %v5207_v18 = vpop.permute.xlu1 %1387  ;;  %v5209_v19 = vpop.permute.xlu0 %1385 }
  0xf0   : > { %8529 = vst [vmem:[#allocation26_spill] sm:$0xff] %v5207_v18  ;;  %8530 = vst [vmem:[#allocation27_spill] sm:$0xff] %v5209_v19  ;;  %v787_v18 = vld [vmem:[%s5527_s7 + $0x210] sm:$0xff] }
  0xf1   : > { %1503 = vrot.lane.b32.xlu1 %v642_v10, %s4819_s30  ;;  %1501 = vrot.lane.b32.xlu0 %v641_v11, %s4819_s30 }
  0xf3   : > { %v5215_v34 = vpop.permute.xlu1 %1391  ;;  %v5217_v35 = vpop.permute.xlu0 %1389 }
  0xf4   : > { %8531 = vst [vmem:[#allocation28_spill] sm:$0xff] %v5215_v34  ;;  %8532 = vst [vmem:[#allocation29_spill] sm:$0xff] %v5217_v35  ;;  %v785_v34 = vld [vmem:[%s5527_s7 + $0x200] sm:$0xff] }
  0xf5   : > { %1507 = vrot.lane.b32.xlu1 %v644_v26, %s4819_s30  ;;  %1505 = vrot.lane.b32.xlu0 %v643_v27, %s4819_s30  ;;  %v650_v26 = vld [vmem:[%s4887_s29 + $0x3a8] sm:$0xff]  ;;  %v649_v27 = vld [vmem:[%s4887_s29 + $0x3a0] sm:$0xff] }
  0xf7   : > { %v5223_v50 = vpop.permute.xlu1 %1395  ;;  %v5225_v51 = vpop.permute.xlu0 %1393 }
  0xf8   : > { %8533 = vst [vmem:[#allocation30_spill] sm:$0xff] %v5223_v50  ;;  %8534 = vst [vmem:[#allocation31_spill] sm:$0xff] %v5225_v51 }
  0xf9   : > { %1511 = vrot.lane.b32.xlu1 %v646_v42, %s4819_s30  ;;  %1509 = vrot.lane.b32.xlu0 %v645_v43, %s4819_s30  ;;  %v652_v43 = vld [vmem:[%s4887_s29 + $0x3b8] sm:$0xff] }
  0xfb   : > { %v5231_v10 = vpop.permute.xlu1 %1399  ;;  %v5233_v11 = vpop.permute.xlu0 %1397 }
  0xfc   : > { %8535 = vst [vmem:[#allocation32_spill] sm:$0xff] %v5231_v10  ;;  %8536 = vst [vmem:[#allocation33_spill] sm:$0xff] %v5233_v11  ;;  %v651_v10 = vld [vmem:[%s4887_s29 + $0x3b0] sm:$0xff] }
  0xfd   : > { %1515 = vrot.lane.b32.xlu1 %v648_v58, %s4819_s30  ;;  %1513 = vrot.lane.b32.xlu0 %v647_v59, %s4819_s30  ;;  %v654_v59 = vld [vmem:[%s4887_s29 + $0x3c8] sm:$0xff] }
  0xff   : > { %v5239_v51 = vpop.permute.xlu1 %1403  ;;  %v5241_v42 = vpop.permute.xlu0 %1401 }
 0x100   : > { %8537 = vst [vmem:[#allocation34_spill] sm:$0xff] %v5239_v51  ;;  %8538 = vst [vmem:[#allocation35_spill] sm:$0xff] %v5241_v42  ;;  %v653_v51 = vld [vmem:[%s4887_s29 + $0x3c0] sm:$0xff] }
 0x101   : > { %1519 = vrot.lane.b32.xlu1 %v650_v26, %s4819_s30  ;;  %1517 = vrot.lane.b32.xlu0 %v649_v27, %s4819_s30  ;;  %v656_v27 = vld [vmem:[%s4887_s29 + $0x3d8] sm:$0xff] }
 0x103   : > { %v5247_v11 = vpop.permute.xlu1 %1407  ;;  %v5249_v58 = vpop.permute.xlu0 %1405 }
 0x104   : > { %8539 = vst [vmem:[#allocation36_spill] sm:$0xff] %v5247_v11  ;;  %8540 = vst [vmem:[#allocation37_spill] sm:$0xff] %v5249_v58  ;;  %v655_v11 = vld [vmem:[%s4887_s29 + $0x3d0] sm:$0xff] }
 0x105   : > { %1523 = vrot.lane.b32.xlu1 %v652_v43, %s4819_s30  ;;  %1521 = vrot.lane.b32.xlu0 %v651_v10, %s4819_s30  ;;  %v658_v10 = vld [vmem:[%s4887_s29 + $0x3e8] sm:$0xff] }
 0x107   : > { %v5255_v42 = vpop.permute.xlu1 %1411  ;;  %v5257_v26 = vpop.permute.xlu0 %1409 }
 0x108   : > { %8541 = vst [vmem:[#allocation38_spill] sm:$0xff] %v5255_v42  ;;  %8542 = vst [vmem:[#allocation39_spill] sm:$0xff] %v5257_v26  ;;  %v657_v42 = vld [vmem:[%s4887_s29 + $0x3e0] sm:$0xff] }
 0x109   : > { %1527 = vrot.lane.b32.xlu1 %v654_v59, %s4819_s30  ;;  %1525 = vrot.lane.b32.xlu0 %v653_v51, %s4819_s30  ;;  %v660_v51 = vld [vmem:[%s4887_s29 + $0x3f8] sm:$0xff] }
 0x10b   : > { %v5263_v58 = vpop.permute.xlu1 %1415  ;;  %v5265_v43 = vpop.permute.xlu0 %1413 }
 0x10c   : > { %8543 = vst [vmem:[#allocation40_spill] sm:$0xff] %v5263_v58  ;;  %8544 = vst [vmem:[#allocation41_spill] sm:$0xff] %v5265_v43  ;;  %v659_v58 = vld [vmem:[%s4887_s29 + $0x3f0] sm:$0xff] }
 0x10d   : > { %1531 = vrot.lane.b32.xlu1 %v656_v27, %s4819_s30  ;;  %1529 = vrot.lane.b32.xlu0 %v655_v11, %s4819_s30  ;;  %v662_v11 = vld [vmem:[%s4887_s29 + $0x408] sm:$0xff] }
 0x10f   : > { %v5271_v26 = vpop.permute.xlu1 %1419  ;;  %v5273_v59 = vpop.permute.xlu0 %1417 }
 0x110   : > { %8545 = vst [vmem:[#allocation42_spill] sm:$0xff] %v5271_v26  ;;  %8546 = vst [vmem:[#allocation43_spill] sm:$0xff] %v5273_v59  ;;  %v661_v26 = vld [vmem:[%s4887_s29 + $0x400] sm:$0xff] }
 0x111   : > { %1535 = vrot.lane.b32.xlu1 %v658_v10, %s4819_s30  ;;  %1533 = vrot.lane.b32.xlu0 %v657_v42, %s4819_s30  ;;  %v664_v42 = vld [vmem:[%s4887_s29 + $0x418] sm:$0xff] }
 0x113   : > { %v5279_v43 = vpop.permute.xlu1 %1423  ;;  %v5281_v27 = vpop.permute.xlu0 %1421 }
 0x114   : > { %8547 = vst [vmem:[#allocation44_spill] sm:$0xff] %v5279_v43  ;;  %8548 = vst [vmem:[#allocation45_spill] sm:$0xff] %v5281_v27  ;;  %v663_v43 = vld [vmem:[%s4887_s29 + $0x410] sm:$0xff] }
 0x115   : > { %1539 = vrot.lane.b32.xlu1 %v660_v51, %s4819_s30  ;;  %1537 = vrot.lane.b32.xlu0 %v659_v58, %s4819_s30  ;;  %v666_v58 = vld [vmem:[%s4887_s29 + $0x428] sm:$0xff] }
 0x117   : > { %v5287_v59 = vpop.permute.xlu1 %1427  ;;  %v5289_v10 = vpop.permute.xlu0 %1425 }
 0x118   : > { %8549 = vst [vmem:[#allocation46_spill] sm:$0xff] %v5287_v59  ;;  %8550 = vst [vmem:[#allocation47_spill] sm:$0xff] %v5289_v10  ;;  %v665_v59 = vld [vmem:[%s4887_s29 + $0x420] sm:$0xff] }
 0x119   : > { %1543 = vrot.lane.b32.xlu1 %v662_v11, %s4819_s30  ;;  %1541 = vrot.lane.b32.xlu0 %v661_v26, %s4819_s30  ;;  %v668_v26 = vld [vmem:[%s4887_s29 + $0x438] sm:$0xff] }
 0x11b   : > { %v5295_v27 = vpop.permute.xlu1 %1431  ;;  %v5297_v51 = vpop.permute.xlu0 %1429 }
 0x11c   : > { %8551 = vst [vmem:[#allocation48_spill] sm:$0xff] %v5295_v27  ;;  %8552 = vst [vmem:[#allocation49_spill] sm:$0xff] %v5297_v51  ;;  %v667_v27 = vld [vmem:[%s4887_s29 + $0x430] sm:$0xff] }
 0x11d   : > { %1547 = vrot.lane.b32.xlu1 %v664_v42, %s4819_s30  ;;  %1545 = vrot.lane.b32.xlu0 %v663_v43, %s4819_s30  ;;  %v670_v43 = vld [vmem:[%s4887_s29 + $0x448] sm:$0xff] }
 0x11f   : > { %v5303_v10 = vpop.permute.xlu1 %1435  ;;  %v5305_v11 = vpop.permute.xlu0 %1433 }
 0x120   : > { %8553 = vst [vmem:[#allocation50_spill] sm:$0xff] %v5303_v10  ;;  %8554 = vst [vmem:[#allocation51_spill] sm:$0xff] %v5305_v11  ;;  %v669_v10 = vld [vmem:[%s4887_s29 + $0x440] sm:$0xff] }
 0x121   : > { %1551 = vrot.lane.b32.xlu1 %v666_v58, %s4819_s30  ;;  %1549 = vrot.lane.b32.xlu0 %v665_v59, %s4819_s30  ;;  %v672_v59 = vld [vmem:[%s4887_s29 + $0x458] sm:$0xff] }
 0x123   : > { %v5311_v51 = vpop.permute.xlu1 %1439  ;;  %v5313_v42 = vpop.permute.xlu0 %1437 }
 0x124   : > { %8555 = vst [vmem:[#allocation52_spill] sm:$0xff] %v5311_v51  ;;  %8556 = vst [vmem:[#allocation53_spill] sm:$0xff] %v5313_v42  ;;  %v671_v51 = vld [vmem:[%s4887_s29 + $0x450] sm:$0xff] }
 0x125   : > { %1555 = vrot.lane.b32.xlu1 %v668_v26, %s4819_s30  ;;  %1553 = vrot.lane.b32.xlu0 %v667_v27, %s4819_s30  ;;  %v674_v27 = vld [vmem:[%s4887_s29 + $0x468] sm:$0xff] }
 0x127   : > { %v5319_v11 = vpop.permute.xlu1 %1443  ;;  %v5321_v58 = vpop.permute.xlu0 %1441 }
 0x128   : > { %8557 = vst [vmem:[#allocation54_spill] sm:$0xff] %v5319_v11  ;;  %8558 = vst [vmem:[#allocation55_spill] sm:$0xff] %v5321_v58  ;;  %v673_v11 = vld [vmem:[%s4887_s29 + $0x460] sm:$0xff] }
 0x129   : > { %1559 = vrot.lane.b32.xlu1 %v670_v43, %s4819_s30  ;;  %1557 = vrot.lane.b32.xlu0 %v669_v10, %s4819_s30  ;;  %v676_v10 = vld [vmem:[%s4887_s29 + $0x478] sm:$0xff] }
 0x12b   : > { %v5327_v42 = vpop.permute.xlu1 %1447  ;;  %v5329_v26 = vpop.permute.xlu0 %1445 }
 0x12c   : > { %8559 = vst [vmem:[#allocation56_spill] sm:$0xff] %v5327_v42  ;;  %8560 = vst [vmem:[#allocation57_spill] sm:$0xff] %v5329_v26  ;;  %v675_v42 = vld [vmem:[%s4887_s29 + $0x470] sm:$0xff] }
 0x12d   : > { %1563 = vrot.lane.b32.xlu1 %v672_v59, %s4819_s30  ;;  %1561 = vrot.lane.b32.xlu0 %v671_v51, %s4819_s30  ;;  %v678_v51 = vld [vmem:[%s4887_s29 + $0x488] sm:$0xff] }
 0x12f   : > { %v5335_v58 = vpop.permute.xlu1 %1451  ;;  %v5337_v43 = vpop.permute.xlu0 %1449 }
 0x130   : > { %8561 = vst [vmem:[#allocation58_spill] sm:$0xff] %v5335_v58  ;;  %8562 = vst [vmem:[#allocation59_spill] sm:$0xff] %v5337_v43  ;;  %v677_v58 = vld [vmem:[%s4887_s29 + $0x480] sm:$0xff] }
 0x131   : > { %1567 = vrot.lane.b32.xlu1 %v674_v27, %s4819_s30  ;;  %1565 = vrot.lane.b32.xlu0 %v673_v11, %s4819_s30  ;;  %v680_v11 = vld [vmem:[%s4887_s29 + $0x498] sm:$0xff] }
 0x133   : > { %v5343_v26 = vpop.permute.xlu1 %1455  ;;  %v5345_v59 = vpop.permute.xlu0 %1453 }
 0x134   : > { %8563 = vst [vmem:[#allocation60_spill] sm:$0xff] %v5343_v26  ;;  %8564 = vst [vmem:[#allocation61_spill] sm:$0xff] %v5345_v59  ;;  %v679_v26 = vld [vmem:[%s4887_s29 + $0x490] sm:$0xff] }
 0x135   : > { %1571 = vrot.lane.b32.xlu1 %v676_v10, %s4819_s30  ;;  %1569 = vrot.lane.b32.xlu0 %v675_v42, %s4819_s30  ;;  %v682_v42 = vld [vmem:[%s4887_s29 + $0x4a8] sm:$0xff] }
 0x137   : > { %v5351_v43 = vpop.permute.xlu1 %1459  ;;  %v5353_v27 = vpop.permute.xlu0 %1457 }
 0x138   : > { %8565 = vst [vmem:[#allocation62_spill] sm:$0xff] %v5351_v43  ;;  %8566 = vst [vmem:[#allocation63_spill] sm:$0xff] %v5353_v27  ;;  %v681_v43 = vld [vmem:[%s4887_s29 + $0x4a0] sm:$0xff] }
 0x139   : > { %1575 = vrot.lane.b32.xlu1 %v678_v51, %s4819_s30  ;;  %1573 = vrot.lane.b32.xlu0 %v677_v58, %s4819_s30  ;;  %v684_v58 = vld [vmem:[%s4887_s29 + $0x4b8] sm:$0xff] }
 0x13b   : > { %v5359_v59 = vpop.permute.xlu1 %1463  ;;  %v5361_v10 = vpop.permute.xlu0 %1461 }
 0x13c   : > { %8567 = vst [vmem:[#allocation64_spill] sm:$0xff] %v5359_v59  ;;  %8568 = vst [vmem:[#allocation65_spill] sm:$0xff] %v5361_v10  ;;  %v683_v59 = vld [vmem:[%s4887_s29 + $0x4b0] sm:$0xff] }
 0x13d   : > { %1579 = vrot.lane.b32.xlu1 %v680_v11, %s4819_s30  ;;  %1577 = vrot.lane.b32.xlu0 %v679_v26, %s4819_s30  ;;  %v686_v26 = vld [vmem:[%s4887_s29 + $0x4c8] sm:$0xff] }
 0x13f   : > { %v5367_v27 = vpop.permute.xlu1 %1467  ;;  %v5369_v51 = vpop.permute.xlu0 %1465 }
 0x140   : > { %8569 = vst [vmem:[#allocation66_spill] sm:$0xff] %v5367_v27  ;;  %8570 = vst [vmem:[#allocation67_spill] sm:$0xff] %v5369_v51  ;;  %v685_v27 = vld [vmem:[%s4887_s29 + $0x4c0] sm:$0xff] }
 0x141   : > { %1583 = vrot.lane.b32.xlu1 %v682_v42, %s4819_s30  ;;  %1581 = vrot.lane.b32.xlu0 %v681_v43, %s4819_s30  ;;  %v688_v43 = vld [vmem:[%s4887_s29 + $0x4d8] sm:$0xff] }
 0x143   : > { %v5375_v10 = vpop.permute.xlu1 %1471  ;;  %v5377_v11 = vpop.permute.xlu0 %1469 }
 0x144   : > { %8571 = vst [vmem:[#allocation68_spill] sm:$0xff] %v5375_v10  ;;  %8572 = vst [vmem:[#allocation69_spill] sm:$0xff] %v5377_v11  ;;  %v687_v10 = vld [vmem:[%s4887_s29 + $0x4d0] sm:$0xff] }
 0x145   : > { %1587 = vrot.lane.b32.xlu1 %v684_v58, %s4819_s30  ;;  %1585 = vrot.lane.b32.xlu0 %v683_v59, %s4819_s30  ;;  %v690_v59 = vld [vmem:[%s4887_s29 + $0x4e8] sm:$0xff] }
 0x147   : > { %v5383_v51 = vpop.permute.xlu1 %1475  ;;  %v5385_v42 = vpop.permute.xlu0 %1473 }
 0x148   : > { %8573 = vst [vmem:[#allocation70_spill] sm:$0xff] %v5383_v51  ;;  %8574 = vst [vmem:[#allocation71_spill] sm:$0xff] %v5385_v42  ;;  %v689_v51 = vld [vmem:[%s4887_s29 + $0x4e0] sm:$0xff] }
 0x149   : > { %1591 = vrot.lane.b32.xlu1 %v686_v26, %s4819_s30  ;;  %1589 = vrot.lane.b32.xlu0 %v685_v27, %s4819_s30  ;;  %v692_v27 = vld [vmem:[%s4887_s29 + $0x4f8] sm:$0xff] }
 0x14b   : > { %v5391_v11 = vpop.permute.xlu1 %1479  ;;  %v5393_v58 = vpop.permute.xlu0 %1477 }
 0x14c   : > { %8575 = vst [vmem:[#allocation72_spill] sm:$0xff] %v5391_v11  ;;  %8576 = vst [vmem:[#allocation73_spill] sm:$0xff] %v5393_v58  ;;  %v691_v11 = vld [vmem:[%s4887_s29 + $0x4f0] sm:$0xff] }
 0x14d   : > { %1595 = vrot.lane.b32.xlu1 %v688_v43, %s4819_s30  ;;  %1593 = vrot.lane.b32.xlu0 %v687_v10, %s4819_s30  ;;  %v694_v10 = vld [vmem:[%s4887_s29 + $0x508] sm:$0xff] }
 0x14f   : > { %v5399_v42 = vpop.permute.xlu1 %1483  ;;  %v5401_v26 = vpop.permute.xlu0 %1481 }
 0x150   : > { %8577 = vst [vmem:[#allocation74_spill] sm:$0xff] %v5399_v42  ;;  %8578 = vst [vmem:[#allocation75_spill] sm:$0xff] %v5401_v26  ;;  %v693_v42 = vld [vmem:[%s4887_s29 + $0x500] sm:$0xff] }
 0x151   : > { %1599 = vrot.lane.b32.xlu1 %v690_v59, %s4819_s30  ;;  %1597 = vrot.lane.b32.xlu0 %v689_v51, %s4819_s30  ;;  %v696_v51 = vld [vmem:[%s4887_s29 + $0x518] sm:$0xff] }
 0x153   : > { %v5407_v58 = vpop.permute.xlu1 %1487  ;;  %v5409_v43 = vpop.permute.xlu0 %1485 }
 0x154   : > { %8579 = vst [vmem:[#allocation76_spill] sm:$0xff] %v5407_v58  ;;  %8580 = vst [vmem:[#allocation77_spill] sm:$0xff] %v5409_v43  ;;  %v695_v58 = vld [vmem:[%s4887_s29 + $0x510] sm:$0xff] }
 0x155   : > { %1603 = vrot.lane.b32.xlu1 %v692_v27, %s4819_s30  ;;  %1601 = vrot.lane.b32.xlu0 %v691_v11, %s4819_s30  ;;  %v698_v11 = vld [vmem:[%s4887_s29 + $0x528] sm:$0xff] }
 0x157   : > { %v5415_v26 = vpop.permute.xlu1 %1491  ;;  %v5417_v59 = vpop.permute.xlu0 %1489 }
 0x158   : > { %8581 = vst [vmem:[#allocation78_spill] sm:$0xff] %v5415_v26  ;;  %8582 = vst [vmem:[#allocation79_spill] sm:$0xff] %v5417_v59  ;;  %v697_v26 = vld [vmem:[%s4887_s29 + $0x520] sm:$0xff] }
 0x159   : > { %1607 = vrot.lane.b32.xlu1 %v694_v10, %s4819_s30  ;;  %1605 = vrot.lane.b32.xlu0 %v693_v42, %s4819_s30  ;;  %v700_v42 = vld [vmem:[%s4887_s29 + $0x538] sm:$0xff] }
 0x15b   : > { %v5423_v43 = vpop.permute.xlu1 %1495  ;;  %v5425_v27 = vpop.permute.xlu0 %1493 }
 0x15c   : > { %8583 = vst [vmem:[#allocation80_spill] sm:$0xff] %v5423_v43  ;;  %8584 = vst [vmem:[#allocation81_spill] sm:$0xff] %v5425_v27  ;;  %v699_v43 = vld [vmem:[%s4887_s29 + $0x530] sm:$0xff] }
 0x15d   : > { %1611 = vrot.lane.b32.xlu1 %v696_v51, %s4819_s30  ;;  %1609 = vrot.lane.b32.xlu0 %v695_v58, %s4819_s30  ;;  %v702_v58 = vld [vmem:[%s4887_s29 + $0x548] sm:$0xff] }
 0x15f   : > { %v5431_v59 = vpop.permute.xlu1 %1499  ;;  %v5433_v10 = vpop.permute.xlu0 %1497 }
 0x160   : > { %8585 = vst [vmem:[#allocation82_spill] sm:$0xff] %v5431_v59  ;;  %8586 = vst [vmem:[#allocation83_spill] sm:$0xff] %v5433_v10  ;;  %v701_v59 = vld [vmem:[%s4887_s29 + $0x540] sm:$0xff] }
 0x161   : > { %1615 = vrot.lane.b32.xlu1 %v698_v11, %s4819_s30  ;;  %1613 = vrot.lane.b32.xlu0 %v697_v26, %s4819_s30  ;;  %v704_v26 = vld [vmem:[%s4887_s29 + $0x558] sm:$0xff] }
 0x163   : > { %v5439_v27 = vpop.permute.xlu1 %1503  ;;  %v5441_v51 = vpop.permute.xlu0 %1501 }
 0x164   : > { %8587 = vst [vmem:[#allocation84_spill] sm:$0xff] %v5439_v27  ;;  %8588 = vst [vmem:[#allocation85_spill] sm:$0xff] %v5441_v51  ;;  %v703_v27 = vld [vmem:[%s4887_s29 + $0x550] sm:$0xff] }
 0x165   : > { %1619 = vrot.lane.b32.xlu1 %v700_v42, %s4819_s30  ;;  %1617 = vrot.lane.b32.xlu0 %v699_v43, %s4819_s30  ;;  %v706_v43 = vld [vmem:[%s4887_s29 + $0x568] sm:$0xff] }
 0x167   : > { %v5447_v10 = vpop.permute.xlu1 %1507  ;;  %v5449_v11 = vpop.permute.xlu0 %1505 }
 0x168   : > { %8589 = vst [vmem:[#allocation86_spill] sm:$0xff] %v5447_v10  ;;  %8590 = vst [vmem:[#allocation87_spill] sm:$0xff] %v5449_v11  ;;  %v705_v10 = vld [vmem:[%s4887_s29 + $0x560] sm:$0xff] }
 0x169   : > { %1623 = vrot.lane.b32.xlu1 %v702_v58, %s4819_s30  ;;  %1621 = vrot.lane.b32.xlu0 %v701_v59, %s4819_s30  ;;  %v708_v59 = vld [vmem:[%s4887_s29 + $0x578] sm:$0xff] }
 0x16b   : > { %v5455_v51 = vpop.permute.xlu1 %1511  ;;  %v5457_v42 = vpop.permute.xlu0 %1509 }
 0x16c   : > { %8591 = vst [vmem:[#allocation88_spill] sm:$0xff] %v5455_v51  ;;  %8592 = vst [vmem:[#allocation89_spill] sm:$0xff] %v5457_v42  ;;  %v707_v51 = vld [vmem:[%s4887_s29 + $0x570] sm:$0xff] }
 0x16d   : > { %1627 = vrot.lane.b32.xlu1 %v704_v26, %s4819_s30  ;;  %1625 = vrot.lane.b32.xlu0 %v703_v27, %s4819_s30  ;;  %v710_v27 = vld [vmem:[%s4887_s29 + $0x588] sm:$0xff] }
 0x16f   : > { %v5463_v11 = vpop.permute.xlu1 %1515  ;;  %v5465_v58 = vpop.permute.xlu0 %1513 }
 0x170   : > { %8593 = vst [vmem:[#allocation90_spill] sm:$0xff] %v5463_v11  ;;  %8594 = vst [vmem:[#allocation91_spill] sm:$0xff] %v5465_v58  ;;  %v709_v11 = vld [vmem:[%s4887_s29 + $0x580] sm:$0xff] }
 0x171   : > { %1631 = vrot.lane.b32.xlu1 %v706_v43, %s4819_s30  ;;  %1629 = vrot.lane.b32.xlu0 %v705_v10, %s4819_s30  ;;  %v712_v10 = vld [vmem:[%s4887_s29 + $0x598] sm:$0xff] }
 0x173   : > { %v5471_v42 = vpop.permute.xlu1 %1519  ;;  %v5473_v26 = vpop.permute.xlu0 %1517 }
 0x174   : > { %8595 = vst [vmem:[#allocation92_spill] sm:$0xff] %v5471_v42  ;;  %8596 = vst [vmem:[#allocation93_spill] sm:$0xff] %v5473_v26  ;;  %v711_v42 = vld [vmem:[%s4887_s29 + $0x590] sm:$0xff] }
 0x175   : > { %1635 = vrot.lane.b32.xlu1 %v708_v59, %s4819_s30  ;;  %1633 = vrot.lane.b32.xlu0 %v707_v51, %s4819_s30  ;;  %v714_v51 = vld [vmem:[%s4887_s29 + $0x5a8] sm:$0xff] }
 0x177   : > { %v5479_v58 = vpop.permute.xlu1 %1523  ;;  %v5481_v43 = vpop.permute.xlu0 %1521 }
 0x178   : > { %8597 = vst [vmem:[#allocation94_spill] sm:$0xff] %v5479_v58  ;;  %8598 = vst [vmem:[#allocation95_spill] sm:$0xff] %v5481_v43  ;;  %v713_v58 = vld [vmem:[%s4887_s29 + $0x5a0] sm:$0xff] }
 0x179   : > { %1639 = vrot.lane.b32.xlu1 %v710_v27, %s4819_s30  ;;  %1637 = vrot.lane.b32.xlu0 %v709_v11, %s4819_s30  ;;  %v716_v11 = vld [vmem:[%s4887_s29 + $0x5b8] sm:$0xff] }
 0x17b   : > { %v5487_v26 = vpop.permute.xlu1 %1527  ;;  %v5489_v59 = vpop.permute.xlu0 %1525 }
 0x17c   : > { %8599 = vst [vmem:[#allocation96_spill] sm:$0xff] %v5487_v26  ;;  %8600 = vst [vmem:[#allocation97_spill] sm:$0xff] %v5489_v59  ;;  %v715_v59 = vld [vmem:[%s4887_s29 + $0x5b0] sm:$0xff] }
 0x17d   : > { %1643 = vrot.lane.b32.xlu1 %v712_v10, %s4819_s30  ;;  %1641 = vrot.lane.b32.xlu0 %v711_v42, %s4819_s30  ;;  %v718_v42 = vld [vmem:[%s4887_s29 + $0x5c8] sm:$0xff] }
 0x17f   : > { %v5495_v43 = vpop.permute.xlu1 %1531  ;;  %v5497_v27 = vpop.permute.xlu0 %1529 }
 0x180   : > { %8601 = vst [vmem:[#allocation98_spill] sm:$0xff] %v5495_v43  ;;  %8602 = vst [vmem:[#allocation99_spill] sm:$0xff] %v5497_v27  ;;  %v717_v43 = vld [vmem:[%s4887_s29 + $0x5c0] sm:$0xff] }
 0x181   : > { %1647 = vrot.lane.b32.xlu1 %v714_v51, %s4819_s30  ;;  %1645 = vrot.lane.b32.xlu0 %v713_v58, %s4819_s30  ;;  %v720_v58 = vld [vmem:[%s4887_s29 + $0x5d8] sm:$0xff]  ;;  %v719_v51 = vld [vmem:[%s4887_s29 + $0x5d0] sm:$0xff]  ;;  %s8301_s29 = scalar_lea.vmem (%p4872_p4), %s8504_s4, %s4636_s26  }
 0x183   : > { %v5503_v26 = vpop.permute.xlu1 %1535  ;;  %v5505_v10 = vpop.permute.xlu0 %1533 }
 0x184   : > { %8603 = vst [vmem:[#allocation100_spill] sm:$0xff] %v5503_v26  ;;  %8604 = vst [vmem:[#allocation101_spill] sm:$0xff] %v5505_v10 }
 0x185   : > { %1651 = vrot.lane.b32.xlu1 %v716_v11, %s4819_s30  ;;  %1649 = vrot.lane.b32.xlu0 %v715_v59, %s4819_s30  ;;  %v721_v59 = vld [vmem:[%s5527_s7] sm:$0xff] }
 0x187   : > { %v5511_v50 = vpop.permute.xlu1 %1539  ;;  %v5513_v27 = vpop.permute.xlu0 %1537 }
 0x188   : > { %8605 = vst [vmem:[#allocation102_spill] sm:$0xff] %v5511_v50  ;;  %8606 = vst [vmem:[#allocation103_spill] sm:$0xff] %v5513_v27  ;;  %v783_v50 = vld [vmem:[%s5527_s7 + $0x1f0] sm:$0xff] }
 0x189   : > { %1655 = vrot.lane.b32.xlu1 %v718_v42, %s4819_s30  ;;  %1653 = vrot.lane.b32.xlu0 %v717_v43, %s4819_s30  ;;  %v722_v43 = vld [vmem:[%s5527_s7 + $0x8] sm:$0xff] }
 0x18b   : > { %v5519_v35 = vpop.permute.xlu1 %1543  ;;  %v5521_v26 = vpop.permute.xlu0 %1541 }
 0x18c   : > { %8607 = vst [vmem:[#allocation104_spill] sm:$0xff] %v5519_v35  ;;  %8608 = vst [vmem:[#allocation105_spill] sm:$0xff] %v5521_v26  ;;  %v724_v26 = vld [vmem:[%s5527_s7 + $0x18] sm:$0xff]  ;;  %v723_v35 = vld [vmem:[%s5527_s7 + $0x10] sm:$0xff] }
 0x18d   : > { %1659 = vrot.lane.b32.xlu1 %v720_v58, %s4819_s30  ;;  %1657 = vrot.lane.b32.xlu0 %v719_v51, %s4819_s30  ;;  %v726_v51 = vld [vmem:[%s5527_s7 + $0x28] sm:$0xff] }
 0x18f   : > { %v5533_v11 = vpop.permute.xlu1 %1547  ;;  %v5535_v42 = vpop.permute.xlu0 %1545 }
 0x190   : > { %8609 = vst [vmem:[#allocation106_spill] sm:$0xff] %v5533_v11  ;;  %8610 = vst [vmem:[#allocation107_spill] sm:$0xff] %v5535_v42  ;;  %v725_v42 = vld [vmem:[%s5527_s7 + $0x20] sm:$0xff] }
 0x191   : > { %2039 = vrot.lane.b32.xlu1 %v722_v43, %s4820_s8  ;;  %2037 = vrot.lane.b32.xlu0 %v721_v59, %s4820_s8  ;;  %v728_v59 = vld [vmem:[%s5527_s7 + $0x38] sm:$0xff] }
 0x193   : > { %v5541_v27 = vpop.permute.xlu1 %1551  ;;  %v5543_v58 = vpop.permute.xlu0 %1549 }
 0x194   : > { %8611 = vst [vmem:[#allocation108_spill] sm:$0xff] %v5541_v27  ;;  %8612 = vst [vmem:[#allocation109_spill] sm:$0xff] %v5543_v58  ;;  %v727_v27 = vld [vmem:[%s5527_s7 + $0x30] sm:$0xff] }
 0x195   : > { %2043 = vrot.lane.b32.xlu1 %v724_v26, %s4820_s8  ;;  %2041 = vrot.lane.b32.xlu0 %v723_v35, %s4820_s8  ;;  %v730_v35 = vld [vmem:[%s5527_s7 + $0x48] sm:$0xff] }
 0x197   : > { %v5549_v11 = vpop.permute.xlu1 %1555  ;;  %v5551_v43 = vpop.permute.xlu0 %1553 }
 0x198   : > { %8613 = vst [vmem:[#allocation110_spill] sm:$0xff] %v5549_v11  ;;  %8614 = vst [vmem:[#allocation111_spill] sm:$0xff] %v5551_v43  ;;  %v729_v11 = vld [vmem:[%s5527_s7 + $0x40] sm:$0xff] }
 0x199   : > { %2047 = vrot.lane.b32.xlu1 %v726_v51, %s4820_s8  ;;  %2045 = vrot.lane.b32.xlu0 %v725_v42, %s4820_s8  ;;  %v732_v42 = vld [vmem:[%s5527_s7 + $0x58] sm:$0xff] }
 0x19b   : > { %v5557_v58 = vpop.permute.xlu1 %1559  ;;  %v5559_v26 = vpop.permute.xlu0 %1557 }
 0x19c   : > { %8615 = vst [vmem:[#allocation112_spill] sm:$0xff] %v5557_v58  ;;  %8616 = vst [vmem:[#allocation113_spill] sm:$0xff] %v5559_v26  ;;  %v731_v58 = vld [vmem:[%s5527_s7 + $0x50] sm:$0xff] }
 0x19d   : > { %2051 = vrot.lane.b32.xlu1 %v728_v59, %s4820_s8  ;;  %2049 = vrot.lane.b32.xlu0 %v727_v27, %s4820_s8  ;;  %v734_v27 = vld [vmem:[%s5527_s7 + $0x68] sm:$0xff] }
 0x19f   : > { %v5565_v43 = vpop.permute.xlu1 %1563  ;;  %v5567_v51 = vpop.permute.xlu0 %1561 }
 0x1a0   : > { %8617 = vst [vmem:[#allocation114_spill] sm:$0xff] %v5565_v43  ;;  %8618 = vst [vmem:[#allocation115_spill] sm:$0xff] %v5567_v51  ;;  %v733_v43 = vld [vmem:[%s5527_s7 + $0x60] sm:$0xff] }
 0x1a1   : > { %2055 = vrot.lane.b32.xlu1 %v730_v35, %s4820_s8  ;;  %2053 = vrot.lane.b32.xlu0 %v729_v11, %s4820_s8  ;;  %v736_v11 = vld [vmem:[%s5527_s7 + $0x78] sm:$0xff] }
 0x1a3   : > { %v5573_v26 = vpop.permute.xlu1 %1567  ;;  %v5575_v59 = vpop.permute.xlu0 %1565 }
 0x1a4   : > { %8619 = vst [vmem:[#allocation116_spill] sm:$0xff] %v5573_v26  ;;  %8620 = vst [vmem:[#allocation117_spill] sm:$0xff] %v5575_v59  ;;  %v735_v26 = vld [vmem:[%s5527_s7 + $0x70] sm:$0xff] }
 0x1a5   : > { %2059 = vrot.lane.b32.xlu1 %v732_v42, %s4820_s8  ;;  %2057 = vrot.lane.b32.xlu0 %v731_v58, %s4820_s8  ;;  %v738_v58 = vld [vmem:[%s5527_s7 + $0x88] sm:$0xff] }
 0x1a7   : > { %v5581_v51 = vpop.permute.xlu1 %1571  ;;  %v5583_v35 = vpop.permute.xlu0 %1569 }
 0x1a8   : > { %8621 = vst [vmem:[#allocation118_spill] sm:$0xff] %v5581_v51  ;;  %8622 = vst [vmem:[#allocation119_spill] sm:$0xff] %v5583_v35  ;;  %v737_v51 = vld [vmem:[%s5527_s7 + $0x80] sm:$0xff] }
 0x1a9   : > { %2063 = vrot.lane.b32.xlu1 %v734_v27, %s4820_s8  ;;  %2061 = vrot.lane.b32.xlu0 %v733_v43, %s4820_s8  ;;  %v740_v43 = vld [vmem:[%s5527_s7 + $0x98] sm:$0xff] }
 0x1ab   : > { %v5589_v59 = vpop.permute.xlu1 %1575  ;;  %v5591_v42 = vpop.permute.xlu0 %1573 }
 0x1ac   : > { %8623 = vst [vmem:[#allocation120_spill] sm:$0xff] %v5589_v59  ;;  %8624 = vst [vmem:[#allocation121_spill] sm:$0xff] %v5591_v42  ;;  %v739_v59 = vld [vmem:[%s5527_s7 + $0x90] sm:$0xff] }
 0x1ad   : > { %2067 = vrot.lane.b32.xlu1 %v736_v11, %s4820_s8  ;;  %2065 = vrot.lane.b32.xlu0 %v735_v26, %s4820_s8  ;;  %v742_v26 = vld [vmem:[%s5527_s7 + $0xa8] sm:$0xff] }
 0x1af   : > { %v5597_v35 = vpop.permute.xlu1 %1579  ;;  %v5599_v27 = vpop.permute.xlu0 %1577 }
 0x1b0   : > { %8625 = vst [vmem:[#allocation122_spill] sm:$0xff] %v5597_v35  ;;  %8626 = vst [vmem:[#allocation123_spill] sm:$0xff] %v5599_v27  ;;  %v741_v35 = vld [vmem:[%s5527_s7 + $0xa0] sm:$0xff] }
 0x1b1   : > { %2071 = vrot.lane.b32.xlu1 %v738_v58, %s4820_s8  ;;  %2069 = vrot.lane.b32.xlu0 %v737_v51, %s4820_s8  ;;  %v744_v51 = vld [vmem:[%s5527_s7 + $0xb8] sm:$0xff] }
 0x1b3   : > { %v5605_v42 = vpop.permute.xlu1 %1583  ;;  %v5607_v11 = vpop.permute.xlu0 %1581 }
 0x1b4   : > { %8627 = vst [vmem:[#allocation124_spill] sm:$0xff] %v5605_v42  ;;  %8628 = vst [vmem:[#allocation125_spill] sm:$0xff] %v5607_v11  ;;  %v743_v42 = vld [vmem:[%s5527_s7 + $0xb0] sm:$0xff] }
 0x1b5   : > { %2075 = vrot.lane.b32.xlu1 %v740_v43, %s4820_s8  ;;  %2073 = vrot.lane.b32.xlu0 %v739_v59, %s4820_s8  ;;  %v746_v59 = vld [vmem:[%s5527_s7 + $0xc8] sm:$0xff] }
 0x1b7   : > { %v5613_v27 = vpop.permute.xlu1 %1587  ;;  %v5615_v58 = vpop.permute.xlu0 %1585 }
 0x1b8   : > { %8629 = vst [vmem:[#allocation126_spill] sm:$0xff] %v5613_v27  ;;  %8630 = vst [vmem:[#allocation127_spill] sm:$0xff] %v5615_v58  ;;  %v745_v27 = vld [vmem:[%s5527_s7 + $0xc0] sm:$0xff] }
 0x1b9   : > { %2079 = vrot.lane.b32.xlu1 %v742_v26, %s4820_s8  ;;  %2077 = vrot.lane.b32.xlu0 %v741_v35, %s4820_s8  ;;  %v748_v35 = vld [vmem:[%s5527_s7 + $0xd8] sm:$0xff] }
 0x1bb   : > { %v5621_v11 = vpop.permute.xlu1 %1591  ;;  %v5623_v43 = vpop.permute.xlu0 %1589 }
 0x1bc   : > { %8631 = vst [vmem:[#allocation128_spill] sm:$0xff] %v5621_v11  ;;  %8632 = vst [vmem:[#allocation129_spill] sm:$0xff] %v5623_v43  ;;  %v747_v11 = vld [vmem:[%s5527_s7 + $0xd0] sm:$0xff] }
 0x1bd   : > { %2083 = vrot.lane.b32.xlu1 %v744_v51, %s4820_s8  ;;  %2081 = vrot.lane.b32.xlu0 %v743_v42, %s4820_s8  ;;  %v750_v42 = vld [vmem:[%s5527_s7 + $0xe8] sm:$0xff] }
 0x1bf   : > { %v5629_v58 = vpop.permute.xlu1 %1595  ;;  %v5631_v26 = vpop.permute.xlu0 %1593 }
 0x1c0   : > { %8633 = vst [vmem:[#allocation130_spill] sm:$0xff] %v5629_v58  ;;  %8634 = vst [vmem:[#allocation131_spill] sm:$0xff] %v5631_v26  ;;  %v749_v58 = vld [vmem:[%s5527_s7 + $0xe0] sm:$0xff] }
 0x1c1   : > { %2087 = vrot.lane.b32.xlu1 %v746_v59, %s4820_s8  ;;  %2085 = vrot.lane.b32.xlu0 %v745_v27, %s4820_s8  ;;  %v752_v27 = vld [vmem:[%s5527_s7 + $0xf8] sm:$0xff] }
 0x1c3   : > { %v5637_v43 = vpop.permute.xlu1 %1599  ;;  %v5639_v51 = vpop.permute.xlu0 %1597 }
 0x1c4   : > { %8635 = vst [vmem:[#allocation132_spill] sm:$0xff] %v5637_v43  ;;  %8636 = vst [vmem:[#allocation133_spill] sm:$0xff] %v5639_v51  ;;  %v751_v43 = vld [vmem:[%s5527_s7 + $0xf0] sm:$0xff] }
 0x1c5   : > { %2091 = vrot.lane.b32.xlu1 %v748_v35, %s4820_s8  ;;  %2089 = vrot.lane.b32.xlu0 %v747_v11, %s4820_s8  ;;  %v754_v11 = vld [vmem:[%s5527_s7 + $0x108] sm:$0xff] }
 0x1c7   : > { %v5645_v26 = vpop.permute.xlu1 %1603  ;;  %v5647_v59 = vpop.permute.xlu0 %1601 }
 0x1c8   : > { %8637 = vst [vmem:[#allocation134_spill] sm:$0xff] %v5645_v26  ;;  %8638 = vst [vmem:[#allocation135_spill] sm:$0xff] %v5647_v59  ;;  %v753_v26 = vld [vmem:[%s5527_s7 + $0x100] sm:$0xff] }
 0x1c9   : > { %2095 = vrot.lane.b32.xlu1 %v750_v42, %s4820_s8  ;;  %2093 = vrot.lane.b32.xlu0 %v749_v58, %s4820_s8  ;;  %v756_v58 = vld [vmem:[%s5527_s7 + $0x118] sm:$0xff] }
 0x1cb   : > { %v5653_v51 = vpop.permute.xlu1 %1607  ;;  %v5655_v35 = vpop.permute.xlu0 %1605 }
 0x1cc   : > { %8639 = vst [vmem:[#allocation136_spill] sm:$0xff] %v5653_v51  ;;  %8640 = vst [vmem:[#allocation137_spill] sm:$0xff] %v5655_v35  ;;  %v755_v51 = vld [vmem:[%s5527_s7 + $0x110] sm:$0xff] }
 0x1cd   : > { %2099 = vrot.lane.b32.xlu1 %v752_v27, %s4820_s8  ;;  %2097 = vrot.lane.b32.xlu0 %v751_v43, %s4820_s8  ;;  %v758_v43 = vld [vmem:[%s5527_s7 + $0x128] sm:$0xff] }
 0x1cf   : > { %v5661_v59 = vpop.permute.xlu1 %1611  ;;  %v5663_v42 = vpop.permute.xlu0 %1609 }
 0x1d0   : > { %8641 = vst [vmem:[#allocation138_spill] sm:$0xff] %v5661_v59  ;;  %8642 = vst [vmem:[#allocation139_spill] sm:$0xff] %v5663_v42  ;;  %v757_v59 = vld [vmem:[%s5527_s7 + $0x120] sm:$0xff] }
 0x1d1   : > { %2103 = vrot.lane.b32.xlu1 %v754_v11, %s4820_s8  ;;  %2101 = vrot.lane.b32.xlu0 %v753_v26, %s4820_s8  ;;  %v760_v26 = vld [vmem:[%s5527_s7 + $0x138] sm:$0xff] }
 0x1d3   : > { %v5669_v35 = vpop.permute.xlu1 %1615  ;;  %v5671_v27 = vpop.permute.xlu0 %1613 }
 0x1d4   : > { %8643 = vst [vmem:[#allocation140_spill] sm:$0xff] %v5669_v35  ;;  %8644 = vst [vmem:[#allocation141_spill] sm:$0xff] %v5671_v27  ;;  %v759_v35 = vld [vmem:[%s5527_s7 + $0x130] sm:$0xff] }
 0x1d5   : > { %2107 = vrot.lane.b32.xlu1 %v756_v58, %s4820_s8  ;;  %2105 = vrot.lane.b32.xlu0 %v755_v51, %s4820_s8  ;;  %v762_v51 = vld [vmem:[%s5527_s7 + $0x148] sm:$0xff] }
 0x1d7   : > { %v5677_v42 = vpop.permute.xlu1 %1619  ;;  %v5679_v11 = vpop.permute.xlu0 %1617 }
 0x1d8   : > { %8645 = vst [vmem:[#allocation142_spill] sm:$0xff] %v5677_v42  ;;  %8646 = vst [vmem:[#allocation143_spill] sm:$0xff] %v5679_v11  ;;  %v761_v42 = vld [vmem:[%s5527_s7 + $0x140] sm:$0xff] }
 0x1d9   : > { %2111 = vrot.lane.b32.xlu1 %v758_v43, %s4820_s8  ;;  %2109 = vrot.lane.b32.xlu0 %v757_v59, %s4820_s8  ;;  %v764_v59 = vld [vmem:[%s5527_s7 + $0x158] sm:$0xff] }
 0x1db   : > { %v5685_v27 = vpop.permute.xlu1 %1623  ;;  %v5687_v58 = vpop.permute.xlu0 %1621 }
 0x1dc   : > { %8647 = vst [vmem:[#allocation144_spill] sm:$0xff] %v5685_v27  ;;  %8648 = vst [vmem:[#allocation145_spill] sm:$0xff] %v5687_v58  ;;  %v763_v27 = vld [vmem:[%s5527_s7 + $0x150] sm:$0xff] }
 0x1dd   : > { %2115 = vrot.lane.b32.xlu1 %v760_v26, %s4820_s8  ;;  %2113 = vrot.lane.b32.xlu0 %v759_v35, %s4820_s8  ;;  %v766_v35 = vld [vmem:[%s5527_s7 + $0x168] sm:$0xff] }
 0x1df   : > { %v5693_v11 = vpop.permute.xlu1 %1627  ;;  %v5695_v43 = vpop.permute.xlu0 %1625 }
 0x1e0   : > { %8649 = vst [vmem:[#allocation146_spill] sm:$0xff] %v5693_v11  ;;  %8650 = vst [vmem:[#allocation147_spill] sm:$0xff] %v5695_v43  ;;  %v765_v11 = vld [vmem:[%s5527_s7 + $0x160] sm:$0xff] }
 0x1e1   : > { %2119 = vrot.lane.b32.xlu1 %v762_v51, %s4820_s8  ;;  %2117 = vrot.lane.b32.xlu0 %v761_v42, %s4820_s8  ;;  %v768_v42 = vld [vmem:[%s5527_s7 + $0x178] sm:$0xff] }
 0x1e3   : > { %v5701_v58 = vpop.permute.xlu1 %1631  ;;  %v5703_v26 = vpop.permute.xlu0 %1629 }
 0x1e4   : > { %8651 = vst [vmem:[#allocation148_spill] sm:$0xff] %v5701_v58  ;;  %8652 = vst [vmem:[#allocation149_spill] sm:$0xff] %v5703_v26  ;;  %v767_v58 = vld [vmem:[%s5527_s7 + $0x170] sm:$0xff] }
 0x1e5   : > { %2123 = vrot.lane.b32.xlu1 %v764_v59, %s4820_s8  ;;  %2121 = vrot.lane.b32.xlu0 %v763_v27, %s4820_s8  ;;  %v770_v27 = vld [vmem:[%s5527_s7 + $0x188] sm:$0xff] }
 0x1e7   : > { %v5709_v43 = vpop.permute.xlu1 %1635  ;;  %v5711_v51 = vpop.permute.xlu0 %1633 }
 0x1e8   : > { %8653 = vst [vmem:[#allocation150_spill] sm:$0xff] %v5709_v43  ;;  %8654 = vst [vmem:[#allocation151_spill] sm:$0xff] %v5711_v51  ;;  %v769_v43 = vld [vmem:[%s5527_s7 + $0x180] sm:$0xff] }
 0x1e9   : > { %2127 = vrot.lane.b32.xlu1 %v766_v35, %s4820_s8  ;;  %2125 = vrot.lane.b32.xlu0 %v765_v11, %s4820_s8  ;;  %v772_v11 = vld [vmem:[%s5527_s7 + $0x198] sm:$0xff] }
 0x1eb   : > { %v5717_v26 = vpop.permute.xlu1 %1639  ;;  %v5719_v59 = vpop.permute.xlu0 %1637 }
 0x1ec   : > { %8655 = vst [vmem:[#allocation152_spill] sm:$0xff] %v5717_v26  ;;  %8656 = vst [vmem:[#allocation153_spill] sm:$0xff] %v5719_v59  ;;  %v771_v26 = vld [vmem:[%s5527_s7 + $0x190] sm:$0xff] }
 0x1ed   : > { %2131 = vrot.lane.b32.xlu1 %v768_v42, %s4820_s8  ;;  %2129 = vrot.lane.b32.xlu0 %v767_v58, %s4820_s8  ;;  %v774_v58 = vld [vmem:[%s5527_s7 + $0x1a8] sm:$0xff] }
 0x1ef   : > { %v5725_v51 = vpop.permute.xlu1 %1643  ;;  %v5727_v35 = vpop.permute.xlu0 %1641 }
 0x1f0   : > { %8657 = vst [vmem:[#allocation154_spill] sm:$0xff] %v5725_v51  ;;  %8658 = vst [vmem:[#allocation155_spill] sm:$0xff] %v5727_v35  ;;  %v773_v51 = vld [vmem:[%s5527_s7 + $0x1a0] sm:$0xff] }
 0x1f1   : > { %2135 = vrot.lane.b32.xlu1 %v770_v27, %s4820_s8  ;;  %2133 = vrot.lane.b32.xlu0 %v769_v43, %s4820_s8  ;;  %v776_v43 = vld [vmem:[%s5527_s7 + $0x1b8] sm:$0xff] }
 0x1f3   : > { %v5733_v59 = vpop.permute.xlu1 %1647  ;;  %v5735_v42 = vpop.permute.xlu0 %1645 }
 0x1f4   : > { %8659 = vst [vmem:[#allocation156_spill] sm:$0xff] %v5733_v59  ;;  %8660 = vst [vmem:[#allocation157_spill] sm:$0xff] %v5735_v42  ;;  %v775_v59 = vld [vmem:[%s5527_s7 + $0x1b0] sm:$0xff] }
 0x1f5   : > { %2139 = vrot.lane.b32.xlu1 %v772_v11, %s4820_s8  ;;  %2137 = vrot.lane.b32.xlu0 %v771_v26, %s4820_s8  ;;  %v778_v26 = vld [vmem:[%s5527_s7 + $0x1c8] sm:$0xff] }
 0x1f7   : > { %v5741_v35 = vpop.permute.xlu1 %1651  ;;  %v5743_v27 = vpop.permute.xlu0 %1649 }
 0x1f8   : > { %8661 = vst [vmem:[#allocation158_spill] sm:$0xff] %v5741_v35  ;;  %8662 = vst [vmem:[#allocation159_spill] sm:$0xff] %v5743_v27  ;;  %v777_v35 = vld [vmem:[%s5527_s7 + $0x1c0] sm:$0xff] }
 0x1f9   : > { %2143 = vrot.lane.b32.xlu1 %v774_v58, %s4820_s8  ;;  %2141 = vrot.lane.b32.xlu0 %v773_v51, %s4820_s8  ;;  %v780_v51 = vld [vmem:[%s5527_s7 + $0x1d8] sm:$0xff] }
 0x1fb   : > { %v5749_v42 = vpop.permute.xlu1 %1655  ;;  %v5751_v11 = vpop.permute.xlu0 %1653 }
 0x1fc   : > { %8663 = vst [vmem:[#allocation160_spill] sm:$0xff] %v5749_v42  ;;  %8664 = vst [vmem:[#allocation161_spill] sm:$0xff] %v5751_v11  ;;  %v779_v42 = vld [vmem:[%s5527_s7 + $0x1d0] sm:$0xff] }
 0x1fd   : > { %2147 = vrot.lane.b32.xlu1 %v776_v43, %s4820_s8  ;;  %2145 = vrot.lane.b32.xlu0 %v775_v59, %s4820_s8  ;;  %v782_v59 = vld [vmem:[%s5527_s7 + $0x1e8] sm:$0xff] }
 0x1ff   : > { %v5757_v27 = vpop.permute.xlu1 %1659  ;;  %v5759_v58 = vpop.permute.xlu0 %1657 }
 0x200   : > { %8665 = vst [vmem:[#allocation162_spill] sm:$0xff] %v5757_v27  ;;  %8666 = vst [vmem:[#allocation163_spill] sm:$0xff] %v5759_v58  ;;  %v781_v27 = vld [vmem:[%s5527_s7 + $0x1e0] sm:$0xff] }
 0x201   : > { %2151 = vrot.lane.b32.xlu1 %v778_v26, %s4820_s8  ;;  %2149 = vrot.lane.b32.xlu0 %v777_v35, %s4820_s8  ;;  %v784_v35 = vld [vmem:[%s5527_s7 + $0x1f8] sm:$0xff] }
 0x203   : > { %v5765_v11 = vpop.permute.xlu1 %2039  ;;  %v5767_v43 = vpop.permute.xlu0 %2037 }
 0x205   : > { %2155 = vrot.lane.b32.xlu1 %v780_v51, %s4820_s8  ;;  %2153 = vrot.lane.b32.xlu0 %v779_v42, %s4820_s8  ;;  %v786_v42 = vld [vmem:[%s5527_s7 + $0x208] sm:$0xff] }
 0x207   : > { %v5773_v58 = vpop.permute.xlu1 %2043  ;;  %v5775_v26 = vpop.permute.xlu0 %2041 }
 0x209   : > { %2159 = vrot.lane.b32.xlu1 %v782_v59, %s4820_s8  ;;  %2157 = vrot.lane.b32.xlu0 %v781_v27, %s4820_s8  ;;  %v788_v27 = vld [vmem:[%s5527_s7 + $0x218] sm:$0xff] }
 0x20b   : > { %v5781_v10 = vpop.permute.xlu1 %2047  ;;  %v5783_v51 = vpop.permute.xlu0 %2045 }
 0x20d   : > { %2163 = vrot.lane.b32.xlu1 %v784_v35, %s4820_s8  ;;  %2161 = vrot.lane.b32.xlu0 %v783_v50, %s4820_s8  ;;  %v790_v50 = vld [vmem:[%s5527_s7 + $0x228] sm:$0xff] }
 0x20f   : > { %v5789_v19 = vpop.permute.xlu1 %2051  ;;  %v5791_v59 = vpop.permute.xlu0 %2049 }
 0x211   : > { %2167 = vrot.lane.b32.xlu1 %v786_v42, %s4820_s8  ;;  %2165 = vrot.lane.b32.xlu0 %v785_v34, %s4820_s8  ;;  %v792_v34 = vld [vmem:[%s5527_s7 + $0x238] sm:$0xff] }
 0x213   : > { %v5797_v3 = vpop.permute.xlu1 %2055  ;;  %v5799_v35 = vpop.permute.xlu0 %2053 }
 0x215   : > { %2171 = vrot.lane.b32.xlu1 %v788_v27, %s4820_s8  ;;  %2169 = vrot.lane.b32.xlu0 %v787_v18, %s4820_s8  ;;  %v794_v18 = vld [vmem:[%s5527_s7 + $0x248] sm:$0xff] }
 0x217   : > { %v5805_v55 = vpop.permute.xlu1 %2059  ;;  %v5807_v42 = vpop.permute.xlu0 %2057 }
 0x219   : > { %2175 = vrot.lane.b32.xlu1 %v790_v50, %s4820_s8  ;;  %2173 = vrot.lane.b32.xlu0 %v789_v2, %s4820_s8  ;;  %v796_v2 = vld [vmem:[%s5527_s7 + $0x258] sm:$0xff] }
 0x21b   : > { %v5813_v47 = vpop.permute.xlu1 %2063  ;;  %v5815_v27 = vpop.permute.xlu0 %2061 }
 0x21d   : > { %2179 = vrot.lane.b32.xlu1 %v792_v34, %s4820_s8  ;;  %2177 = vrot.lane.b32.xlu0 %v791_v54, %s4820_s8  ;;  %v798_v54 = vld [vmem:[%s5527_s7 + $0x268] sm:$0xff] }
 0x21f   : > { %v5821_v39 = vpop.permute.xlu1 %2067  ;;  %v5823_v50 = vpop.permute.xlu0 %2065 }
 0x221   : > { %2183 = vrot.lane.b32.xlu1 %v794_v18, %s4820_s8  ;;  %2181 = vrot.lane.b32.xlu0 %v793_v46, %s4820_s8  ;;  %v800_v46 = vld [vmem:[%s5527_s7 + $0x278] sm:$0xff] }
 0x223   : > { %v5829_v31 = vpop.permute.xlu1 %2071  ;;  %v5831_v34 = vpop.permute.xlu0 %2069 }
 0x225   : > { %2187 = vrot.lane.b32.xlu1 %v796_v2, %s4820_s8  ;;  %2185 = vrot.lane.b32.xlu0 %v795_v38, %s4820_s8  ;;  %v802_v38 = vld [vmem:[%s5527_s7 + $0x288] sm:$0xff] }
 0x227   : > { %v5837_v23 = vpop.permute.xlu1 %2075  ;;  %v5839_v18 = vpop.permute.xlu0 %2073 }
 0x229   : > { %2191 = vrot.lane.b32.xlu1 %v798_v54, %s4820_s8  ;;  %2189 = vrot.lane.b32.xlu0 %v797_v30, %s4820_s8  ;;  %v804_v30 = vld [vmem:[%s5527_s7 + $0x298] sm:$0xff] }
 0x22b   : > { %v5845_v15 = vpop.permute.xlu1 %2079  ;;  %v5847_v2 = vpop.permute.xlu0 %2077 }
 0x22d   : > { %2195 = vrot.lane.b32.xlu1 %v800_v46, %s4820_s8  ;;  %2193 = vrot.lane.b32.xlu0 %v799_v22, %s4820_s8  ;;  %v806_v22 = vld [vmem:[%s5527_s7 + $0x2a8] sm:$0xff] }
 0x22f   : > { %v5853_v7 = vpop.permute.xlu1 %2083  ;;  %v5855_v54 = vpop.permute.xlu0 %2081 }
 0x231   : > { %2199 = vrot.lane.b32.xlu1 %v802_v38, %s4820_s8  ;;  %2197 = vrot.lane.b32.xlu0 %v801_v14, %s4820_s8  ;;  %v808_v14 = vld [vmem:[%s5527_s7 + $0x2b8] sm:$0xff] }
 0x233   : > { %v5861_v63 = vpop.permute.xlu1 %2087  ;;  %v5863_v46 = vpop.permute.xlu0 %2085 }
 0x235   : > { %2203 = vrot.lane.b32.xlu1 %v804_v30, %s4820_s8  ;;  %2201 = vrot.lane.b32.xlu0 %v803_v6, %s4820_s8  ;;  %v810_v6 = vld [vmem:[%s5527_s7 + $0x2c8] sm:$0xff] }
 0x237   : > { %v5869_v57 = vpop.permute.xlu1 %2091  ;;  %v5871_v38 = vpop.permute.xlu0 %2089 }
 0x238   : > { %8667 = vst [vmem:[#allocation164_spill] sm:$0xff] %v5869_v57  ;;  %8668 = vst [vmem:[#allocation165_spill] sm:$0xff] %v5871_v38 }
 0x239   : > { %2207 = vrot.lane.b32.xlu1 %v806_v22, %s4820_s8  ;;  %2205 = vrot.lane.b32.xlu0 %v805_v62, %s4820_s8  ;;  %v812_v62 = vld [vmem:[%s5527_s7 + $0x2d8] sm:$0xff] }
 0x23b   : > { %v5877_v53 = vpop.permute.xlu1 %2095  ;;  %v5879_v30 = vpop.permute.xlu0 %2093 }
 0x23c   : > { %8669 = vst [vmem:[#allocation166_spill] sm:$0xff] %v5877_v53  ;;  %8670 = vst [vmem:[#allocation167_spill] sm:$0xff] %v5879_v30  ;;  %v811_v53 = vld [vmem:[%s5527_s7 + $0x2d0] sm:$0xff] }
 0x23d   : > { %2211 = vrot.lane.b32.xlu1 %v808_v14, %s4820_s8  ;;  %2209 = vrot.lane.b32.xlu0 %v807_v56, %s4820_s8  ;;  %v814_v56 = vld [vmem:[%s5527_s7 + $0x2e8] sm:$0xff] }
 0x23f   : > { %v5885_v38 = vpop.permute.xlu1 %2099  ;;  %v5887_v22 = vpop.permute.xlu0 %2097 }
 0x240   : > { %8671 = vst [vmem:[#allocation168_spill] sm:$0xff] %v5885_v38  ;;  %8672 = vst [vmem:[#allocation169_spill] sm:$0xff] %v5887_v22  ;;  %v813_v38 = vld [vmem:[%s5527_s7 + $0x2e0] sm:$0xff] }
 0x241   : > { %2215 = vrot.lane.b32.xlu1 %v810_v6, %s4820_s8  ;;  %2213 = vrot.lane.b32.xlu0 %v809_v52, %s4820_s8  ;;  %v816_v52 = vld [vmem:[%s5527_s7 + $0x2f8] sm:$0xff] }
 0x243   : > { %v5893_v30 = vpop.permute.xlu1 %2103  ;;  %v5895_v14 = vpop.permute.xlu0 %2101 }
 0x244   : > { %8673 = vst [vmem:[#allocation170_spill] sm:$0xff] %v5893_v30  ;;  %8674 = vst [vmem:[#allocation171_spill] sm:$0xff] %v5895_v14  ;;  %v815_v30 = vld [vmem:[%s5527_s7 + $0x2f0] sm:$0xff] }
 0x245   : > { %2219 = vrot.lane.b32.xlu1 %v812_v62, %s4820_s8  ;;  %2217 = vrot.lane.b32.xlu0 %v811_v53, %s4820_s8  ;;  %v818_v53 = vld [vmem:[%s5527_s7 + $0x308] sm:$0xff] }
 0x247   : > { %v5901_v22 = vpop.permute.xlu1 %2107  ;;  %v5903_v6 = vpop.permute.xlu0 %2105 }
 0x248   : > { %8675 = vst [vmem:[#allocation172_spill] sm:$0xff] %v5901_v22  ;;  %8676 = vst [vmem:[#allocation173_spill] sm:$0xff] %v5903_v6  ;;  %v817_v22 = vld [vmem:[%s5527_s7 + $0x300] sm:$0xff] }
 0x249   : > { %2223 = vrot.lane.b32.xlu1 %v814_v56, %s4820_s8  ;;  %2221 = vrot.lane.b32.xlu0 %v813_v38, %s4820_s8  ;;  %v820_v38 = vld [vmem:[%s5527_s7 + $0x318] sm:$0xff] }
 0x24b   : > { %v5909_v14 = vpop.permute.xlu1 %2111  ;;  %v5911_v62 = vpop.permute.xlu0 %2109 }
 0x24c   : > { %8677 = vst [vmem:[#allocation174_spill] sm:$0xff] %v5909_v14  ;;  %8678 = vst [vmem:[#allocation175_spill] sm:$0xff] %v5911_v62  ;;  %v819_v14 = vld [vmem:[%s5527_s7 + $0x310] sm:$0xff] }
 0x24d   : > { %2227 = vrot.lane.b32.xlu1 %v816_v52, %s4820_s8  ;;  %2225 = vrot.lane.b32.xlu0 %v815_v30, %s4820_s8  ;;  %v822_v30 = vld [vmem:[%s5527_s7 + $0x328] sm:$0xff] }
 0x24f   : > { %v5917_v6 = vpop.permute.xlu1 %2115  ;;  %v5919_v56 = vpop.permute.xlu0 %2113 }
 0x250   : > { %8679 = vst [vmem:[#allocation176_spill] sm:$0xff] %v5917_v6  ;;  %8680 = vst [vmem:[#allocation177_spill] sm:$0xff] %v5919_v56  ;;  %v821_v6 = vld [vmem:[%s5527_s7 + $0x320] sm:$0xff] }
 0x251   : > { %2231 = vrot.lane.b32.xlu1 %v818_v53, %s4820_s8  ;;  %2229 = vrot.lane.b32.xlu0 %v817_v22, %s4820_s8  ;;  %v824_v22 = vld [vmem:[%s5527_s7 + $0x338] sm:$0xff] }
 0x253   : > { %v5925_v62 = vpop.permute.xlu1 %2119  ;;  %v5927_v52 = vpop.permute.xlu0 %2117 }
 0x254   : > { %8681 = vst [vmem:[#allocation178_spill] sm:$0xff] %v5925_v62  ;;  %8682 = vst [vmem:[#allocation179_spill] sm:$0xff] %v5927_v52  ;;  %v823_v62 = vld [vmem:[%s5527_s7 + $0x330] sm:$0xff] }
 0x255   : > { %2235 = vrot.lane.b32.xlu1 %v820_v38, %s4820_s8  ;;  %2233 = vrot.lane.b32.xlu0 %v819_v14, %s4820_s8  ;;  %v826_v14 = vld [vmem:[%s5527_s7 + $0x348] sm:$0xff] }
 0x257   : > { %v5933_v56 = vpop.permute.xlu1 %2123  ;;  %v5935_v53 = vpop.permute.xlu0 %2121 }
 0x258   : > { %8683 = vst [vmem:[#allocation180_spill] sm:$0xff] %v5933_v56  ;;  %8684 = vst [vmem:[#allocation181_spill] sm:$0xff] %v5935_v53  ;;  %v825_v56 = vld [vmem:[%s5527_s7 + $0x340] sm:$0xff] }
 0x259   : > { %2239 = vrot.lane.b32.xlu1 %v822_v30, %s4820_s8  ;;  %2237 = vrot.lane.b32.xlu0 %v821_v6, %s4820_s8  ;;  %v828_v6 = vld [vmem:[%s5527_s7 + $0x358] sm:$0xff] }
 0x25b   : > { %v5941_v52 = vpop.permute.xlu1 %2127  ;;  %v5943_v38 = vpop.permute.xlu0 %2125 }
 0x25c   : > { %8685 = vst [vmem:[#allocation182_spill] sm:$0xff] %v5941_v52  ;;  %8686 = vst [vmem:[#allocation183_spill] sm:$0xff] %v5943_v38  ;;  %v827_v52 = vld [vmem:[%s5527_s7 + $0x350] sm:$0xff] }
 0x25d   : > { %2243 = vrot.lane.b32.xlu1 %v824_v22, %s4820_s8  ;;  %2241 = vrot.lane.b32.xlu0 %v823_v62, %s4820_s8  ;;  %v830_v62 = vld [vmem:[%s5527_s7 + $0x368] sm:$0xff] }
 0x25f   : > { %v5949_v53 = vpop.permute.xlu1 %2131  ;;  %v5951_v30 = vpop.permute.xlu0 %2129 }
 0x260   : > { %8687 = vst [vmem:[#allocation184_spill] sm:$0xff] %v5949_v53  ;;  %8688 = vst [vmem:[#allocation185_spill] sm:$0xff] %v5951_v30  ;;  %v829_v53 = vld [vmem:[%s5527_s7 + $0x360] sm:$0xff] }
 0x261   : > { %2247 = vrot.lane.b32.xlu1 %v826_v14, %s4820_s8  ;;  %2245 = vrot.lane.b32.xlu0 %v825_v56, %s4820_s8  ;;  %v832_v56 = vld [vmem:[%s5527_s7 + $0x378] sm:$0xff] }
 0x263   : > { %v5957_v38 = vpop.permute.xlu1 %2135  ;;  %v5959_v22 = vpop.permute.xlu0 %2133 }
 0x264   : > { %8689 = vst [vmem:[#allocation186_spill] sm:$0xff] %v5957_v38  ;;  %8690 = vst [vmem:[#allocation187_spill] sm:$0xff] %v5959_v22  ;;  %v831_v38 = vld [vmem:[%s5527_s7 + $0x370] sm:$0xff] }
 0x265   : > { %2251 = vrot.lane.b32.xlu1 %v828_v6, %s4820_s8  ;;  %2249 = vrot.lane.b32.xlu0 %v827_v52, %s4820_s8  ;;  %v834_v52 = vld [vmem:[%s5527_s7 + $0x388] sm:$0xff] }
 0x267   : > { %v5965_v30 = vpop.permute.xlu1 %2139  ;;  %v5967_v14 = vpop.permute.xlu0 %2137 }
 0x268   : > { %8691 = vst [vmem:[#allocation188_spill] sm:$0xff] %v5965_v30  ;;  %8692 = vst [vmem:[#allocation189_spill] sm:$0xff] %v5967_v14  ;;  %v833_v30 = vld [vmem:[%s5527_s7 + $0x380] sm:$0xff] }
 0x269   : > { %2255 = vrot.lane.b32.xlu1 %v830_v62, %s4820_s8  ;;  %2253 = vrot.lane.b32.xlu0 %v829_v53, %s4820_s8  ;;  %v836_v53 = vld [vmem:[%s5527_s7 + $0x398] sm:$0xff] }
 0x26b   : > { %v5973_v22 = vpop.permute.xlu1 %2143  ;;  %v5975_v6 = vpop.permute.xlu0 %2141 }
 0x26c   : > { %8693 = vst [vmem:[#allocation190_spill] sm:$0xff] %v5973_v22  ;;  %8694 = vst [vmem:[#allocation191_spill] sm:$0xff] %v5975_v6  ;;  %v835_v22 = vld [vmem:[%s5527_s7 + $0x390] sm:$0xff] }
 0x26d   : > { %2259 = vrot.lane.b32.xlu1 %v832_v56, %s4820_s8  ;;  %2257 = vrot.lane.b32.xlu0 %v831_v38, %s4820_s8  ;;  %v838_v38 = vld [vmem:[%s5527_s7 + $0x3a8] sm:$0xff] }
 0x26f   : > { %v5981_v14 = vpop.permute.xlu1 %2147  ;;  %v5983_v62 = vpop.permute.xlu0 %2145 }
 0x270   : > { %8695 = vst [vmem:[#allocation192_spill] sm:$0xff] %v5981_v14  ;;  %8696 = vst [vmem:[#allocation193_spill] sm:$0xff] %v5983_v62  ;;  %v837_v14 = vld [vmem:[%s5527_s7 + $0x3a0] sm:$0xff] }
 0x271   : > { %2263 = vrot.lane.b32.xlu1 %v834_v52, %s4820_s8  ;;  %2261 = vrot.lane.b32.xlu0 %v833_v30, %s4820_s8  ;;  %v840_v30 = vld [vmem:[%s5527_s7 + $0x3b8] sm:$0xff] }
 0x273   : > { %v5989_v6 = vpop.permute.xlu1 %2151  ;;  %v5991_v56 = vpop.permute.xlu0 %2149 }
 0x274   : > { %8697 = vst [vmem:[#allocation194_spill] sm:$0xff] %v5989_v6  ;;  %8698 = vst [vmem:[#allocation195_spill] sm:$0xff] %v5991_v56  ;;  %v839_v6 = vld [vmem:[%s5527_s7 + $0x3b0] sm:$0xff] }
 0x275   : > { %2267 = vrot.lane.b32.xlu1 %v836_v53, %s4820_s8  ;;  %2265 = vrot.lane.b32.xlu0 %v835_v22, %s4820_s8  ;;  %v842_v22 = vld [vmem:[%s5527_s7 + $0x3c8] sm:$0xff] }
 0x277   : > { %v5997_v62 = vpop.permute.xlu1 %2155  ;;  %v5999_v52 = vpop.permute.xlu0 %2153 }
 0x278   : > { %8699 = vst [vmem:[#allocation196_spill] sm:$0xff] %v5997_v62  ;;  %8700 = vst [vmem:[#allocation197_spill] sm:$0xff] %v5999_v52  ;;  %v841_v62 = vld [vmem:[%s5527_s7 + $0x3c0] sm:$0xff] }
 0x279   : > { %2271 = vrot.lane.b32.xlu1 %v838_v38, %s4820_s8  ;;  %2269 = vrot.lane.b32.xlu0 %v837_v14, %s4820_s8  ;;  %v844_v14 = vld [vmem:[%s5527_s7 + $0x3d8] sm:$0xff] }
 0x27b   : > { %v6005_v56 = vpop.permute.xlu1 %2159  ;;  %v6007_v53 = vpop.permute.xlu0 %2157 }
 0x27c   : > { %8701 = vst [vmem:[#allocation198_spill] sm:$0xff] %v6005_v56  ;;  %8702 = vst [vmem:[#allocation199_spill] sm:$0xff] %v6007_v53  ;;  %v843_v56 = vld [vmem:[%s5527_s7 + $0x3d0] sm:$0xff] }
 0x27d   : > { %2275 = vrot.lane.b32.xlu1 %v840_v30, %s4820_s8  ;;  %2273 = vrot.lane.b32.xlu0 %v839_v6, %s4820_s8  ;;  %v846_v6 = vld [vmem:[%s5527_s7 + $0x3e8] sm:$0xff] }
 0x27f   : > { %v6013_v52 = vpop.permute.xlu1 %2163  ;;  %v6015_v38 = vpop.permute.xlu0 %2161 }
 0x280   : > { %8703 = vst [vmem:[#allocation200_spill] sm:$0xff] %v6013_v52  ;;  %8704 = vst [vmem:[#allocation201_spill] sm:$0xff] %v6015_v38  ;;  %v845_v52 = vld [vmem:[%s5527_s7 + $0x3e0] sm:$0xff] }
 0x281   : > { %2279 = vrot.lane.b32.xlu1 %v842_v22, %s4820_s8  ;;  %2277 = vrot.lane.b32.xlu0 %v841_v62, %s4820_s8  ;;  %v848_v62 = vld [vmem:[%s5527_s7 + $0x3f8] sm:$0xff] }
 0x283   : > { %v6021_v53 = vpop.permute.xlu1 %2167  ;;  %v6023_v30 = vpop.permute.xlu0 %2165 }
 0x284   : > { %8705 = vst [vmem:[#allocation202_spill] sm:$0xff] %v6021_v53  ;;  %8706 = vst [vmem:[#allocation203_spill] sm:$0xff] %v6023_v30  ;;  %v847_v53 = vld [vmem:[%s5527_s7 + $0x3f0] sm:$0xff] }
 0x285   : > { %2283 = vrot.lane.b32.xlu1 %v844_v14, %s4820_s8  ;;  %2281 = vrot.lane.b32.xlu0 %v843_v56, %s4820_s8  ;;  %v850_v56 = vld [vmem:[%s5527_s7 + $0x408] sm:$0xff] }
 0x287   : > { %v6029_v38 = vpop.permute.xlu1 %2171  ;;  %v6031_v22 = vpop.permute.xlu0 %2169 }
 0x288   : > { %8707 = vst [vmem:[#allocation204_spill] sm:$0xff] %v6029_v38  ;;  %8708 = vst [vmem:[#allocation205_spill] sm:$0xff] %v6031_v22  ;;  %v849_v38 = vld [vmem:[%s5527_s7 + $0x400] sm:$0xff] }
 0x289   : > { %2287 = vrot.lane.b32.xlu1 %v846_v6, %s4820_s8  ;;  %2285 = vrot.lane.b32.xlu0 %v845_v52, %s4820_s8  ;;  %v852_v52 = vld [vmem:[%s5527_s7 + $0x418] sm:$0xff] }
 0x28b   : > { %v6037_v30 = vpop.permute.xlu1 %2175  ;;  %v6039_v14 = vpop.permute.xlu0 %2173 }
 0x28c   : > { %8709 = vst [vmem:[#allocation206_spill] sm:$0xff] %v6037_v30  ;;  %8710 = vst [vmem:[#allocation207_spill] sm:$0xff] %v6039_v14  ;;  %v851_v30 = vld [vmem:[%s5527_s7 + $0x410] sm:$0xff] }
 0x28d   : > { %2291 = vrot.lane.b32.xlu1 %v848_v62, %s4820_s8  ;;  %2289 = vrot.lane.b32.xlu0 %v847_v53, %s4820_s8  ;;  %v854_v53 = vld [vmem:[%s5527_s7 + $0x428] sm:$0xff] }
 0x28f   : > { %v6045_v22 = vpop.permute.xlu1 %2179  ;;  %v6047_v6 = vpop.permute.xlu0 %2177 }
 0x290   : > { %8711 = vst [vmem:[#allocation208_spill] sm:$0xff] %v6045_v22  ;;  %8712 = vst [vmem:[#allocation209_spill] sm:$0xff] %v6047_v6  ;;  %v853_v22 = vld [vmem:[%s5527_s7 + $0x420] sm:$0xff] }
 0x291   : > { %2295 = vrot.lane.b32.xlu1 %v850_v56, %s4820_s8  ;;  %2293 = vrot.lane.b32.xlu0 %v849_v38, %s4820_s8  ;;  %v856_v38 = vld [vmem:[%s5527_s7 + $0x438] sm:$0xff] }
 0x293   : > { %v6053_v14 = vpop.permute.xlu1 %2183  ;;  %v6055_v62 = vpop.permute.xlu0 %2181 }
 0x294   : > { %8713 = vst [vmem:[#allocation210_spill] sm:$0xff] %v6053_v14  ;;  %8714 = vst [vmem:[#allocation211_spill] sm:$0xff] %v6055_v62  ;;  %v855_v14 = vld [vmem:[%s5527_s7 + $0x430] sm:$0xff] }
 0x295   : > { %2299 = vrot.lane.b32.xlu1 %v852_v52, %s4820_s8  ;;  %2297 = vrot.lane.b32.xlu0 %v851_v30, %s4820_s8  ;;  %v858_v30 = vld [vmem:[%s5527_s7 + $0x448] sm:$0xff] }
 0x297   : > { %v6061_v6 = vpop.permute.xlu1 %2187  ;;  %v6063_v56 = vpop.permute.xlu0 %2185 }
 0x298   : > { %8715 = vst [vmem:[#allocation212_spill] sm:$0xff] %v6061_v6  ;;  %8716 = vst [vmem:[#allocation213_spill] sm:$0xff] %v6063_v56  ;;  %v857_v6 = vld [vmem:[%s5527_s7 + $0x440] sm:$0xff] }
 0x299   : > { %2303 = vrot.lane.b32.xlu1 %v854_v53, %s4820_s8  ;;  %2301 = vrot.lane.b32.xlu0 %v853_v22, %s4820_s8  ;;  %v860_v22 = vld [vmem:[%s5527_s7 + $0x458] sm:$0xff] }
 0x29b   : > { %v6069_v62 = vpop.permute.xlu1 %2191  ;;  %v6071_v52 = vpop.permute.xlu0 %2189 }
 0x29c   : > { %8717 = vst [vmem:[#allocation214_spill] sm:$0xff] %v6069_v62  ;;  %8718 = vst [vmem:[#allocation215_spill] sm:$0xff] %v6071_v52  ;;  %v859_v62 = vld [vmem:[%s5527_s7 + $0x450] sm:$0xff] }
 0x29d   : > { %2307 = vrot.lane.b32.xlu1 %v856_v38, %s4820_s8  ;;  %2305 = vrot.lane.b32.xlu0 %v855_v14, %s4820_s8  ;;  %v862_v14 = vld [vmem:[%s5527_s7 + $0x468] sm:$0xff] }
 0x29f   : > { %v6077_v56 = vpop.permute.xlu1 %2195  ;;  %v6079_v53 = vpop.permute.xlu0 %2193 }
 0x2a0   : > { %8719 = vst [vmem:[#allocation216_spill] sm:$0xff] %v6077_v56  ;;  %8720 = vst [vmem:[#allocation217_spill] sm:$0xff] %v6079_v53  ;;  %v861_v56 = vld [vmem:[%s5527_s7 + $0x460] sm:$0xff] }
 0x2a1   : > { %2311 = vrot.lane.b32.xlu1 %v858_v30, %s4820_s8  ;;  %2309 = vrot.lane.b32.xlu0 %v857_v6, %s4820_s8  ;;  %v864_v6 = vld [vmem:[%s5527_s7 + $0x478] sm:$0xff] }
 0x2a3   : > { %v6085_v52 = vpop.permute.xlu1 %2199  ;;  %v6087_v38 = vpop.permute.xlu0 %2197 }
 0x2a4   : > { %8721 = vst [vmem:[#allocation218_spill] sm:$0xff] %v6085_v52  ;;  %8722 = vst [vmem:[#allocation219_spill] sm:$0xff] %v6087_v38  ;;  %v863_v52 = vld [vmem:[%s5527_s7 + $0x470] sm:$0xff] }
 0x2a5   : > { %2315 = vrot.lane.b32.xlu1 %v860_v22, %s4820_s8  ;;  %2313 = vrot.lane.b32.xlu0 %v859_v62, %s4820_s8  ;;  %v866_v62 = vld [vmem:[%s5527_s7 + $0x488] sm:$0xff] }
 0x2a7   : > { %v6093_v53 = vpop.permute.xlu1 %2203  ;;  %v6095_v30 = vpop.permute.xlu0 %2201 }
 0x2a8   : > { %8723 = vst [vmem:[#allocation220_spill] sm:$0xff] %v6093_v53  ;;  %8724 = vst [vmem:[#allocation221_spill] sm:$0xff] %v6095_v30  ;;  %v865_v53 = vld [vmem:[%s5527_s7 + $0x480] sm:$0xff] }
 0x2a9   : > { %2319 = vrot.lane.b32.xlu1 %v862_v14, %s4820_s8  ;;  %2317 = vrot.lane.b32.xlu0 %v861_v56, %s4820_s8  ;;  %v868_v56 = vld [vmem:[%s5527_s7 + $0x498] sm:$0xff] }
 0x2ab   : > { %v6101_v38 = vpop.permute.xlu1 %2207  ;;  %v6103_v22 = vpop.permute.xlu0 %2205 }
 0x2ac   : > { %8725 = vst [vmem:[#allocation222_spill] sm:$0xff] %v6101_v38  ;;  %8726 = vst [vmem:[#allocation223_spill] sm:$0xff] %v6103_v22  ;;  %v867_v38 = vld [vmem:[%s5527_s7 + $0x490] sm:$0xff] }
 0x2ad   : > { %2323 = vrot.lane.b32.xlu1 %v864_v6, %s4820_s8  ;;  %2321 = vrot.lane.b32.xlu0 %v863_v52, %s4820_s8  ;;  %v870_v52 = vld [vmem:[%s5527_s7 + $0x4a8] sm:$0xff] }
 0x2af   : > { %v6109_v30 = vpop.permute.xlu1 %2211  ;;  %v6111_v14 = vpop.permute.xlu0 %2209 }
 0x2b0   : > { %8727 = vst [vmem:[#allocation224_spill] sm:$0xff] %v6109_v30  ;;  %8728 = vst [vmem:[#allocation225_spill] sm:$0xff] %v6111_v14  ;;  %v869_v30 = vld [vmem:[%s5527_s7 + $0x4a0] sm:$0xff] }
 0x2b1   : > { %2327 = vrot.lane.b32.xlu1 %v866_v62, %s4820_s8  ;;  %2325 = vrot.lane.b32.xlu0 %v865_v53, %s4820_s8  ;;  %v872_v53 = vld [vmem:[%s5527_s7 + $0x4b8] sm:$0xff] }
 0x2b3   : > { %v6117_v22 = vpop.permute.xlu1 %2215  ;;  %v6119_v6 = vpop.permute.xlu0 %2213 }
 0x2b4   : > { %8729 = vst [vmem:[#allocation226_spill] sm:$0xff] %v6117_v22  ;;  %8730 = vst [vmem:[#allocation227_spill] sm:$0xff] %v6119_v6  ;;  %v871_v22 = vld [vmem:[%s5527_s7 + $0x4b0] sm:$0xff] }
 0x2b5   : > { %2331 = vrot.lane.b32.xlu1 %v868_v56, %s4820_s8  ;;  %2329 = vrot.lane.b32.xlu0 %v867_v38, %s4820_s8  ;;  %v874_v38 = vld [vmem:[%s5527_s7 + $0x4c8] sm:$0xff] }
 0x2b7   : > { %v6125_v14 = vpop.permute.xlu1 %2219  ;;  %v6127_v62 = vpop.permute.xlu0 %2217 }
 0x2b8   : > { %8731 = vst [vmem:[#allocation228_spill] sm:$0xff] %v6125_v14  ;;  %8732 = vst [vmem:[#allocation229_spill] sm:$0xff] %v6127_v62  ;;  %v873_v14 = vld [vmem:[%s5527_s7 + $0x4c0] sm:$0xff] }
 0x2b9   : > { %2335 = vrot.lane.b32.xlu1 %v870_v52, %s4820_s8  ;;  %2333 = vrot.lane.b32.xlu0 %v869_v30, %s4820_s8  ;;  %v876_v30 = vld [vmem:[%s5527_s7 + $0x4d8] sm:$0xff] }
 0x2bb   : > { %v6133_v6 = vpop.permute.xlu1 %2223  ;;  %v6135_v56 = vpop.permute.xlu0 %2221 }
 0x2bc   : > { %8733 = vst [vmem:[#allocation230_spill] sm:$0xff] %v6133_v6  ;;  %8734 = vst [vmem:[#allocation231_spill] sm:$0xff] %v6135_v56  ;;  %v875_v6 = vld [vmem:[%s5527_s7 + $0x4d0] sm:$0xff] }
 0x2bd   : > { %2339 = vrot.lane.b32.xlu1 %v872_v53, %s4820_s8  ;;  %2337 = vrot.lane.b32.xlu0 %v871_v22, %s4820_s8  ;;  %v878_v22 = vld [vmem:[%s5527_s7 + $0x4e8] sm:$0xff] }
 0x2bf   : > { %v6141_v62 = vpop.permute.xlu1 %2227  ;;  %v6143_v52 = vpop.permute.xlu0 %2225 }
 0x2c0   : > { %8735 = vst [vmem:[#allocation232_spill] sm:$0xff] %v6141_v62  ;;  %8736 = vst [vmem:[#allocation233_spill] sm:$0xff] %v6143_v52  ;;  %v877_v62 = vld [vmem:[%s5527_s7 + $0x4e0] sm:$0xff] }
 0x2c1   : > { %2343 = vrot.lane.b32.xlu1 %v874_v38, %s4820_s8  ;;  %2341 = vrot.lane.b32.xlu0 %v873_v14, %s4820_s8  ;;  %v880_v14 = vld [vmem:[%s5527_s7 + $0x4f8] sm:$0xff] }
 0x2c3   : > { %v6149_v56 = vpop.permute.xlu1 %2231  ;;  %v6151_v53 = vpop.permute.xlu0 %2229 }
 0x2c4   : > { %8737 = vst [vmem:[#allocation234_spill] sm:$0xff] %v6149_v56  ;;  %8738 = vst [vmem:[#allocation235_spill] sm:$0xff] %v6151_v53  ;;  %v879_v56 = vld [vmem:[%s5527_s7 + $0x4f0] sm:$0xff] }
 0x2c5   : > { %2347 = vrot.lane.b32.xlu1 %v876_v30, %s4820_s8  ;;  %2345 = vrot.lane.b32.xlu0 %v875_v6, %s4820_s8  ;;  %v882_v6 = vld [vmem:[%s5527_s7 + $0x508] sm:$0xff] }
 0x2c7   : > { %v6157_v52 = vpop.permute.xlu1 %2235  ;;  %v6159_v38 = vpop.permute.xlu0 %2233 }
 0x2c8   : > { %8739 = vst [vmem:[#allocation236_spill] sm:$0xff] %v6157_v52  ;;  %8740 = vst [vmem:[#allocation237_spill] sm:$0xff] %v6159_v38  ;;  %v881_v52 = vld [vmem:[%s5527_s7 + $0x500] sm:$0xff] }
 0x2c9   : > { %2351 = vrot.lane.b32.xlu1 %v878_v22, %s4820_s8  ;;  %2349 = vrot.lane.b32.xlu0 %v877_v62, %s4820_s8  ;;  %v884_v62 = vld [vmem:[%s5527_s7 + $0x518] sm:$0xff] }
 0x2cb   : > { %v6165_v53 = vpop.permute.xlu1 %2239  ;;  %v6167_v30 = vpop.permute.xlu0 %2237 }
 0x2cc   : > { %8741 = vst [vmem:[#allocation238_spill] sm:$0xff] %v6165_v53  ;;  %8742 = vst [vmem:[#allocation239_spill] sm:$0xff] %v6167_v30  ;;  %v883_v53 = vld [vmem:[%s5527_s7 + $0x510] sm:$0xff] }
 0x2cd   : > { %2355 = vrot.lane.b32.xlu1 %v880_v14, %s4820_s8  ;;  %2353 = vrot.lane.b32.xlu0 %v879_v56, %s4820_s8  ;;  %v886_v56 = vld [vmem:[%s5527_s7 + $0x528] sm:$0xff] }
 0x2cf   : > { %v6173_v38 = vpop.permute.xlu1 %2243  ;;  %v6175_v22 = vpop.permute.xlu0 %2241 }
 0x2d0   : > { %8743 = vst [vmem:[#allocation240_spill] sm:$0xff] %v6173_v38  ;;  %8744 = vst [vmem:[#allocation241_spill] sm:$0xff] %v6175_v22  ;;  %v885_v38 = vld [vmem:[%s5527_s7 + $0x520] sm:$0xff] }
 0x2d1   : > { %2359 = vrot.lane.b32.xlu1 %v882_v6, %s4820_s8  ;;  %2357 = vrot.lane.b32.xlu0 %v881_v52, %s4820_s8  ;;  %v888_v52 = vld [vmem:[%s5527_s7 + $0x538] sm:$0xff] }
 0x2d3   : > { %v6181_v30 = vpop.permute.xlu1 %2247  ;;  %v6183_v14 = vpop.permute.xlu0 %2245 }
 0x2d4   : > { %8745 = vst [vmem:[#allocation242_spill] sm:$0xff] %v6181_v30  ;;  %8746 = vst [vmem:[#allocation243_spill] sm:$0xff] %v6183_v14  ;;  %v887_v30 = vld [vmem:[%s5527_s7 + $0x530] sm:$0xff] }
 0x2d5   : > { %2363 = vrot.lane.b32.xlu1 %v884_v62, %s4820_s8  ;;  %2361 = vrot.lane.b32.xlu0 %v883_v53, %s4820_s8  ;;  %v890_v53 = vld [vmem:[%s5527_s7 + $0x548] sm:$0xff] }
 0x2d7   : > { %v6189_v22 = vpop.permute.xlu1 %2251  ;;  %v6191_v6 = vpop.permute.xlu0 %2249 }
 0x2d8   : > { %8747 = vst [vmem:[#allocation244_spill] sm:$0xff] %v6189_v22  ;;  %8748 = vst [vmem:[#allocation245_spill] sm:$0xff] %v6191_v6  ;;  %v889_v22 = vld [vmem:[%s5527_s7 + $0x540] sm:$0xff] }
 0x2d9   : > { %2367 = vrot.lane.b32.xlu1 %v886_v56, %s4820_s8  ;;  %2365 = vrot.lane.b32.xlu0 %v885_v38, %s4820_s8  ;;  %v892_v38 = vld [vmem:[%s5527_s7 + $0x558] sm:$0xff] }
 0x2db   : > { %v6197_v14 = vpop.permute.xlu1 %2255  ;;  %v6199_v62 = vpop.permute.xlu0 %2253 }
 0x2dc   : > { %8749 = vst [vmem:[#allocation246_spill] sm:$0xff] %v6197_v14  ;;  %8750 = vst [vmem:[#allocation247_spill] sm:$0xff] %v6199_v62  ;;  %v891_v14 = vld [vmem:[%s5527_s7 + $0x550] sm:$0xff] }
 0x2dd   : > { %2371 = vrot.lane.b32.xlu1 %v888_v52, %s4820_s8  ;;  %2369 = vrot.lane.b32.xlu0 %v887_v30, %s4820_s8  ;;  %v894_v30 = vld [vmem:[%s5527_s7 + $0x568] sm:$0xff] }
 0x2df   : > { %v6205_v6 = vpop.permute.xlu1 %2259  ;;  %v6207_v56 = vpop.permute.xlu0 %2257 }
 0x2e0   : > { %8751 = vst [vmem:[#allocation248_spill] sm:$0xff] %v6205_v6  ;;  %8752 = vst [vmem:[#allocation249_spill] sm:$0xff] %v6207_v56  ;;  %v893_v6 = vld [vmem:[%s5527_s7 + $0x560] sm:$0xff] }
 0x2e1   : > { %2375 = vrot.lane.b32.xlu1 %v890_v53, %s4820_s8  ;;  %2373 = vrot.lane.b32.xlu0 %v889_v22, %s4820_s8  ;;  %v896_v22 = vld [vmem:[%s5527_s7 + $0x578] sm:$0xff] }
 0x2e3   : > { %v6213_v62 = vpop.permute.xlu1 %2263  ;;  %v6215_v52 = vpop.permute.xlu0 %2261 }
 0x2e4   : > { %8753 = vst [vmem:[#allocation250_spill] sm:$0xff] %v6213_v62  ;;  %8754 = vst [vmem:[#allocation251_spill] sm:$0xff] %v6215_v52  ;;  %v895_v62 = vld [vmem:[%s5527_s7 + $0x570] sm:$0xff] }
 0x2e5   : > { %2379 = vrot.lane.b32.xlu1 %v892_v38, %s4820_s8  ;;  %2377 = vrot.lane.b32.xlu0 %v891_v14, %s4820_s8  ;;  %v898_v14 = vld [vmem:[%s5527_s7 + $0x588] sm:$0xff] }
 0x2e7   : > { %v6221_v56 = vpop.permute.xlu1 %2267  ;;  %v6223_v53 = vpop.permute.xlu0 %2265 }
 0x2e8   : > { %8755 = vst [vmem:[#allocation252_spill] sm:$0xff] %v6221_v56  ;;  %8756 = vst [vmem:[#allocation253_spill] sm:$0xff] %v6223_v53  ;;  %v897_v56 = vld [vmem:[%s5527_s7 + $0x580] sm:$0xff] }
 0x2e9   : > { %2383 = vrot.lane.b32.xlu1 %v894_v30, %s4820_s8  ;;  %2381 = vrot.lane.b32.xlu0 %v893_v6, %s4820_s8  ;;  %v900_v6 = vld [vmem:[%s5527_s7 + $0x598] sm:$0xff] }
 0x2eb   : > { %v6229_v52 = vpop.permute.xlu1 %2271  ;;  %v6231_v38 = vpop.permute.xlu0 %2269 }
 0x2ec   : > { %8757 = vst [vmem:[#allocation254_spill] sm:$0xff] %v6229_v52  ;;  %8758 = vst [vmem:[#allocation255_spill] sm:$0xff] %v6231_v38  ;;  %v899_v52 = vld [vmem:[%s5527_s7 + $0x590] sm:$0xff] }
 0x2ed   : > { %2387 = vrot.lane.b32.xlu1 %v896_v22, %s4820_s8  ;;  %2385 = vrot.lane.b32.xlu0 %v895_v62, %s4820_s8  ;;  %v902_v62 = vld [vmem:[%s5527_s7 + $0x5a8] sm:$0xff] }
 0x2ef   : > { %v6237_v53 = vpop.permute.xlu1 %2275  ;;  %v6239_v30 = vpop.permute.xlu0 %2273 }
 0x2f0   : > { %8759 = vst [vmem:[#allocation256_spill] sm:$0xff] %v6237_v53  ;;  %8760 = vst [vmem:[#allocation257_spill] sm:$0xff] %v6239_v30  ;;  %v901_v53 = vld [vmem:[%s5527_s7 + $0x5a0] sm:$0xff] }
 0x2f1   : > { %2391 = vrot.lane.b32.xlu1 %v898_v14, %s4820_s8  ;;  %2389 = vrot.lane.b32.xlu0 %v897_v56, %s4820_s8  ;;  %v904_v56 = vld [vmem:[%s5527_s7 + $0x5b8] sm:$0xff] }
 0x2f3   : > { %v6245_v38 = vpop.permute.xlu1 %2279  ;;  %v6247_v22 = vpop.permute.xlu0 %2277 }
 0x2f4   : > { %8761 = vst [vmem:[#allocation258_spill] sm:$0xff] %v6245_v38  ;;  %8762 = vst [vmem:[#allocation259_spill] sm:$0xff] %v6247_v22  ;;  %v903_v22 = vld [vmem:[%s5527_s7 + $0x5b0] sm:$0xff] }
 0x2f5   : > { %2395 = vrot.lane.b32.xlu1 %v900_v6, %s4820_s8  ;;  %2393 = vrot.lane.b32.xlu0 %v899_v52, %s4820_s8  ;;  %v906_v52 = vld [vmem:[%s5527_s7 + $0x5c8] sm:$0xff] }
 0x2f7   : > { %v6253_v30 = vpop.permute.xlu1 %2283  ;;  %v6255_v14 = vpop.permute.xlu0 %2281 }
 0x2f8   : > { %8763 = vst [vmem:[#allocation260_spill] sm:$0xff] %v6253_v30  ;;  %8764 = vst [vmem:[#allocation261_spill] sm:$0xff] %v6255_v14  ;;  %v905_v30 = vld [vmem:[%s5527_s7 + $0x5c0] sm:$0xff] }
 0x2f9   : > { %2399 = vrot.lane.b32.xlu1 %v902_v62, %s4820_s8  ;;  %2397 = vrot.lane.b32.xlu0 %v901_v53, %s4820_s8  ;;  %v908_v53 = vld [vmem:[%s5527_s7 + $0x5d8] sm:$0xff]  ;;  %v907_v62 = vld [vmem:[%s5527_s7 + $0x5d0] sm:$0xff] }
 0x2fb   : > { %v6261_v38 = vpop.permute.xlu1 %2287  ;;  %v6263_v6 = vpop.permute.xlu0 %2285 }
 0x2fc   : > { %8765 = vst [vmem:[#allocation262_spill] sm:$0xff] %v6261_v38  ;;  %8766 = vst [vmem:[#allocation263_spill] sm:$0xff] %v6263_v6  ;;  %v347_v6 = vld [vmem:[%s6516_s20 + $0x10] sm:$0xff] }
 0x2fd   : > { %2403 = vrot.lane.b32.xlu1 %v904_v56, %s4820_s8  ;;  %2401 = vrot.lane.b32.xlu0 %v903_v22, %s4820_s8  ;;  %v909_v22 = vld [vmem:[%s6285_s11] sm:$0xff] }
 0x2ff   : > { %v6269_v57 = vpop.permute.xlu1 %2291  ;;  %v6271_v14 = vpop.permute.xlu0 %2289 }
 0x300   : > { %8767 = vst [vmem:[#allocation264_spill] sm:$0xff] %v6269_v57  ;;  %8768 = vst [vmem:[#allocation265_spill] sm:$0xff] %v6271_v14 }
 0x301   : > { %2407 = vrot.lane.b32.xlu1 %v906_v52, %s4820_s8  ;;  %2405 = vrot.lane.b32.xlu0 %v905_v30, %s4820_s8  ;;  %v910_v30 = vld [vmem:[%s6285_s11 + $0x8] sm:$0xff] }
 0x303   : > { %v6277_v49 = vpop.permute.xlu1 %2295  ;;  %v6279_v38 = vpop.permute.xlu0 %2293 }
 0x304   : > { %8769 = vst [vmem:[#allocation266_spill] sm:$0xff] %v6277_v49  ;;  %8770 = vst [vmem:[#allocation267_spill] sm:$0xff] %v6279_v38  ;;  %v912_v38 = vld [vmem:[%s6285_s11 + $0x18] sm:$0xff]  ;;  %v911_v49 = vld [vmem:[%s6285_s11 + $0x10] sm:$0xff] }
 0x305   : > { %2411 = vrot.lane.b32.xlu1 %v908_v53, %s4820_s8  ;;  %2409 = vrot.lane.b32.xlu0 %v907_v62, %s4820_s8  ;;  %v914_v62 = vld [vmem:[%s6285_s11 + $0x28] sm:$0xff] }
 0x307   : > { %v6291_v56 = vpop.permute.xlu1 %2299  ;;  %v6293_v52 = vpop.permute.xlu0 %2297 }
 0x308   : > { %8771 = vst [vmem:[#allocation268_spill] sm:$0xff] %v6291_v56  ;;  %8772 = vst [vmem:[#allocation269_spill] sm:$0xff] %v6293_v52  ;;  %v913_v52 = vld [vmem:[%s6285_s11 + $0x20] sm:$0xff] }
 0x309   : > { %2791 = vrot.lane.b32.xlu1 %v910_v30, %s4821_s12  ;;  %2789 = vrot.lane.b32.xlu0 %v909_v22, %s4821_s12  ;;  %v916_v22 = vld [vmem:[%s6285_s11 + $0x38] sm:$0xff] }
 0x30b   : > { %v6299_v14 = vpop.permute.xlu1 %2303  ;;  %v6301_v53 = vpop.permute.xlu0 %2301 }
 0x30c   : > { %8773 = vst [vmem:[#allocation270_spill] sm:$0xff] %v6299_v14  ;;  %8774 = vst [vmem:[#allocation271_spill] sm:$0xff] %v6301_v53  ;;  %v915_v14 = vld [vmem:[%s6285_s11 + $0x30] sm:$0xff] }
 0x30d   : > { %2795 = vrot.lane.b32.xlu1 %v912_v38, %s4821_s12  ;;  %2793 = vrot.lane.b32.xlu0 %v911_v49, %s4821_s12  ;;  %v918_v49 = vld [vmem:[%s6285_s11 + $0x48] sm:$0xff] }
 0x30f   : > { %v6307_v56 = vpop.permute.xlu1 %2307  ;;  %v6309_v30 = vpop.permute.xlu0 %2305 }
 0x310   : > { %8775 = vst [vmem:[#allocation272_spill] sm:$0xff] %v6307_v56  ;;  %8776 = vst [vmem:[#allocation273_spill] sm:$0xff] %v6309_v30  ;;  %v917_v56 = vld [vmem:[%s6285_s11 + $0x40] sm:$0xff] }
 0x311   : > { %2799 = vrot.lane.b32.xlu1 %v914_v62, %s4821_s12  ;;  %2797 = vrot.lane.b32.xlu0 %v913_v52, %s4821_s12  ;;  %v920_v52 = vld [vmem:[%s6285_s11 + $0x58] sm:$0xff] }
 0x313   : > { %v6315_v53 = vpop.permute.xlu1 %2311  ;;  %v6317_v38 = vpop.permute.xlu0 %2309 }
 0x314   : > { %8777 = vst [vmem:[#allocation274_spill] sm:$0xff] %v6315_v53  ;;  %8778 = vst [vmem:[#allocation275_spill] sm:$0xff] %v6317_v38  ;;  %v919_v53 = vld [vmem:[%s6285_s11 + $0x50] sm:$0xff] }
 0x315   : > { %2803 = vrot.lane.b32.xlu1 %v916_v22, %s4821_s12  ;;  %2801 = vrot.lane.b32.xlu0 %v915_v14, %s4821_s12  ;;  %v922_v14 = vld [vmem:[%s6285_s11 + $0x68] sm:$0xff] }
 0x317   : > { %v6323_v30 = vpop.permute.xlu1 %2315  ;;  %v6325_v62 = vpop.permute.xlu0 %2313 }
 0x318   : > { %8779 = vst [vmem:[#allocation276_spill] sm:$0xff] %v6323_v30  ;;  %8780 = vst [vmem:[#allocation277_spill] sm:$0xff] %v6325_v62  ;;  %v921_v30 = vld [vmem:[%s6285_s11 + $0x60] sm:$0xff] }
 0x319   : > { %2807 = vrot.lane.b32.xlu1 %v918_v49, %s4821_s12  ;;  %2805 = vrot.lane.b32.xlu0 %v917_v56, %s4821_s12  ;;  %v924_v56 = vld [vmem:[%s6285_s11 + $0x78] sm:$0xff] }
 0x31b   : > { %v6331_v38 = vpop.permute.xlu1 %2319  ;;  %v6333_v22 = vpop.permute.xlu0 %2317 }
 0x31c   : > { %8781 = vst [vmem:[#allocation278_spill] sm:$0xff] %v6331_v38  ;;  %8782 = vst [vmem:[#allocation279_spill] sm:$0xff] %v6333_v22  ;;  %v923_v38 = vld [vmem:[%s6285_s11 + $0x70] sm:$0xff] }
 0x31d   : > { %2811 = vrot.lane.b32.xlu1 %v920_v52, %s4821_s12  ;;  %2809 = vrot.lane.b32.xlu0 %v919_v53, %s4821_s12  ;;  %v926_v53 = vld [vmem:[%s6285_s11 + $0x88] sm:$0xff] }
 0x31f   : > { %v6339_v62 = vpop.permute.xlu1 %2323  ;;  %v6341_v49 = vpop.permute.xlu0 %2321 }
 0x320   : > { %8783 = vst [vmem:[#allocation280_spill] sm:$0xff] %v6339_v62  ;;  %8784 = vst [vmem:[#allocation281_spill] sm:$0xff] %v6341_v49  ;;  %v925_v62 = vld [vmem:[%s6285_s11 + $0x80] sm:$0xff] }
 0x321   : > { %2815 = vrot.lane.b32.xlu1 %v922_v14, %s4821_s12  ;;  %2813 = vrot.lane.b32.xlu0 %v921_v30, %s4821_s12  ;;  %v928_v30 = vld [vmem:[%s6285_s11 + $0x98] sm:$0xff] }
 0x323   : > { %v6347_v22 = vpop.permute.xlu1 %2327  ;;  %v6349_v52 = vpop.permute.xlu0 %2325 }
 0x324   : > { %8785 = vst [vmem:[#allocation282_spill] sm:$0xff] %v6347_v22  ;;  %8786 = vst [vmem:[#allocation283_spill] sm:$0xff] %v6349_v52  ;;  %v927_v22 = vld [vmem:[%s6285_s11 + $0x90] sm:$0xff] }
 0x325   : > { %2819 = vrot.lane.b32.xlu1 %v924_v56, %s4821_s12  ;;  %2817 = vrot.lane.b32.xlu0 %v923_v38, %s4821_s12  ;;  %v930_v38 = vld [vmem:[%s6285_s11 + $0xa8] sm:$0xff] }
 0x327   : > { %v6355_v49 = vpop.permute.xlu1 %2331  ;;  %v6357_v14 = vpop.permute.xlu0 %2329 }
 0x328   : > { %8787 = vst [vmem:[#allocation284_spill] sm:$0xff] %v6355_v49  ;;  %8788 = vst [vmem:[#allocation285_spill] sm:$0xff] %v6357_v14  ;;  %v929_v49 = vld [vmem:[%s6285_s11 + $0xa0] sm:$0xff] }
 0x329   : > { %2823 = vrot.lane.b32.xlu1 %v926_v53, %s4821_s12  ;;  %2821 = vrot.lane.b32.xlu0 %v925_v62, %s4821_s12  ;;  %v932_v62 = vld [vmem:[%s6285_s11 + $0xb8] sm:$0xff] }
 0x32b   : > { %v6363_v52 = vpop.permute.xlu1 %2335  ;;  %v6365_v56 = vpop.permute.xlu0 %2333 }
 0x32c   : > { %8789 = vst [vmem:[#allocation286_spill] sm:$0xff] %v6363_v52  ;;  %8790 = vst [vmem:[#allocation287_spill] sm:$0xff] %v6365_v56  ;;  %v931_v52 = vld [vmem:[%s6285_s11 + $0xb0] sm:$0xff] }
 0x32d   : > { %2827 = vrot.lane.b32.xlu1 %v928_v30, %s4821_s12  ;;  %2825 = vrot.lane.b32.xlu0 %v927_v22, %s4821_s12  ;;  %v934_v22 = vld [vmem:[%s6285_s11 + $0xc8] sm:$0xff] }
 0x32f   : > { %v6371_v14 = vpop.permute.xlu1 %2339  ;;  %v6373_v53 = vpop.permute.xlu0 %2337 }
 0x330   : > { %8791 = vst [vmem:[#allocation288_spill] sm:$0xff] %v6371_v14  ;;  %8792 = vst [vmem:[#allocation289_spill] sm:$0xff] %v6373_v53  ;;  %v933_v14 = vld [vmem:[%s6285_s11 + $0xc0] sm:$0xff] }
 0x331   : > { %2831 = vrot.lane.b32.xlu1 %v930_v38, %s4821_s12  ;;  %2829 = vrot.lane.b32.xlu0 %v929_v49, %s4821_s12  ;;  %v936_v49 = vld [vmem:[%s6285_s11 + $0xd8] sm:$0xff] }
 0x333   : > { %v6379_v56 = vpop.permute.xlu1 %2343  ;;  %v6381_v30 = vpop.permute.xlu0 %2341 }
 0x334   : > { %8793 = vst [vmem:[#allocation290_spill] sm:$0xff] %v6379_v56  ;;  %8794 = vst [vmem:[#allocation291_spill] sm:$0xff] %v6381_v30  ;;  %v935_v56 = vld [vmem:[%s6285_s11 + $0xd0] sm:$0xff] }
 0x335   : > { %2835 = vrot.lane.b32.xlu1 %v932_v62, %s4821_s12  ;;  %2833 = vrot.lane.b32.xlu0 %v931_v52, %s4821_s12  ;;  %v938_v52 = vld [vmem:[%s6285_s11 + $0xe8] sm:$0xff] }
 0x337   : > { %v6387_v53 = vpop.permute.xlu1 %2347  ;;  %v6389_v38 = vpop.permute.xlu0 %2345 }
 0x338   : > { %8795 = vst [vmem:[#allocation292_spill] sm:$0xff] %v6387_v53  ;;  %8796 = vst [vmem:[#allocation293_spill] sm:$0xff] %v6389_v38  ;;  %v937_v53 = vld [vmem:[%s6285_s11 + $0xe0] sm:$0xff] }
 0x339   : > { %2839 = vrot.lane.b32.xlu1 %v934_v22, %s4821_s12  ;;  %2837 = vrot.lane.b32.xlu0 %v933_v14, %s4821_s12  ;;  %v940_v14 = vld [vmem:[%s6285_s11 + $0xf8] sm:$0xff] }
 0x33b   : > { %v6395_v30 = vpop.permute.xlu1 %2351  ;;  %v6397_v62 = vpop.permute.xlu0 %2349 }
 0x33c   : > { %8797 = vst [vmem:[#allocation294_spill] sm:$0xff] %v6395_v30  ;;  %8798 = vst [vmem:[#allocation295_spill] sm:$0xff] %v6397_v62  ;;  %v939_v30 = vld [vmem:[%s6285_s11 + $0xf0] sm:$0xff] }
 0x33d   : > { %2843 = vrot.lane.b32.xlu1 %v936_v49, %s4821_s12  ;;  %2841 = vrot.lane.b32.xlu0 %v935_v56, %s4821_s12  ;;  %v942_v56 = vld [vmem:[%s6285_s11 + $0x108] sm:$0xff] }
 0x33f   : > { %v6403_v38 = vpop.permute.xlu1 %2355  ;;  %v6405_v22 = vpop.permute.xlu0 %2353 }
 0x340   : > { %8799 = vst [vmem:[#allocation296_spill] sm:$0xff] %v6403_v38  ;;  %8800 = vst [vmem:[#allocation297_spill] sm:$0xff] %v6405_v22  ;;  %v941_v38 = vld [vmem:[%s6285_s11 + $0x100] sm:$0xff] }
 0x341   : > { %2847 = vrot.lane.b32.xlu1 %v938_v52, %s4821_s12  ;;  %2845 = vrot.lane.b32.xlu0 %v937_v53, %s4821_s12  ;;  %v944_v53 = vld [vmem:[%s6285_s11 + $0x118] sm:$0xff] }
 0x343   : > { %v6411_v62 = vpop.permute.xlu1 %2359  ;;  %v6413_v49 = vpop.permute.xlu0 %2357 }
 0x344   : > { %8801 = vst [vmem:[#allocation298_spill] sm:$0xff] %v6411_v62  ;;  %8802 = vst [vmem:[#allocation299_spill] sm:$0xff] %v6413_v49  ;;  %v943_v62 = vld [vmem:[%s6285_s11 + $0x110] sm:$0xff] }
 0x345   : > { %2851 = vrot.lane.b32.xlu1 %v940_v14, %s4821_s12  ;;  %2849 = vrot.lane.b32.xlu0 %v939_v30, %s4821_s12  ;;  %v946_v30 = vld [vmem:[%s6285_s11 + $0x128] sm:$0xff] }
 0x347   : > { %v6419_v22 = vpop.permute.xlu1 %2363  ;;  %v6421_v52 = vpop.permute.xlu0 %2361 }
 0x348   : > { %8803 = vst [vmem:[#allocation300_spill] sm:$0xff] %v6419_v22  ;;  %8804 = vst [vmem:[#allocation301_spill] sm:$0xff] %v6421_v52  ;;  %v945_v22 = vld [vmem:[%s6285_s11 + $0x120] sm:$0xff] }
 0x349   : > { %2855 = vrot.lane.b32.xlu1 %v942_v56, %s4821_s12  ;;  %2853 = vrot.lane.b32.xlu0 %v941_v38, %s4821_s12  ;;  %v948_v38 = vld [vmem:[%s6285_s11 + $0x138] sm:$0xff] }
 0x34b   : > { %v6427_v49 = vpop.permute.xlu1 %2367  ;;  %v6429_v14 = vpop.permute.xlu0 %2365 }
 0x34c   : > { %8805 = vst [vmem:[#allocation302_spill] sm:$0xff] %v6427_v49  ;;  %8806 = vst [vmem:[#allocation303_spill] sm:$0xff] %v6429_v14  ;;  %v947_v49 = vld [vmem:[%s6285_s11 + $0x130] sm:$0xff] }
 0x34d   : > { %2859 = vrot.lane.b32.xlu1 %v944_v53, %s4821_s12  ;;  %2857 = vrot.lane.b32.xlu0 %v943_v62, %s4821_s12  ;;  %v950_v62 = vld [vmem:[%s6285_s11 + $0x148] sm:$0xff] }
 0x34f   : > { %v6435_v52 = vpop.permute.xlu1 %2371  ;;  %v6437_v56 = vpop.permute.xlu0 %2369 }
 0x350   : > { %8807 = vst [vmem:[#allocation304_spill] sm:$0xff] %v6435_v52  ;;  %8808 = vst [vmem:[#allocation305_spill] sm:$0xff] %v6437_v56  ;;  %v949_v52 = vld [vmem:[%s6285_s11 + $0x140] sm:$0xff] }
 0x351   : > { %2863 = vrot.lane.b32.xlu1 %v946_v30, %s4821_s12  ;;  %2861 = vrot.lane.b32.xlu0 %v945_v22, %s4821_s12  ;;  %v952_v22 = vld [vmem:[%s6285_s11 + $0x158] sm:$0xff] }
 0x353   : > { %v6443_v14 = vpop.permute.xlu1 %2375  ;;  %v6445_v53 = vpop.permute.xlu0 %2373 }
 0x354   : > { %8809 = vst [vmem:[#allocation306_spill] sm:$0xff] %v6443_v14  ;;  %8810 = vst [vmem:[#allocation307_spill] sm:$0xff] %v6445_v53  ;;  %v951_v14 = vld [vmem:[%s6285_s11 + $0x150] sm:$0xff] }
 0x355   : > { %2867 = vrot.lane.b32.xlu1 %v948_v38, %s4821_s12  ;;  %2865 = vrot.lane.b32.xlu0 %v947_v49, %s4821_s12  ;;  %v954_v49 = vld [vmem:[%s6285_s11 + $0x168] sm:$0xff] }
 0x357   : > { %v6451_v56 = vpop.permute.xlu1 %2379  ;;  %v6453_v30 = vpop.permute.xlu0 %2377 }
 0x358   : > { %8811 = vst [vmem:[#allocation308_spill] sm:$0xff] %v6451_v56  ;;  %8812 = vst [vmem:[#allocation309_spill] sm:$0xff] %v6453_v30  ;;  %v953_v56 = vld [vmem:[%s6285_s11 + $0x160] sm:$0xff] }
 0x359   : > { %2871 = vrot.lane.b32.xlu1 %v950_v62, %s4821_s12  ;;  %2869 = vrot.lane.b32.xlu0 %v949_v52, %s4821_s12  ;;  %v956_v52 = vld [vmem:[%s6285_s11 + $0x178] sm:$0xff] }
 0x35b   : > { %v6459_v53 = vpop.permute.xlu1 %2383  ;;  %v6461_v38 = vpop.permute.xlu0 %2381 }
 0x35c   : > { %8813 = vst [vmem:[#allocation310_spill] sm:$0xff] %v6459_v53  ;;  %8814 = vst [vmem:[#allocation311_spill] sm:$0xff] %v6461_v38  ;;  %v955_v53 = vld [vmem:[%s6285_s11 + $0x170] sm:$0xff] }
 0x35d   : > { %2875 = vrot.lane.b32.xlu1 %v952_v22, %s4821_s12  ;;  %2873 = vrot.lane.b32.xlu0 %v951_v14, %s4821_s12  ;;  %v958_v14 = vld [vmem:[%s6285_s11 + $0x188] sm:$0xff] }
 0x35f   : > { %v6467_v30 = vpop.permute.xlu1 %2387  ;;  %v6469_v62 = vpop.permute.xlu0 %2385 }
 0x360   : > { %8815 = vst [vmem:[#allocation312_spill] sm:$0xff] %v6467_v30  ;;  %8816 = vst [vmem:[#allocation313_spill] sm:$0xff] %v6469_v62  ;;  %v957_v30 = vld [vmem:[%s6285_s11 + $0x180] sm:$0xff] }
 0x361   : > { %2879 = vrot.lane.b32.xlu1 %v954_v49, %s4821_s12  ;;  %2877 = vrot.lane.b32.xlu0 %v953_v56, %s4821_s12  ;;  %v960_v56 = vld [vmem:[%s6285_s11 + $0x198] sm:$0xff] }
 0x363   : > { %v6475_v38 = vpop.permute.xlu1 %2391  ;;  %v6477_v22 = vpop.permute.xlu0 %2389 }
 0x364   : > { %8817 = vst [vmem:[#allocation314_spill] sm:$0xff] %v6475_v38  ;;  %8818 = vst [vmem:[#allocation315_spill] sm:$0xff] %v6477_v22  ;;  %v959_v22 = vld [vmem:[%s6285_s11 + $0x190] sm:$0xff] }
 0x365   : > { %2883 = vrot.lane.b32.xlu1 %v956_v52, %s4821_s12  ;;  %2881 = vrot.lane.b32.xlu0 %v955_v53, %s4821_s12  ;;  %v962_v53 = vld [vmem:[%s6285_s11 + $0x1a8] sm:$0xff] }
 0x367   : > { %v6483_v62 = vpop.permute.xlu1 %2395  ;;  %v6485_v49 = vpop.permute.xlu0 %2393 }
 0x368   : > { %8819 = vst [vmem:[#allocation316_spill] sm:$0xff] %v6483_v62  ;;  %8820 = vst [vmem:[#allocation317_spill] sm:$0xff] %v6485_v49  ;;  %v961_v49 = vld [vmem:[%s6285_s11 + $0x1a0] sm:$0xff] }
 0x369   : > { %2887 = vrot.lane.b32.xlu1 %v958_v14, %s4821_s12  ;;  %2885 = vrot.lane.b32.xlu0 %v957_v30, %s4821_s12  ;;  %v964_v30 = vld [vmem:[%s6285_s11 + $0x1b8] sm:$0xff] }
 0x36b   : > { %v6491_v38 = vpop.permute.xlu1 %2399  ;;  %v6493_v52 = vpop.permute.xlu0 %2397 }
 0x36c   : > { %8821 = vst [vmem:[#allocation318_spill] sm:$0xff] %v6491_v38  ;;  %8822 = vst [vmem:[#allocation319_spill] sm:$0xff] %v6493_v52  ;;  %v963_v38 = vld [vmem:[%s6285_s11 + $0x1b0] sm:$0xff] }
 0x36d   : > { %2891 = vrot.lane.b32.xlu1 %v960_v56, %s4821_s12  ;;  %2889 = vrot.lane.b32.xlu0 %v959_v22, %s4821_s12  ;;  %v966_v22 = vld [vmem:[%s6285_s11 + $0x1c8] sm:$0xff]  ;;  %v345_v56 = vld [vmem:[%s6516_s20] sm:$0xff] }
 0x36f   : > { %v6499_v62 = vpop.permute.xlu1 %2403  ;;  %v6501_v14 = vpop.permute.xlu0 %2401 }
 0x370   : > { %8823 = vst [vmem:[#allocation320_spill] sm:$0xff] %v6499_v62  ;;  %8824 = vst [vmem:[#allocation321_spill] sm:$0xff] %v6501_v14  ;;  %v968_v14 = vld [vmem:[%s6285_s11 + $0x1d8] sm:$0xff]  ;;  %v967_v62 = vld [vmem:[%s6285_s11 + $0x1d0] sm:$0xff] }
 0x371   : > { %2895 = vrot.lane.b32.xlu1 %v962_v53, %s4821_s12  ;;  %2893 = vrot.lane.b32.xlu0 %v961_v49, %s4821_s12  ;;  %v965_v49 = vld [vmem:[%s6285_s11 + $0x1c0] sm:$0xff]  ;;  %v346_v53 = vld [vmem:[%s6516_s20 + $0x8] sm:$0xff] }
 0x373   : > { %v6507_v57 = vpop.permute.xlu1 %2407  ;;  %v6509_v52 = vpop.permute.xlu0 %2405 }
 0x374   : > { %8825 = vst [vmem:[#allocation322_spill] sm:$0xff] %v6507_v57  ;;  %8826 = vst [vmem:[#allocation323_spill] sm:$0xff] %v6509_v52 }
 0x375   : > { %2899 = vrot.lane.b32.xlu1 %v964_v30, %s4821_s12  ;;  %2897 = vrot.lane.b32.xlu0 %v963_v38, %s4821_s12  ;;  %v3354_v38 = vsel %vm3353_vm0, %v345_v56, %v5009_v61  ;;  %v3355_v30 = vsel %vm3353_vm0, %v346_v53, %v5017_v1  ;;  %v969_v53 = vld [vmem:[%s6285_s11 + $0x1e0] sm:$0xff] }
 0x377   : > { %v6524_v52 = vpop.permute.xlu1 %2411  ;;  %v6526_v57 = vpop.permute.xlu0 %2409 }
 0x378   : > { %8827 = vst [vmem:[#allocation324_spill] sm:$0xff] %v6524_v52  ;;  %8828 = vst [vmem:[#allocation325_spill] sm:$0xff] %v6526_v57  ;;  %v348_v52 = vld [vmem:[%s6516_s20 + $0x18] sm:$0xff] }
 0x379   : > { %2903 = vrot.lane.b32.xlu1 %v966_v22, %s4821_s12  ;;  %2901 = vrot.lane.b32.xlu0 %v965_v49, %s4821_s12  ;;  %v3544_v22 = vsel %vm3542_vm1, %v3355_v30, %v5765_v11  ;;  %v3543_v49 = vsel %vm3542_vm1, %v3354_v38, %v5767_v43  ;;  %v3356_v11 = vsel %vm3353_vm0, %v347_v6, %v5007_v60  ;;  %v970_v43 = vld [vmem:[%s6285_s11 + $0x1e8] sm:$0xff]  ;;  %v349_v30 = vld [vmem:[%s6516_s20 + $0x20] sm:$0xff] }
 0x37a   : > { %v350_v38 = vld [vmem:[%s6516_s20 + $0x28] sm:$0xff]  ;;  %v972_v6 = vld [vmem:[%s6285_s11 + $0x1f8] sm:$0xff] }
 0x37b   : > { %v2792_v57 = vpop.permute.xlu1 %2791  ;;  %v2790_v61 = vpop.permute.xlu0 %2789 }
 0x37c   : > { %v3733_v56 = vsel %vm3731_vm2, %v3544_v22, %v2792_v57  ;;  %v3732_v1 = vsel %vm3731_vm2, %v3543_v49, %v2790_v61  ;;  %v3357_v57 = vsel %vm3353_vm0, %v348_v52, %v5015_v0  ;;  %v971_v52 = vld [vmem:[%s6285_s11 + $0x1f0] sm:$0xff]  ;;  %v352_v61 = vld [vmem:[%s6516_s20 + $0x38] sm:$0xff] }
 0x37d   : > { %3922 = vst.msk [vmem:[%s6544_s15 + $0x8] sm:$0xff] %vm3920_vm3, %v3733_v56  ;;  %3921 = vst.msk [vmem:[%s6544_s15] sm:$0xff] %vm3920_vm3, %v3732_v1  ;;  %2907 = vrot.lane.b32.xlu1 %v968_v14, %s4821_s12  ;;  %2905 = vrot.lane.b32.xlu0 %v967_v62, %s4821_s12  ;;  %v3546_v22 = vsel %vm3542_vm1, %v3357_v57, %v5773_v58  ;;  %v3545_v62 = vsel %vm3542_vm1, %v3356_v11, %v5775_v26 }
 0x37e   : > { %v3359_v58 = vsel %vm3353_vm0, %v350_v38, %v5023_v4  ;;  %v3358_v26 = vsel %vm3353_vm0, %v349_v30, %v5025_v5  ;;  %v351_v56 = vld [vmem:[%s6516_s20 + $0x30] sm:$0xff]  ;;  %v973_v38 = vld [vmem:[%s6285_s11 + $0x200] sm:$0xff]  ;;  %v354_v30 = vld [vmem:[%s6516_s20 + $0x48] sm:$0xff] }
 0x37f   : > { %v2796_v14 = vpop.permute.xlu1 %2795  ;;  %v2794_v49 = vpop.permute.xlu0 %2793  ;;  %v3548_v1 = vsel %vm3542_vm1, %v3359_v58, %v5781_v10  ;;  %v3547_v11 = vsel %vm3542_vm1, %v3358_v26, %v5783_v51  ;;  %v3361_v10 = vsel %vm3353_vm0, %v352_v61, %v5031_v8  ;;  %v3360_v51 = vsel %vm3353_vm0, %v351_v56, %v5033_v9  ;;  %v975_v58 = vld [vmem:[%s6285_s11 + $0x210] sm:$0xff]  ;;  %v356_v26 = vld [vmem:[%s6516_s20 + $0x58] sm:$0xff] }
 0x380   : > { %v3735_v60 = vsel %vm3731_vm2, %v3546_v22, %v2796_v14  ;;  %v3734_v0 = vsel %vm3731_vm2, %v3545_v62, %v2794_v49  ;;  %v353_v22 = vld [vmem:[%s6516_s20 + $0x40] sm:$0xff]  ;;  %v3550_v62 = vsel %vm3542_vm1, %v3361_v10, %v5789_v19  ;;  %v3549_v14 = vsel %vm3542_vm1, %v3360_v51, %v5791_v59 }
 0x381   : > { %3924 = vst.msk [vmem:[%s6544_s15 + $0x18] sm:$0xff] %vm3920_vm3, %v3735_v60  ;;  %3923 = vst.msk [vmem:[%s6544_s15 + $0x10] sm:$0xff] %vm3920_vm3, %v3734_v0  ;;  %2911 = vrot.lane.b32.xlu1 %v970_v43, %s4821_s12  ;;  %2909 = vrot.lane.b32.xlu0 %v969_v53, %s4821_s12  ;;  %v3363_v19 = vsel %vm3353_vm0, %v354_v30, %v5039_v12  ;;  %v3362_v59 = vsel %vm3353_vm0, %v353_v22, %v5041_v13 }
 0x382   : > { %v974_v53 = vld [vmem:[%s6285_s11 + $0x208] sm:$0xff]  ;;  %v976_v0 = vld [vmem:[%s6285_s11 + $0x218] sm:$0xff]  ;;  %v3551_v61 = vsel %vm3542_vm1, %v3362_v59, %v5799_v35  ;;  %v979_v30 = vld [vmem:[%s6285_s11 + $0x230] sm:$0xff] }
 0x383   : > { %v2800_v57 = vpop.permute.xlu1 %2799  ;;  %v2798_v43 = vpop.permute.xlu0 %2797  ;;  %v360_v22 = vld [vmem:[%s6516_s20 + $0x78] sm:$0xff]  ;;  %v362_v59 = vld [vmem:[%s6516_s20 + $0x88] sm:$0xff] }
 0x384   : > { %v3737_v4 = vsel %vm3731_vm2, %v3548_v1, %v2800_v57  ;;  %v3736_v5 = vsel %vm3731_vm2, %v3547_v11, %v2798_v43  ;;  %v978_v11 = vld [vmem:[%s6285_s11 + $0x228] sm:$0xff]  ;;  %v977_v57 = vld [vmem:[%s6285_s11 + $0x220] sm:$0xff] }
 0x385   : > { %3926 = vst.msk [vmem:[%s6544_s15 + $0x28] sm:$0xff] %vm3920_vm3, %v3737_v4  ;;  %3925 = vst.msk [vmem:[%s6544_s15 + $0x20] sm:$0xff] %vm3920_vm3, %v3736_v5  ;;  %2915 = vrot.lane.b32.xlu1 %v972_v6, %s4821_s12  ;;  %2913 = vrot.lane.b32.xlu0 %v971_v52, %s4821_s12  ;;  %v3552_v52 = vsel %vm3542_vm1, %v3363_v19, %v5797_v3  ;;  %v3365_v3 = vsel %vm3353_vm0, %v356_v26, %v5047_v16 }
 0x386   : > { %v355_v6 = vld [vmem:[%s6516_s20 + $0x50] sm:$0xff]  ;;  %v358_v43 = vld [vmem:[%s6516_s20 + $0x68] sm:$0xff]  ;;  %v357_v4 = vld [vmem:[%s6516_s20 + $0x60] sm:$0xff]  ;;  %v3554_v5 = vsel %vm3542_vm1, %v3365_v3, %v5805_v55 }
 0x387   : > { %v2804_v49 = vpop.permute.xlu1 %2803  ;;  %v2802_v60 = vpop.permute.xlu0 %2801  ;;  %v3364_v35 = vsel %vm3353_vm0, %v355_v6, %v5049_v17  ;;  %v3367_v55 = vsel %vm3353_vm0, %v358_v43, %v5055_v20  ;;  %v981_v19 = vld [vmem:[%s6285_s11 + $0x240] sm:$0xff] }
 0x388   : > { %v3739_v8 = vsel %vm3731_vm2, %v3550_v62, %v2804_v49  ;;  %v3738_v9 = vsel %vm3731_vm2, %v3549_v14, %v2802_v60  ;;  %v3553_v10 = vsel %vm3542_vm1, %v3364_v35, %v5807_v42  ;;  %v3366_v42 = vsel %vm3353_vm0, %v357_v4, %v5057_v21  ;;  %v359_v62 = vld [vmem:[%s6516_s20 + $0x70] sm:$0xff]  ;;  %v985_v43 = vld [vmem:[%s6285_s11 + $0x260] sm:$0xff]  ;;  %v366_v4 = vld [vmem:[%s6516_s20 + $0xa8] sm:$0xff] }
 0x389   : > { %3928 = vst.msk [vmem:[%s6544_s15 + $0x38] sm:$0xff] %vm3920_vm3, %v3739_v8  ;;  %3927 = vst.msk [vmem:[%s6544_s15 + $0x30] sm:$0xff] %vm3920_vm3, %v3738_v9  ;;  %2919 = vrot.lane.b32.xlu1 %v974_v53, %s4821_s12  ;;  %2917 = vrot.lane.b32.xlu0 %v973_v38, %s4821_s12  ;;  %v3556_v14 = vsel %vm3542_vm1, %v3367_v55, %v5813_v47  ;;  %v3555_v49 = vsel %vm3542_vm1, %v3366_v42, %v5815_v27 }
 0x38a   : > { %v980_v38 = vld [vmem:[%s6285_s11 + $0x238] sm:$0xff]  ;;  %v3369_v47 = vsel %vm3353_vm0, %v360_v22, %v5063_v24  ;;  %v3368_v27 = vsel %vm3353_vm0, %v359_v62, %v5065_v25  ;;  %v982_v9 = vld [vmem:[%s6285_s11 + $0x248] sm:$0xff]  ;;  %v987_v55 = vld [vmem:[%s6285_s11 + $0x270] sm:$0xff] }
 0x38b   : > { %v2808_v56 = vpop.permute.xlu1 %2807  ;;  %v2806_v1 = vpop.permute.xlu0 %2805  ;;  %v3557_v26 = vsel %vm3542_vm1, %v3368_v27, %v5823_v50  ;;  %v368_v42 = vld [vmem:[%s6516_s20 + $0xb8] sm:$0xff] }
 0x38c   : > { %v3741_v12 = vsel %vm3731_vm2, %v3552_v52, %v2808_v56  ;;  %v3740_v13 = vsel %vm3731_vm2, %v3551_v61, %v2806_v1  ;;  %v984_v61 = vld [vmem:[%s6285_s11 + $0x258] sm:$0xff]  ;;  %v983_v56 = vld [vmem:[%s6285_s11 + $0x250] sm:$0xff] }
 0x38d   : > { %3930 = vst.msk [vmem:[%s6544_s15 + $0x48] sm:$0xff] %vm3920_vm3, %v3741_v12  ;;  %3929 = vst.msk [vmem:[%s6544_s15 + $0x40] sm:$0xff] %vm3920_vm3, %v3740_v13  ;;  %2923 = vrot.lane.b32.xlu1 %v976_v0, %s4821_s12  ;;  %2921 = vrot.lane.b32.xlu0 %v975_v58, %s4821_s12  ;;  %v3558_v58 = vsel %vm3542_vm1, %v3369_v47, %v5821_v39  ;;  %v3371_v39 = vsel %vm3353_vm0, %v362_v59, %v5071_v28 }
 0x38e   : > { %v361_v0 = vld [vmem:[%s6516_s20 + $0x80] sm:$0xff]  ;;  %v364_v1 = vld [vmem:[%s6516_s20 + $0x98] sm:$0xff]  ;;  %v363_v12 = vld [vmem:[%s6516_s20 + $0x90] sm:$0xff]  ;;  %v3560_v13 = vsel %vm3542_vm1, %v3371_v39, %v5829_v31 }
 0x38f   : > { %v2812_v51 = vpop.permute.xlu1 %2811  ;;  %v2810_v53 = vpop.permute.xlu0 %2809  ;;  %v3370_v50 = vsel %vm3353_vm0, %v361_v0, %v5073_v29  ;;  %v3373_v31 = vsel %vm3353_vm0, %v364_v1, %v5079_v32  ;;  %v991_v59 = vld [vmem:[%s6285_s11 + $0x290] sm:$0xff]  ;;  %v372_v0 = vld [vmem:[%s6516_s20 + $0xd8] sm:$0xff]  ;;  %v994_v39 = vld [vmem:[%s6285_s11 + $0x2a8] sm:$0xff] }
 0x390   : > { %v3743_v16 = vsel %vm3731_vm2, %v3554_v5, %v2812_v51  ;;  %v3742_v17 = vsel %vm3731_vm2, %v3553_v10, %v2810_v53  ;;  %v3559_v3 = vsel %vm3542_vm1, %v3370_v50, %v5831_v34  ;;  %v3372_v34 = vsel %vm3353_vm0, %v363_v12, %v5081_v33  ;;  %v365_v5 = vld [vmem:[%s6516_s20 + $0xa0] sm:$0xff]  ;;  %v8830_v1 = vld [vmem:[#allocation164_spill] sm:$0xff] }
 0x391   : > { %3932 = vst.msk [vmem:[%s6544_s15 + $0x58] sm:$0xff] %vm3920_vm3, %v3743_v16  ;;  %3931 = vst.msk [vmem:[%s6544_s15 + $0x50] sm:$0xff] %vm3920_vm3, %v3742_v17  ;;  %2927 = vrot.lane.b32.xlu1 %v978_v11, %s4821_s12  ;;  %2925 = vrot.lane.b32.xlu0 %v977_v57, %s4821_s12  ;;  %v3562_v10 = vsel %vm3542_vm1, %v3373_v31, %v5837_v23  ;;  %v3561_v51 = vsel %vm3542_vm1, %v3372_v34, %v5839_v18  ;;  %v8833_v34 = vld [vmem:[#allocation5_spill] sm:$0xff] }
 0x392   : > { %v986_v57 = vld [vmem:[%s6285_s11 + $0x268] sm:$0xff]  ;;  %v3375_v23 = vsel %vm3353_vm0, %v366_v4, %v5087_v36  ;;  %v3374_v18 = vsel %vm3353_vm0, %v365_v5, %v5089_v37  ;;  %v988_v17 = vld [vmem:[%s6285_s11 + $0x278] sm:$0xff]  ;;  %v993_v50 = vld [vmem:[%s6285_s11 + $0x2a0] sm:$0xff] }
 0x393   : > { %v2816_v60 = vpop.permute.xlu1 %2815  ;;  %v2814_v8 = vpop.permute.xlu0 %2813  ;;  %v3563_v22 = vsel %vm3542_vm1, %v3374_v18, %v5847_v2  ;;  %v995_v4 = vld [vmem:[%s6285_s11 + $0x2b0] sm:$0xff]  ;;  %v376_v5 = vld [vmem:[%s6516_s20 + $0xf8] sm:$0xff] }
 0x394   : > { %v3745_v20 = vsel %vm3731_vm2, %v3556_v14, %v2816_v60  ;;  %v3744_v21 = vsel %vm3731_vm2, %v3555_v49, %v2814_v8  ;;  %v990_v49 = vld [vmem:[%s6285_s11 + $0x288] sm:$0xff]  ;;  %v989_v60 = vld [vmem:[%s6285_s11 + $0x280] sm:$0xff] }
 0x395   : > { %3934 = vst.msk [vmem:[%s6544_s15 + $0x68] sm:$0xff] %vm3920_vm3, %v3745_v20  ;;  %3933 = vst.msk [vmem:[%s6544_s15 + $0x60] sm:$0xff] %vm3920_vm3, %v3744_v21  ;;  %2931 = vrot.lane.b32.xlu1 %v980_v38, %s4821_s12  ;;  %2929 = vrot.lane.b32.xlu0 %v979_v30, %s4821_s12  ;;  %v3564_v30 = vsel %vm3542_vm1, %v3375_v23, %v5845_v15  ;;  %v3377_v15 = vsel %vm3353_vm0, %v368_v42, %v5095_v40 }
 0x396   : > { %v367_v38 = vld [vmem:[%s6516_s20 + $0xb0] sm:$0xff]  ;;  %v370_v8 = vld [vmem:[%s6516_s20 + $0xc8] sm:$0xff]  ;;  %v369_v20 = vld [vmem:[%s6516_s20 + $0xc0] sm:$0xff]  ;;  %v3566_v21 = vsel %vm3542_vm1, %v3377_v15, %v5853_v7 }
 0x397   : > { %v2820_v6 = vpop.permute.xlu1 %2819  ;;  %v2818_v52 = vpop.permute.xlu0 %2817  ;;  %v3376_v2 = vsel %vm3353_vm0, %v367_v38, %v5097_v41  ;;  %v3379_v7 = vsel %vm3353_vm0, %v370_v8, %v5103_v44  ;;  %v8837_v38 = vld [vmem:[#allocation7_spill] sm:$0xff] }
 0x398   : > { %v3747_v24 = vsel %vm3731_vm2, %v3558_v58, %v2820_v6  ;;  %v3746_v25 = vsel %vm3731_vm2, %v3557_v26, %v2818_v52  ;;  %v3565_v47 = vsel %vm3542_vm1, %v3376_v2, %v5855_v54  ;;  %v3378_v54 = vsel %vm3353_vm0, %v369_v20, %v5105_v45  ;;  %v371_v58 = vld [vmem:[%s6516_s20 + $0xd0] sm:$0xff] }
 0x399   : > { %3936 = vst.msk [vmem:[%s6544_s15 + $0x78] sm:$0xff] %vm3920_vm3, %v3747_v24  ;;  %3935 = vst.msk [vmem:[%s6544_s15 + $0x70] sm:$0xff] %vm3920_vm3, %v3746_v25  ;;  %2935 = vrot.lane.b32.xlu1 %v982_v9, %s4821_s12  ;;  %2933 = vrot.lane.b32.xlu0 %v981_v19, %s4821_s12  ;;  %v3568_v26 = vsel %vm3542_vm1, %v3379_v7, %v5861_v63  ;;  %v3567_v6 = vsel %vm3542_vm1, %v3378_v54, %v5863_v46  ;;  %v8829_v46 = vld [vmem:[#allocation3_spill] sm:$0xff]  ;;  %v8839_v2 = vld [vmem:[#allocation169_spill] sm:$0xff] }
 0x39a   : > { %v992_v19 = vld [vmem:[%s6285_s11 + $0x298] sm:$0xff]  ;;  %v3381_v63 = vsel %vm3353_vm0, %v372_v0, %v5111_v48  ;;  %v3380_v25 = vsel %vm3353_vm0, %v371_v58, %v8829_v46  ;;  %v999_v7 = vld [vmem:[%s6285_s11 + $0x2d0] sm:$0xff]  ;;  %v8843_v58 = vld [vmem:[#allocation171_spill] sm:$0xff] }
 0x39b   : > { %v2824_v35 = vpop.permute.xlu1 %2823  ;;  %v2822_v11 = vpop.permute.xlu0 %2821  ;;  %v3570_v12 = vsel %vm3542_vm1, %v3381_v63, %v8830_v1  ;;  %v380_v54 = vld [vmem:[%s6516_s20 + $0x118] sm:$0xff]  ;;  %v8845_v46 = vld [vmem:[#allocation11_spill] sm:$0xff]  ;;  %v8846_v1 = vld [vmem:[#allocation172_spill] sm:$0xff] }
 0x39c   : > { %v3749_v28 = vsel %vm3731_vm2, %v3560_v13, %v2824_v35  ;;  %v3748_v29 = vsel %vm3731_vm2, %v3559_v3, %v2822_v11  ;;  %v8831_v13 = vld [vmem:[#allocation165_spill] sm:$0xff] }
 0x39d   : > { %3938 = vst.msk [vmem:[%s6544_s15 + $0x88] sm:$0xff] %vm3920_vm3, %v3749_v28  ;;  %3937 = vst.msk [vmem:[%s6544_s15 + $0x80] sm:$0xff] %vm3920_vm3, %v3748_v29  ;;  %2939 = vrot.lane.b32.xlu1 %v984_v61, %s4821_s12  ;;  %2937 = vrot.lane.b32.xlu0 %v983_v56, %s4821_s12  ;;  %v3569_v3 = vsel %vm3542_vm1, %v3380_v25, %v8831_v13  ;;  %v8832_v29 = vld [vmem:[#allocation4_spill] sm:$0xff]  ;;  %v8847_v13 = vld [vmem:[#allocation173_spill] sm:$0xff] }
 0x39e   : > { %v374_v61 = vld [vmem:[%s6516_s20 + $0xe8] sm:$0xff]  ;;  %v373_v56 = vld [vmem:[%s6516_s20 + $0xe0] sm:$0xff] }
 0x39f   : > { %v2828_v53 = vpop.permute.xlu1 %2827  ;;  %v2826_v16 = vpop.permute.xlu0 %2825  ;;  %v3383_v31 = vsel %vm3353_vm0, %v374_v61, %v8832_v29  ;;  %v382_v61 = vld [vmem:[%s6516_s20 + $0x128] sm:$0xff] }
 0x3a0   : > { %v3751_v32 = vsel %vm3731_vm2, %v3562_v10, %v2828_v53  ;;  %v3750_v33 = vsel %vm3731_vm2, %v3561_v51, %v2826_v16  ;;  %v375_v10 = vld [vmem:[%s6516_s20 + $0xf0] sm:$0xff]  ;;  %v8834_v51 = vld [vmem:[#allocation166_spill] sm:$0xff]  ;;  %v8835_v16 = vld [vmem:[#allocation167_spill] sm:$0xff] }
 0x3a1   : > { %3940 = vst.msk [vmem:[%s6544_s15 + $0x98] sm:$0xff] %vm3920_vm3, %v3751_v32  ;;  %3939 = vst.msk [vmem:[%s6544_s15 + $0x90] sm:$0xff] %vm3920_vm3, %v3750_v33  ;;  %2943 = vrot.lane.b32.xlu1 %v986_v57, %s4821_s12  ;;  %2941 = vrot.lane.b32.xlu0 %v985_v43, %s4821_s12  ;;  %v3382_v57 = vsel %vm3353_vm0, %v373_v56, %v8833_v34  ;;  %v3572_v53 = vsel %vm3542_vm1, %v3383_v31, %v8834_v51  ;;  %v8848_v29 = vld [vmem:[#allocation12_spill] sm:$0xff]  ;;  %v8849_v34 = vld [vmem:[#allocation13_spill] sm:$0xff] }
 0x3a2   : > { %v996_v43 = vld [vmem:[%s6285_s11 + $0x2b8] sm:$0xff]  ;;  %v3571_v32 = vsel %vm3542_vm1, %v3382_v57, %v8835_v16  ;;  %v381_v56 = vld [vmem:[%s6516_s20 + $0x120] sm:$0xff]  ;;  %v3391_v31 = vsel %vm3353_vm0, %v382_v61, %v8848_v29  ;;  %v390_v61 = vld [vmem:[%s6516_s20 + $0x168] sm:$0xff] }
 0x3a3   : > { %v2832_v62 = vpop.permute.xlu1 %2831  ;;  %v2830_v14 = vpop.permute.xlu0 %2829  ;;  %v3390_v57 = vsel %vm3353_vm0, %v381_v56, %v8849_v34  ;;  %v8850_v51 = vld [vmem:[#allocation174_spill] sm:$0xff]  ;;  %v8851_v16 = vld [vmem:[#allocation175_spill] sm:$0xff]  ;;  %v8864_v29 = vld [vmem:[#allocation20_spill] sm:$0xff] }
 0x3a4   : > { %v3753_v36 = vsel %vm3731_vm2, %v3564_v30, %v2832_v62  ;;  %v3752_v37 = vsel %vm3731_vm2, %v3563_v22, %v2830_v14  ;;  %v3384_v30 = vsel %vm3353_vm0, %v375_v10, %v8837_v38  ;;  %v998_v22 = vld [vmem:[%s6285_s11 + $0x2c8] sm:$0xff]  ;;  %v997_v62 = vld [vmem:[%s6285_s11 + $0x2c0] sm:$0xff]  ;;  %v383_v10 = vld [vmem:[%s6516_s20 + $0x130] sm:$0xff] }
 0x3a5   : > { %3942 = vst.msk [vmem:[%s6544_s15 + $0xa8] sm:$0xff] %vm3920_vm3, %v3753_v36  ;;  %3941 = vst.msk [vmem:[%s6544_s15 + $0xa0] sm:$0xff] %vm3920_vm3, %v3752_v37  ;;  %2947 = vrot.lane.b32.xlu1 %v988_v17, %s4821_s12  ;;  %2945 = vrot.lane.b32.xlu0 %v987_v55, %s4821_s12  ;;  %v8836_v55 = vld [vmem:[#allocation6_spill] sm:$0xff]  ;;  %v8838_v37 = vld [vmem:[#allocation168_spill] sm:$0xff] }
 0x3a6   : > { %v3385_v42 = vsel %vm3353_vm0, %v376_v5, %v8836_v55  ;;  %v378_v14 = vld [vmem:[%s6516_s20 + $0x108] sm:$0xff]  ;;  %v377_v36 = vld [vmem:[%s6516_s20 + $0x100] sm:$0xff]  ;;  %v384_v5 = vld [vmem:[%s6516_s20 + $0x138] sm:$0xff] }
 0x3a7   : > { %v2836_v27 = vpop.permute.xlu1 %2835  ;;  %v2834_v9 = vpop.permute.xlu0 %2833  ;;  %v3574_v15 = vsel %vm3542_vm1, %v3385_v42, %v8838_v37  ;;  %v8852_v55 = vld [vmem:[#allocation14_spill] sm:$0xff]  ;;  %v8853_v38 = vld [vmem:[#allocation15_spill] sm:$0xff]  ;;  %v8854_v37 = vld [vmem:[#allocation176_spill] sm:$0xff] }
 0x3a8   : > { %v3755_v40 = vsel %vm3731_vm2, %v3566_v21, %v2836_v27  ;;  %v3754_v41 = vsel %vm3731_vm2, %v3565_v47, %v2834_v9  ;;  %v8840_v47 = vld [vmem:[#allocation8_spill] sm:$0xff]  ;;  %v8841_v9 = vld [vmem:[#allocation9_spill] sm:$0xff]  ;;  %v3393_v42 = vsel %vm3353_vm0, %v384_v5, %v8852_v55  ;;  %v389_v56 = vld [vmem:[%s6516_s20 + $0x160] sm:$0xff] }
 0x3a9   : > { %3944 = vst.msk [vmem:[%s6544_s15 + $0xb8] sm:$0xff] %vm3920_vm3, %v3755_v40  ;;  %3943 = vst.msk [vmem:[%s6544_s15 + $0xb0] sm:$0xff] %vm3920_vm3, %v3754_v41  ;;  %2951 = vrot.lane.b32.xlu1 %v990_v49, %s4821_s12  ;;  %2949 = vrot.lane.b32.xlu0 %v989_v60, %s4821_s12  ;;  %v3573_v49 = vsel %vm3542_vm1, %v3384_v30, %v8839_v2  ;;  %v3387_v27 = vsel %vm3353_vm0, %v378_v14, %v8840_v47  ;;  %v8855_v2 = vld [vmem:[#allocation177_spill] sm:$0xff]  ;;  %v8856_v47 = vld [vmem:[#allocation16_spill] sm:$0xff] }
 0x3aa   : > { %v3386_v40 = vsel %vm3353_vm0, %v377_v36, %v8841_v9  ;;  %v1000_v41 = vld [vmem:[%s6285_s11 + $0x2d8] sm:$0xff]  ;;  %v3392_v30 = vsel %vm3353_vm0, %v383_v10, %v8853_v38  ;;  %v386_v14 = vld [vmem:[%s6516_s20 + $0x148] sm:$0xff]  ;;  %v385_v36 = vld [vmem:[%s6516_s20 + $0x140] sm:$0xff] }
 0x3ab   : > { %v2840_v52 = vpop.permute.xlu1 %2839  ;;  %v2838_v24 = vpop.permute.xlu0 %2837  ;;  %v8857_v9 = vld [vmem:[#allocation17_spill] sm:$0xff]  ;;  %v392_v5 = vld [vmem:[%s6516_s20 + $0x178] sm:$0xff]  ;;  %v8869_v38 = vld [vmem:[#allocation23_spill] sm:$0xff] }
 0x3ac   : > { %v3757_v44 = vsel %vm3731_vm2, %v3568_v26, %v2840_v52  ;;  %v3756_v45 = vsel %vm3731_vm2, %v3567_v6, %v2838_v24  ;;  %v3575_v26 = vsel %vm3542_vm1, %v3386_v40, %v8843_v58  ;;  %v3394_v40 = vsel %vm3353_vm0, %v385_v36, %v8857_v9  ;;  %v8859_v58 = vld [vmem:[#allocation179_spill] sm:$0xff]  ;;  %v8865_v34 = vld [vmem:[#allocation21_spill] sm:$0xff]  ;;  %v8868_v55 = vld [vmem:[#allocation22_spill] sm:$0xff] }
 0x3ad   : > { %3946 = vst.msk [vmem:[%s6544_s15 + $0xc8] sm:$0xff] %vm3920_vm3, %v3757_v44  ;;  %3945 = vst.msk [vmem:[%s6544_s15 + $0xc0] sm:$0xff] %vm3920_vm3, %v3756_v45  ;;  %2955 = vrot.lane.b32.xlu1 %v992_v19, %s4821_s12  ;;  %2953 = vrot.lane.b32.xlu0 %v991_v59, %s4821_s12  ;;  %v8842_v59 = vld [vmem:[#allocation170_spill] sm:$0xff]  ;;  %v8873_v9 = vld [vmem:[#allocation25_spill] sm:$0xff] }
 0x3ae   : > { %v379_v19 = vld [vmem:[%s6516_s20 + $0x110] sm:$0xff]  ;;  %v3576_v0 = vsel %vm3542_vm1, %v3387_v27, %v8842_v59  ;;  %v8844_v45 = vld [vmem:[#allocation10_spill] sm:$0xff]  ;;  %v3395_v27 = vsel %vm3353_vm0, %v386_v14, %v8856_v47  ;;  %v394_v14 = vld [vmem:[%s6516_s20 + $0x188] sm:$0xff] }
 0x3af   : > { %v2844_v35 = vpop.permute.xlu1 %2843  ;;  %v2842_v11 = vpop.permute.xlu0 %2841  ;;  %v3389_v63 = vsel %vm3353_vm0, %v380_v54, %v8844_v45  ;;  %v3388_v25 = vsel %vm3353_vm0, %v379_v19, %v8845_v46  ;;  %v388_v54 = vld [vmem:[%s6516_s20 + $0x158] sm:$0xff]  ;;  %v387_v19 = vld [vmem:[%s6516_s20 + $0x150] sm:$0xff]  ;;  %v8861_v46 = vld [vmem:[#allocation19_spill] sm:$0xff] }
 0x3b0   : > { %v3759_v48 = vsel %vm3731_vm2, %v3570_v12, %v2844_v35  ;;  %v3758_v28 = vsel %vm3731_vm2, %v3569_v3, %v2842_v11  ;;  %v3578_v12 = vsel %vm3542_vm1, %v3389_v63, %v8846_v1  ;;  %v3577_v3 = vsel %vm3542_vm1, %v3388_v25, %v8847_v13  ;;  %v8858_v59 = vld [vmem:[#allocation178_spill] sm:$0xff]  ;;  %v8862_v1 = vld [vmem:[#allocation180_spill] sm:$0xff]  ;;  %v8863_v13 = vld [vmem:[#allocation181_spill] sm:$0xff] }
 0x3b1   : > { %3948 = vst.msk [vmem:[%s6544_s15 + $0xd8] sm:$0xff] %vm3920_vm3, %v3759_v48  ;;  %3947 = vst.msk [vmem:[%s6544_s15 + $0xd0] sm:$0xff] %vm3920_vm3, %v3758_v28  ;;  %2959 = vrot.lane.b32.xlu1 %v994_v39, %s4821_s12  ;;  %2957 = vrot.lane.b32.xlu0 %v993_v50, %s4821_s12  ;;  %v8860_v45 = vld [vmem:[#allocation18_spill] sm:$0xff]  ;;  %v3396_v25 = vsel %vm3353_vm0, %v387_v19, %v8861_v46  ;;  %v8872_v47 = vld [vmem:[#allocation24_spill] sm:$0xff] }
 0x3b2   : > { %v1002_v39 = vld [vmem:[%s6285_s11 + $0x2e8] sm:$0xff]  ;;  %v1001_v50 = vld [vmem:[%s6285_s11 + $0x2e0] sm:$0xff]  ;;  %v3397_v63 = vsel %vm3353_vm0, %v388_v54, %v8860_v45  ;;  %v391_v10 = vld [vmem:[%s6516_s20 + $0x170] sm:$0xff] }
 0x3b3   : > { %v2848_v33 = vpop.permute.xlu1 %2847  ;;  %v2846_v23 = vpop.permute.xlu0 %2845  ;;  %v393_v36 = vld [vmem:[%s6516_s20 + $0x180] sm:$0xff]  ;;  %v396_v54 = vld [vmem:[%s6516_s20 + $0x198] sm:$0xff]  ;;  %v395_v19 = vld [vmem:[%s6516_s20 + $0x190] sm:$0xff] }
 0x3b4   : > { %v3761_v18 = vsel %vm3731_vm2, %v3572_v53, %v2848_v33  ;;  %v3760_v17 = vsel %vm3731_vm2, %v3571_v32, %v2846_v23  ;;  %v3580_v53 = vsel %vm3542_vm1, %v3391_v31, %v8850_v51  ;;  %v3579_v32 = vsel %vm3542_vm1, %v3390_v57, %v8851_v16  ;;  %v8866_v51 = vld [vmem:[#allocation182_spill] sm:$0xff]  ;;  %v8867_v16 = vld [vmem:[#allocation183_spill] sm:$0xff] }
 0x3b5   : > { %3950 = vst.msk [vmem:[%s6544_s15 + $0xe8] sm:$0xff] %vm3920_vm3, %v3761_v18  ;;  %3949 = vst.msk [vmem:[%s6544_s15 + $0xe0] sm:$0xff] %vm3920_vm3, %v3760_v17  ;;  %2963 = vrot.lane.b32.xlu1 %v996_v43, %s4821_s12  ;;  %2961 = vrot.lane.b32.xlu0 %v995_v4, %s4821_s12  ;;  %v3399_v31 = vsel %vm3353_vm0, %v390_v61, %v8864_v29  ;;  %v3398_v57 = vsel %vm3353_vm0, %v389_v56, %v8865_v34  ;;  %v8876_v45 = vld [vmem:[#allocation26_spill] sm:$0xff]  ;;  %v8877_v46 = vld [vmem:[#allocation27_spill] sm:$0xff] }
 0x3b6   : > { %v1004_v43 = vld [vmem:[%s6285_s11 + $0x2f8] sm:$0xff]  ;;  %v1003_v4 = vld [vmem:[%s6285_s11 + $0x2f0] sm:$0xff]  ;;  %v398_v61 = vld [vmem:[%s6516_s20 + $0x1a8] sm:$0xff] }
 0x3b7   : > { %v2852_v60 = vpop.permute.xlu1 %2851  ;;  %v2850_v8 = vpop.permute.xlu0 %2849  ;;  %v397_v56 = vld [vmem:[%s6516_s20 + $0x1a0] sm:$0xff]  ;;  %v8880_v29 = vld [vmem:[#allocation28_spill] sm:$0xff]  ;;  %v8881_v34 = vld [vmem:[#allocation29_spill] sm:$0xff] }
 0x3b8   : > { %v3763_v20 = vsel %vm3731_vm2, %v3574_v15, %v2852_v60  ;;  %v3762_v21 = vsel %vm3731_vm2, %v3573_v49, %v2850_v8  ;;  %v3582_v15 = vsel %vm3542_vm1, %v3393_v42, %v8854_v37  ;;  %v3581_v49 = vsel %vm3542_vm1, %v3392_v30, %v8855_v2  ;;  %v8870_v37 = vld [vmem:[#allocation184_spill] sm:$0xff]  ;;  %v8871_v2 = vld [vmem:[#allocation185_spill] sm:$0xff] }
 0x3b9   : > { %3952 = vst.msk [vmem:[%s6544_s15 + $0xf8] sm:$0xff] %vm3920_vm3, %v3763_v20  ;;  %3951 = vst.msk [vmem:[%s6544_s15 + $0xf0] sm:$0xff] %vm3920_vm3, %v3762_v21  ;;  %2967 = vrot.lane.b32.xlu1 %v998_v22, %s4821_s12  ;;  %2965 = vrot.lane.b32.xlu0 %v997_v62, %s4821_s12  ;;  %v3401_v42 = vsel %vm3353_vm0, %v392_v5, %v8868_v55  ;;  %v3400_v30 = vsel %vm3353_vm0, %v391_v10, %v8869_v38  ;;  %v8884_v55 = vld [vmem:[#allocation30_spill] sm:$0xff]  ;;  %v8885_v38 = vld [vmem:[#allocation31_spill] sm:$0xff] }
 0x3ba   : > { %v1006_v22 = vld [vmem:[%s6285_s11 + $0x308] sm:$0xff]  ;;  %v1005_v62 = vld [vmem:[%s6285_s11 + $0x300] sm:$0xff]  ;;  %v400_v5 = vld [vmem:[%s6516_s20 + $0x1b8] sm:$0xff] }
 0x3bb   : > { %v2856_v6 = vpop.permute.xlu1 %2855  ;;  %v2854_v52 = vpop.permute.xlu0 %2853  ;;  %v399_v10 = vld [vmem:[%s6516_s20 + $0x1b0] sm:$0xff] }
 0x3bc   : > { %v3765_v24 = vsel %vm3731_vm2, %v3576_v0, %v2856_v6  ;;  %v3764_v44 = vsel %vm3731_vm2, %v3575_v26, %v2854_v52  ;;  %v3584_v0 = vsel %vm3542_vm1, %v3395_v27, %v8858_v59  ;;  %v3583_v26 = vsel %vm3542_vm1, %v3394_v40, %v8859_v58  ;;  %v8874_v59 = vld [vmem:[#allocation186_spill] sm:$0xff]  ;;  %v8875_v58 = vld [vmem:[#allocation187_spill] sm:$0xff] }
 0x3bd   : > { %3954 = vst.msk [vmem:[%s6544_s15 + $0x108] sm:$0xff] %vm3920_vm3, %v3765_v24  ;;  %3953 = vst.msk [vmem:[%s6544_s15 + $0x100] sm:$0xff] %vm3920_vm3, %v3764_v44  ;;  %2971 = vrot.lane.b32.xlu1 %v1000_v41, %s4821_s12  ;;  %2969 = vrot.lane.b32.xlu0 %v999_v7, %s4821_s12  ;;  %v3403_v27 = vsel %vm3353_vm0, %v394_v14, %v8872_v47  ;;  %v3402_v40 = vsel %vm3353_vm0, %v393_v36, %v8873_v9  ;;  %v8888_v47 = vld [vmem:[#allocation32_spill] sm:$0xff]  ;;  %v8889_v9 = vld [vmem:[#allocation33_spill] sm:$0xff] }
 0x3be   : > { %v1008_v41 = vld [vmem:[%s6285_s11 + $0x318] sm:$0xff]  ;;  %v1007_v7 = vld [vmem:[%s6285_s11 + $0x310] sm:$0xff]  ;;  %v402_v14 = vld [vmem:[%s6516_s20 + $0x1c8] sm:$0xff] }
 0x3bf   : > { %v2860_v35 = vpop.permute.xlu1 %2859  ;;  %v2858_v11 = vpop.permute.xlu0 %2857  ;;  %v401_v36 = vld [vmem:[%s6516_s20 + $0x1c0] sm:$0xff] }
 0x3c0   : > { %v3767_v48 = vsel %vm3731_vm2, %v3578_v12, %v2860_v35  ;;  %v3766_v28 = vsel %vm3731_vm2, %v3577_v3, %v2858_v11  ;;  %v3586_v12 = vsel %vm3542_vm1, %v3397_v63, %v8862_v1  ;;  %v3585_v3 = vsel %vm3542_vm1, %v3396_v25, %v8863_v13  ;;  %v8878_v1 = vld [vmem:[#allocation188_spill] sm:$0xff]  ;;  %v8879_v13 = vld [vmem:[#allocation189_spill] sm:$0xff] }
 0x3c1   : > { %3956 = vst.msk [vmem:[%s6544_s15 + $0x118] sm:$0xff] %vm3920_vm3, %v3767_v48  ;;  %3955 = vst.msk [vmem:[%s6544_s15 + $0x110] sm:$0xff] %vm3920_vm3, %v3766_v28  ;;  %2975 = vrot.lane.b32.xlu1 %v1002_v39, %s4821_s12  ;;  %2973 = vrot.lane.b32.xlu0 %v1001_v50, %s4821_s12  ;;  %v3405_v63 = vsel %vm3353_vm0, %v396_v54, %v8876_v45  ;;  %v3404_v25 = vsel %vm3353_vm0, %v395_v19, %v8877_v46  ;;  %v8892_v45 = vld [vmem:[#allocation34_spill] sm:$0xff]  ;;  %v8893_v46 = vld [vmem:[#allocation35_spill] sm:$0xff] }
 0x3c2   : > { %v1010_v39 = vld [vmem:[%s6285_s11 + $0x328] sm:$0xff]  ;;  %v1009_v50 = vld [vmem:[%s6285_s11 + $0x320] sm:$0xff]  ;;  %v404_v54 = vld [vmem:[%s6516_s20 + $0x1d8] sm:$0xff] }
 0x3c3   : > { %v2864_v33 = vpop.permute.xlu1 %2863  ;;  %v2862_v23 = vpop.permute.xlu0 %2861  ;;  %v403_v19 = vld [vmem:[%s6516_s20 + $0x1d0] sm:$0xff] }
 0x3c4   : > { %v3769_v18 = vsel %vm3731_vm2, %v3580_v53, %v2864_v33  ;;  %v3768_v17 = vsel %vm3731_vm2, %v3579_v32, %v2862_v23  ;;  %v3588_v53 = vsel %vm3542_vm1, %v3399_v31, %v8866_v51  ;;  %v3587_v32 = vsel %vm3542_vm1, %v3398_v57, %v8867_v16  ;;  %v8882_v51 = vld [vmem:[#allocation190_spill] sm:$0xff]  ;;  %v8883_v16 = vld [vmem:[#allocation191_spill] sm:$0xff] }
 0x3c5   : > { %3958 = vst.msk [vmem:[%s6544_s15 + $0x128] sm:$0xff] %vm3920_vm3, %v3769_v18  ;;  %3957 = vst.msk [vmem:[%s6544_s15 + $0x120] sm:$0xff] %vm3920_vm3, %v3768_v17  ;;  %2979 = vrot.lane.b32.xlu1 %v1004_v43, %s4821_s12  ;;  %2977 = vrot.lane.b32.xlu0 %v1003_v4, %s4821_s12  ;;  %v3407_v31 = vsel %vm3353_vm0, %v398_v61, %v8880_v29  ;;  %v3406_v57 = vsel %vm3353_vm0, %v397_v56, %v8881_v34  ;;  %v8896_v29 = vld [vmem:[#allocation36_spill] sm:$0xff]  ;;  %v8897_v34 = vld [vmem:[#allocation37_spill] sm:$0xff] }
 0x3c6   : > { %v1012_v43 = vld [vmem:[%s6285_s11 + $0x338] sm:$0xff]  ;;  %v1011_v4 = vld [vmem:[%s6285_s11 + $0x330] sm:$0xff]  ;;  %v406_v61 = vld [vmem:[%s6516_s20 + $0x1e8] sm:$0xff] }
 0x3c7   : > { %v2868_v60 = vpop.permute.xlu1 %2867  ;;  %v2866_v8 = vpop.permute.xlu0 %2865  ;;  %v405_v56 = vld [vmem:[%s6516_s20 + $0x1e0] sm:$0xff] }
 0x3c8   : > { %v3771_v20 = vsel %vm3731_vm2, %v3582_v15, %v2868_v60  ;;  %v3770_v21 = vsel %vm3731_vm2, %v3581_v49, %v2866_v8  ;;  %v3590_v15 = vsel %vm3542_vm1, %v3401_v42, %v8870_v37  ;;  %v3589_v49 = vsel %vm3542_vm1, %v3400_v30, %v8871_v2  ;;  %v8886_v37 = vld [vmem:[#allocation192_spill] sm:$0xff]  ;;  %v8887_v2 = vld [vmem:[#allocation193_spill] sm:$0xff] }
 0x3c9   : > { %3960 = vst.msk [vmem:[%s6544_s15 + $0x138] sm:$0xff] %vm3920_vm3, %v3771_v20  ;;  %3959 = vst.msk [vmem:[%s6544_s15 + $0x130] sm:$0xff] %vm3920_vm3, %v3770_v21  ;;  %2983 = vrot.lane.b32.xlu1 %v1006_v22, %s4821_s12  ;;  %2981 = vrot.lane.b32.xlu0 %v1005_v62, %s4821_s12  ;;  %v3409_v42 = vsel %vm3353_vm0, %v400_v5, %v8884_v55  ;;  %v3408_v30 = vsel %vm3353_vm0, %v399_v10, %v8885_v38  ;;  %v8900_v55 = vld [vmem:[#allocation38_spill] sm:$0xff]  ;;  %v8901_v38 = vld [vmem:[#allocation39_spill] sm:$0xff] }
 0x3ca   : > { %v1014_v22 = vld [vmem:[%s6285_s11 + $0x348] sm:$0xff]  ;;  %v1013_v62 = vld [vmem:[%s6285_s11 + $0x340] sm:$0xff]  ;;  %v408_v5 = vld [vmem:[%s6516_s20 + $0x1f8] sm:$0xff] }
 0x3cb   : > { %v2872_v6 = vpop.permute.xlu1 %2871  ;;  %v2870_v52 = vpop.permute.xlu0 %2869  ;;  %v407_v10 = vld [vmem:[%s6516_s20 + $0x1f0] sm:$0xff] }
 0x3cc   : > { %v3773_v24 = vsel %vm3731_vm2, %v3584_v0, %v2872_v6  ;;  %v3772_v44 = vsel %vm3731_vm2, %v3583_v26, %v2870_v52  ;;  %v3592_v0 = vsel %vm3542_vm1, %v3403_v27, %v8874_v59  ;;  %v3591_v26 = vsel %vm3542_vm1, %v3402_v40, %v8875_v58  ;;  %v8890_v59 = vld [vmem:[#allocation194_spill] sm:$0xff]  ;;  %v8891_v58 = vld [vmem:[#allocation195_spill] sm:$0xff] }
 0x3cd   : > { %3962 = vst.msk [vmem:[%s6544_s15 + $0x148] sm:$0xff] %vm3920_vm3, %v3773_v24  ;;  %3961 = vst.msk [vmem:[%s6544_s15 + $0x140] sm:$0xff] %vm3920_vm3, %v3772_v44  ;;  %2987 = vrot.lane.b32.xlu1 %v1008_v41, %s4821_s12  ;;  %2985 = vrot.lane.b32.xlu0 %v1007_v7, %s4821_s12  ;;  %v3411_v27 = vsel %vm3353_vm0, %v402_v14, %v8888_v47  ;;  %v3410_v40 = vsel %vm3353_vm0, %v401_v36, %v8889_v9  ;;  %v8904_v47 = vld [vmem:[#allocation40_spill] sm:$0xff]  ;;  %v8905_v9 = vld [vmem:[#allocation41_spill] sm:$0xff] }
 0x3ce   : > { %v1016_v41 = vld [vmem:[%s6285_s11 + $0x358] sm:$0xff]  ;;  %v1015_v7 = vld [vmem:[%s6285_s11 + $0x350] sm:$0xff]  ;;  %v410_v14 = vld [vmem:[%s6516_s20 + $0x208] sm:$0xff] }
 0x3cf   : > { %v2876_v35 = vpop.permute.xlu1 %2875  ;;  %v2874_v11 = vpop.permute.xlu0 %2873  ;;  %v409_v36 = vld [vmem:[%s6516_s20 + $0x200] sm:$0xff] }
 0x3d0   : > { %v3775_v48 = vsel %vm3731_vm2, %v3586_v12, %v2876_v35  ;;  %v3774_v28 = vsel %vm3731_vm2, %v3585_v3, %v2874_v11  ;;  %v3594_v12 = vsel %vm3542_vm1, %v3405_v63, %v8878_v1  ;;  %v3593_v3 = vsel %vm3542_vm1, %v3404_v25, %v8879_v13  ;;  %v8894_v1 = vld [vmem:[#allocation196_spill] sm:$0xff]  ;;  %v8895_v13 = vld [vmem:[#allocation197_spill] sm:$0xff] }
 0x3d1   : > { %3964 = vst.msk [vmem:[%s6544_s15 + $0x158] sm:$0xff] %vm3920_vm3, %v3775_v48  ;;  %3963 = vst.msk [vmem:[%s6544_s15 + $0x150] sm:$0xff] %vm3920_vm3, %v3774_v28  ;;  %2991 = vrot.lane.b32.xlu1 %v1010_v39, %s4821_s12  ;;  %2989 = vrot.lane.b32.xlu0 %v1009_v50, %s4821_s12  ;;  %v3413_v63 = vsel %vm3353_vm0, %v404_v54, %v8892_v45  ;;  %v3412_v25 = vsel %vm3353_vm0, %v403_v19, %v8893_v46  ;;  %v8908_v45 = vld [vmem:[#allocation42_spill] sm:$0xff]  ;;  %v8909_v46 = vld [vmem:[#allocation43_spill] sm:$0xff] }
 0x3d2   : > { %v1018_v39 = vld [vmem:[%s6285_s11 + $0x368] sm:$0xff]  ;;  %v1017_v50 = vld [vmem:[%s6285_s11 + $0x360] sm:$0xff]  ;;  %v412_v54 = vld [vmem:[%s6516_s20 + $0x218] sm:$0xff] }
 0x3d3   : > { %v2880_v33 = vpop.permute.xlu1 %2879  ;;  %v2878_v23 = vpop.permute.xlu0 %2877  ;;  %v411_v19 = vld [vmem:[%s6516_s20 + $0x210] sm:$0xff] }
 0x3d4   : > { %v3777_v18 = vsel %vm3731_vm2, %v3588_v53, %v2880_v33  ;;  %v3776_v17 = vsel %vm3731_vm2, %v3587_v32, %v2878_v23  ;;  %v3596_v53 = vsel %vm3542_vm1, %v3407_v31, %v8882_v51  ;;  %v3595_v32 = vsel %vm3542_vm1, %v3406_v57, %v8883_v16  ;;  %v8898_v51 = vld [vmem:[#allocation198_spill] sm:$0xff]  ;;  %v8899_v16 = vld [vmem:[#allocation199_spill] sm:$0xff] }
 0x3d5   : > { %3966 = vst.msk [vmem:[%s6544_s15 + $0x168] sm:$0xff] %vm3920_vm3, %v3777_v18  ;;  %3965 = vst.msk [vmem:[%s6544_s15 + $0x160] sm:$0xff] %vm3920_vm3, %v3776_v17  ;;  %2995 = vrot.lane.b32.xlu1 %v1012_v43, %s4821_s12  ;;  %2993 = vrot.lane.b32.xlu0 %v1011_v4, %s4821_s12  ;;  %v3415_v31 = vsel %vm3353_vm0, %v406_v61, %v8896_v29  ;;  %v3414_v57 = vsel %vm3353_vm0, %v405_v56, %v8897_v34  ;;  %v8912_v29 = vld [vmem:[#allocation44_spill] sm:$0xff]  ;;  %v8913_v34 = vld [vmem:[#allocation45_spill] sm:$0xff] }
 0x3d6   : > { %v1020_v43 = vld [vmem:[%s6285_s11 + $0x378] sm:$0xff]  ;;  %v1019_v4 = vld [vmem:[%s6285_s11 + $0x370] sm:$0xff]  ;;  %v414_v61 = vld [vmem:[%s6516_s20 + $0x228] sm:$0xff] }
 0x3d7   : > { %v2884_v60 = vpop.permute.xlu1 %2883  ;;  %v2882_v8 = vpop.permute.xlu0 %2881  ;;  %v413_v56 = vld [vmem:[%s6516_s20 + $0x220] sm:$0xff] }
 0x3d8   : > { %v3779_v20 = vsel %vm3731_vm2, %v3590_v15, %v2884_v60  ;;  %v3778_v21 = vsel %vm3731_vm2, %v3589_v49, %v2882_v8  ;;  %v3598_v15 = vsel %vm3542_vm1, %v3409_v42, %v8886_v37  ;;  %v3597_v49 = vsel %vm3542_vm1, %v3408_v30, %v8887_v2  ;;  %v8902_v37 = vld [vmem:[#allocation200_spill] sm:$0xff]  ;;  %v8903_v2 = vld [vmem:[#allocation201_spill] sm:$0xff] }
 0x3d9   : > { %3968 = vst.msk [vmem:[%s6544_s15 + $0x178] sm:$0xff] %vm3920_vm3, %v3779_v20  ;;  %3967 = vst.msk [vmem:[%s6544_s15 + $0x170] sm:$0xff] %vm3920_vm3, %v3778_v21  ;;  %2999 = vrot.lane.b32.xlu1 %v1014_v22, %s4821_s12  ;;  %2997 = vrot.lane.b32.xlu0 %v1013_v62, %s4821_s12  ;;  %v3417_v42 = vsel %vm3353_vm0, %v408_v5, %v8900_v55  ;;  %v3416_v30 = vsel %vm3353_vm0, %v407_v10, %v8901_v38  ;;  %v8916_v55 = vld [vmem:[#allocation46_spill] sm:$0xff]  ;;  %v8917_v38 = vld [vmem:[#allocation47_spill] sm:$0xff] }
 0x3da   : > { %v1022_v22 = vld [vmem:[%s6285_s11 + $0x388] sm:$0xff]  ;;  %v1021_v62 = vld [vmem:[%s6285_s11 + $0x380] sm:$0xff]  ;;  %v416_v5 = vld [vmem:[%s6516_s20 + $0x238] sm:$0xff] }
 0x3db   : > { %v2888_v6 = vpop.permute.xlu1 %2887  ;;  %v2886_v52 = vpop.permute.xlu0 %2885  ;;  %v415_v10 = vld [vmem:[%s6516_s20 + $0x230] sm:$0xff] }
 0x3dc   : > { %v3781_v24 = vsel %vm3731_vm2, %v3592_v0, %v2888_v6  ;;  %v3780_v44 = vsel %vm3731_vm2, %v3591_v26, %v2886_v52  ;;  %v3600_v0 = vsel %vm3542_vm1, %v3411_v27, %v8890_v59  ;;  %v3599_v26 = vsel %vm3542_vm1, %v3410_v40, %v8891_v58  ;;  %v8906_v59 = vld [vmem:[#allocation202_spill] sm:$0xff]  ;;  %v8907_v58 = vld [vmem:[#allocation203_spill] sm:$0xff] }
 0x3dd   : > { %3970 = vst.msk [vmem:[%s6544_s15 + $0x188] sm:$0xff] %vm3920_vm3, %v3781_v24  ;;  %3969 = vst.msk [vmem:[%s6544_s15 + $0x180] sm:$0xff] %vm3920_vm3, %v3780_v44  ;;  %3003 = vrot.lane.b32.xlu1 %v1016_v41, %s4821_s12  ;;  %3001 = vrot.lane.b32.xlu0 %v1015_v7, %s4821_s12  ;;  %v3419_v27 = vsel %vm3353_vm0, %v410_v14, %v8904_v47  ;;  %v3418_v40 = vsel %vm3353_vm0, %v409_v36, %v8905_v9  ;;  %v8920_v47 = vld [vmem:[#allocation48_spill] sm:$0xff]  ;;  %v8921_v9 = vld [vmem:[#allocation49_spill] sm:$0xff] }
 0x3de   : > { %v1024_v41 = vld [vmem:[%s6285_s11 + $0x398] sm:$0xff]  ;;  %v1023_v7 = vld [vmem:[%s6285_s11 + $0x390] sm:$0xff]  ;;  %v418_v14 = vld [vmem:[%s6516_s20 + $0x248] sm:$0xff] }
 0x3df   : > { %v2892_v35 = vpop.permute.xlu1 %2891  ;;  %v2890_v11 = vpop.permute.xlu0 %2889  ;;  %v417_v36 = vld [vmem:[%s6516_s20 + $0x240] sm:$0xff] }
 0x3e0   : > { %v3783_v48 = vsel %vm3731_vm2, %v3594_v12, %v2892_v35  ;;  %v3782_v28 = vsel %vm3731_vm2, %v3593_v3, %v2890_v11  ;;  %v3602_v12 = vsel %vm3542_vm1, %v3413_v63, %v8894_v1  ;;  %v3601_v3 = vsel %vm3542_vm1, %v3412_v25, %v8895_v13  ;;  %v8910_v1 = vld [vmem:[#allocation204_spill] sm:$0xff]  ;;  %v8911_v13 = vld [vmem:[#allocation205_spill] sm:$0xff] }
 0x3e1   : > { %3972 = vst.msk [vmem:[%s6544_s15 + $0x198] sm:$0xff] %vm3920_vm3, %v3783_v48  ;;  %3971 = vst.msk [vmem:[%s6544_s15 + $0x190] sm:$0xff] %vm3920_vm3, %v3782_v28  ;;  %3007 = vrot.lane.b32.xlu1 %v1018_v39, %s4821_s12  ;;  %3005 = vrot.lane.b32.xlu0 %v1017_v50, %s4821_s12  ;;  %v3421_v63 = vsel %vm3353_vm0, %v412_v54, %v8908_v45  ;;  %v3420_v25 = vsel %vm3353_vm0, %v411_v19, %v8909_v46  ;;  %v8924_v45 = vld [vmem:[#allocation50_spill] sm:$0xff]  ;;  %v8925_v46 = vld [vmem:[#allocation51_spill] sm:$0xff] }
 0x3e2   : > { %v1026_v39 = vld [vmem:[%s6285_s11 + $0x3a8] sm:$0xff]  ;;  %v1025_v50 = vld [vmem:[%s6285_s11 + $0x3a0] sm:$0xff]  ;;  %v420_v54 = vld [vmem:[%s6516_s20 + $0x258] sm:$0xff] }
 0x3e3   : > { %v2896_v33 = vpop.permute.xlu1 %2895  ;;  %v2894_v23 = vpop.permute.xlu0 %2893  ;;  %v419_v19 = vld [vmem:[%s6516_s20 + $0x250] sm:$0xff] }
 0x3e4   : > { %v3785_v18 = vsel %vm3731_vm2, %v3596_v53, %v2896_v33  ;;  %v3784_v17 = vsel %vm3731_vm2, %v3595_v32, %v2894_v23  ;;  %v3604_v53 = vsel %vm3542_vm1, %v3415_v31, %v8898_v51  ;;  %v3603_v32 = vsel %vm3542_vm1, %v3414_v57, %v8899_v16  ;;  %v8914_v51 = vld [vmem:[#allocation206_spill] sm:$0xff]  ;;  %v8915_v16 = vld [vmem:[#allocation207_spill] sm:$0xff] }
 0x3e5   : > { %3974 = vst.msk [vmem:[%s6544_s15 + $0x1a8] sm:$0xff] %vm3920_vm3, %v3785_v18  ;;  %3973 = vst.msk [vmem:[%s6544_s15 + $0x1a0] sm:$0xff] %vm3920_vm3, %v3784_v17  ;;  %3011 = vrot.lane.b32.xlu1 %v1020_v43, %s4821_s12  ;;  %3009 = vrot.lane.b32.xlu0 %v1019_v4, %s4821_s12  ;;  %v3423_v31 = vsel %vm3353_vm0, %v414_v61, %v8912_v29  ;;  %v3422_v57 = vsel %vm3353_vm0, %v413_v56, %v8913_v34  ;;  %v8928_v29 = vld [vmem:[#allocation52_spill] sm:$0xff]  ;;  %v8929_v34 = vld [vmem:[#allocation53_spill] sm:$0xff] }
 0x3e6   : > { %v1028_v43 = vld [vmem:[%s6285_s11 + $0x3b8] sm:$0xff]  ;;  %v1027_v4 = vld [vmem:[%s6285_s11 + $0x3b0] sm:$0xff]  ;;  %v422_v61 = vld [vmem:[%s6516_s20 + $0x268] sm:$0xff] }
 0x3e7   : > { %v2900_v60 = vpop.permute.xlu1 %2899  ;;  %v2898_v8 = vpop.permute.xlu0 %2897  ;;  %v421_v56 = vld [vmem:[%s6516_s20 + $0x260] sm:$0xff] }
 0x3e8   : > { %v3787_v20 = vsel %vm3731_vm2, %v3598_v15, %v2900_v60  ;;  %v3786_v21 = vsel %vm3731_vm2, %v3597_v49, %v2898_v8  ;;  %v3606_v15 = vsel %vm3542_vm1, %v3417_v42, %v8902_v37  ;;  %v3605_v49 = vsel %vm3542_vm1, %v3416_v30, %v8903_v2  ;;  %v8918_v37 = vld [vmem:[#allocation208_spill] sm:$0xff]  ;;  %v8919_v2 = vld [vmem:[#allocation209_spill] sm:$0xff] }
 0x3e9   : > { %3976 = vst.msk [vmem:[%s6544_s15 + $0x1b8] sm:$0xff] %vm3920_vm3, %v3787_v20  ;;  %3975 = vst.msk [vmem:[%s6544_s15 + $0x1b0] sm:$0xff] %vm3920_vm3, %v3786_v21  ;;  %3015 = vrot.lane.b32.xlu1 %v1022_v22, %s4821_s12  ;;  %3013 = vrot.lane.b32.xlu0 %v1021_v62, %s4821_s12  ;;  %v3425_v42 = vsel %vm3353_vm0, %v416_v5, %v8916_v55  ;;  %v3424_v30 = vsel %vm3353_vm0, %v415_v10, %v8917_v38  ;;  %v8932_v55 = vld [vmem:[#allocation54_spill] sm:$0xff]  ;;  %v8933_v38 = vld [vmem:[#allocation55_spill] sm:$0xff] }
 0x3ea   : > { %v1030_v22 = vld [vmem:[%s6285_s11 + $0x3c8] sm:$0xff]  ;;  %v1029_v62 = vld [vmem:[%s6285_s11 + $0x3c0] sm:$0xff]  ;;  %v424_v5 = vld [vmem:[%s6516_s20 + $0x278] sm:$0xff] }
 0x3eb   : > { %v2904_v6 = vpop.permute.xlu1 %2903  ;;  %v2902_v52 = vpop.permute.xlu0 %2901  ;;  %v423_v10 = vld [vmem:[%s6516_s20 + $0x270] sm:$0xff] }
 0x3ec   : > { %v3789_v24 = vsel %vm3731_vm2, %v3600_v0, %v2904_v6  ;;  %v3788_v44 = vsel %vm3731_vm2, %v3599_v26, %v2902_v52  ;;  %v3608_v0 = vsel %vm3542_vm1, %v3419_v27, %v8906_v59  ;;  %v3607_v26 = vsel %vm3542_vm1, %v3418_v40, %v8907_v58  ;;  %v8922_v59 = vld [vmem:[#allocation210_spill] sm:$0xff]  ;;  %v8923_v58 = vld [vmem:[#allocation211_spill] sm:$0xff] }
 0x3ed   : > { %3978 = vst.msk [vmem:[%s6544_s15 + $0x1c8] sm:$0xff] %vm3920_vm3, %v3789_v24  ;;  %3977 = vst.msk [vmem:[%s6544_s15 + $0x1c0] sm:$0xff] %vm3920_vm3, %v3788_v44  ;;  %3019 = vrot.lane.b32.xlu1 %v1024_v41, %s4821_s12  ;;  %3017 = vrot.lane.b32.xlu0 %v1023_v7, %s4821_s12  ;;  %v3427_v27 = vsel %vm3353_vm0, %v418_v14, %v8920_v47  ;;  %v3426_v40 = vsel %vm3353_vm0, %v417_v36, %v8921_v9  ;;  %v8936_v47 = vld [vmem:[#allocation56_spill] sm:$0xff]  ;;  %v8937_v9 = vld [vmem:[#allocation57_spill] sm:$0xff] }
 0x3ee   : > { %v1032_v41 = vld [vmem:[%s6285_s11 + $0x3d8] sm:$0xff]  ;;  %v1031_v7 = vld [vmem:[%s6285_s11 + $0x3d0] sm:$0xff]  ;;  %v426_v14 = vld [vmem:[%s6516_s20 + $0x288] sm:$0xff] }
 0x3ef   : > { %v2908_v35 = vpop.permute.xlu1 %2907  ;;  %v2906_v11 = vpop.permute.xlu0 %2905  ;;  %v425_v36 = vld [vmem:[%s6516_s20 + $0x280] sm:$0xff] }
 0x3f0   : > { %v3791_v48 = vsel %vm3731_vm2, %v3602_v12, %v2908_v35  ;;  %v3790_v28 = vsel %vm3731_vm2, %v3601_v3, %v2906_v11  ;;  %v3610_v12 = vsel %vm3542_vm1, %v3421_v63, %v8910_v1  ;;  %v3609_v3 = vsel %vm3542_vm1, %v3420_v25, %v8911_v13  ;;  %v8926_v1 = vld [vmem:[#allocation212_spill] sm:$0xff]  ;;  %v8927_v13 = vld [vmem:[#allocation213_spill] sm:$0xff] }
 0x3f1   : > { %3980 = vst.msk [vmem:[%s6544_s15 + $0x1d8] sm:$0xff] %vm3920_vm3, %v3791_v48  ;;  %3979 = vst.msk [vmem:[%s6544_s15 + $0x1d0] sm:$0xff] %vm3920_vm3, %v3790_v28  ;;  %3023 = vrot.lane.b32.xlu1 %v1026_v39, %s4821_s12  ;;  %3021 = vrot.lane.b32.xlu0 %v1025_v50, %s4821_s12  ;;  %v3429_v63 = vsel %vm3353_vm0, %v420_v54, %v8924_v45  ;;  %v3428_v25 = vsel %vm3353_vm0, %v419_v19, %v8925_v46  ;;  %v8940_v45 = vld [vmem:[#allocation58_spill] sm:$0xff]  ;;  %v8941_v46 = vld [vmem:[#allocation59_spill] sm:$0xff] }
 0x3f2   : > { %v1034_v39 = vld [vmem:[%s6285_s11 + $0x3e8] sm:$0xff]  ;;  %v1033_v50 = vld [vmem:[%s6285_s11 + $0x3e0] sm:$0xff]  ;;  %v428_v54 = vld [vmem:[%s6516_s20 + $0x298] sm:$0xff] }
 0x3f3   : > { %v2912_v33 = vpop.permute.xlu1 %2911  ;;  %v2910_v23 = vpop.permute.xlu0 %2909  ;;  %v427_v19 = vld [vmem:[%s6516_s20 + $0x290] sm:$0xff] }
 0x3f4   : > { %v3793_v18 = vsel %vm3731_vm2, %v3604_v53, %v2912_v33  ;;  %v3792_v17 = vsel %vm3731_vm2, %v3603_v32, %v2910_v23  ;;  %v3612_v53 = vsel %vm3542_vm1, %v3423_v31, %v8914_v51  ;;  %v3611_v32 = vsel %vm3542_vm1, %v3422_v57, %v8915_v16  ;;  %v8930_v51 = vld [vmem:[#allocation214_spill] sm:$0xff]  ;;  %v8931_v16 = vld [vmem:[#allocation215_spill] sm:$0xff] }
 0x3f5   : > { %3982 = vst.msk [vmem:[%s6544_s15 + $0x1e8] sm:$0xff] %vm3920_vm3, %v3793_v18  ;;  %3981 = vst.msk [vmem:[%s6544_s15 + $0x1e0] sm:$0xff] %vm3920_vm3, %v3792_v17  ;;  %3027 = vrot.lane.b32.xlu1 %v1028_v43, %s4821_s12  ;;  %3025 = vrot.lane.b32.xlu0 %v1027_v4, %s4821_s12  ;;  %v3431_v31 = vsel %vm3353_vm0, %v422_v61, %v8928_v29  ;;  %v3430_v57 = vsel %vm3353_vm0, %v421_v56, %v8929_v34  ;;  %v8944_v29 = vld [vmem:[#allocation60_spill] sm:$0xff]  ;;  %v8945_v34 = vld [vmem:[#allocation61_spill] sm:$0xff] }
 0x3f6   : > { %v1036_v43 = vld [vmem:[%s6285_s11 + $0x3f8] sm:$0xff]  ;;  %v1035_v4 = vld [vmem:[%s6285_s11 + $0x3f0] sm:$0xff]  ;;  %v430_v61 = vld [vmem:[%s6516_s20 + $0x2a8] sm:$0xff] }
 0x3f7   : > { %v2916_v60 = vpop.permute.xlu1 %2915  ;;  %v2914_v8 = vpop.permute.xlu0 %2913  ;;  %v429_v56 = vld [vmem:[%s6516_s20 + $0x2a0] sm:$0xff] }
 0x3f8   : > { %v3795_v20 = vsel %vm3731_vm2, %v3606_v15, %v2916_v60  ;;  %v3794_v21 = vsel %vm3731_vm2, %v3605_v49, %v2914_v8  ;;  %v3614_v15 = vsel %vm3542_vm1, %v3425_v42, %v8918_v37  ;;  %v3613_v49 = vsel %vm3542_vm1, %v3424_v30, %v8919_v2  ;;  %v8934_v37 = vld [vmem:[#allocation216_spill] sm:$0xff]  ;;  %v8935_v2 = vld [vmem:[#allocation217_spill] sm:$0xff] }
 0x3f9   : > { %3984 = vst.msk [vmem:[%s6544_s15 + $0x1f8] sm:$0xff] %vm3920_vm3, %v3795_v20  ;;  %3983 = vst.msk [vmem:[%s6544_s15 + $0x1f0] sm:$0xff] %vm3920_vm3, %v3794_v21  ;;  %3031 = vrot.lane.b32.xlu1 %v1030_v22, %s4821_s12  ;;  %3029 = vrot.lane.b32.xlu0 %v1029_v62, %s4821_s12  ;;  %v3433_v42 = vsel %vm3353_vm0, %v424_v5, %v8932_v55  ;;  %v3432_v30 = vsel %vm3353_vm0, %v423_v10, %v8933_v38  ;;  %v8948_v55 = vld [vmem:[#allocation62_spill] sm:$0xff]  ;;  %v8949_v38 = vld [vmem:[#allocation63_spill] sm:$0xff] }
 0x3fa   : > { %v1038_v22 = vld [vmem:[%s6285_s11 + $0x408] sm:$0xff]  ;;  %v1037_v62 = vld [vmem:[%s6285_s11 + $0x400] sm:$0xff]  ;;  %v432_v5 = vld [vmem:[%s6516_s20 + $0x2b8] sm:$0xff] }
 0x3fb   : > { %v2920_v6 = vpop.permute.xlu1 %2919  ;;  %v2918_v52 = vpop.permute.xlu0 %2917  ;;  %v431_v10 = vld [vmem:[%s6516_s20 + $0x2b0] sm:$0xff] }
 0x3fc   : > { %v3797_v24 = vsel %vm3731_vm2, %v3608_v0, %v2920_v6  ;;  %v3796_v44 = vsel %vm3731_vm2, %v3607_v26, %v2918_v52  ;;  %v3616_v0 = vsel %vm3542_vm1, %v3427_v27, %v8922_v59  ;;  %v3615_v26 = vsel %vm3542_vm1, %v3426_v40, %v8923_v58  ;;  %v8938_v59 = vld [vmem:[#allocation218_spill] sm:$0xff]  ;;  %v8939_v58 = vld [vmem:[#allocation219_spill] sm:$0xff] }
 0x3fd   : > { %3986 = vst.msk [vmem:[%s6544_s15 + $0x208] sm:$0xff] %vm3920_vm3, %v3797_v24  ;;  %3985 = vst.msk [vmem:[%s6544_s15 + $0x200] sm:$0xff] %vm3920_vm3, %v3796_v44  ;;  %3035 = vrot.lane.b32.xlu1 %v1032_v41, %s4821_s12  ;;  %3033 = vrot.lane.b32.xlu0 %v1031_v7, %s4821_s12  ;;  %v3435_v27 = vsel %vm3353_vm0, %v426_v14, %v8936_v47  ;;  %v3434_v40 = vsel %vm3353_vm0, %v425_v36, %v8937_v9  ;;  %v8952_v47 = vld [vmem:[#allocation64_spill] sm:$0xff]  ;;  %v8953_v9 = vld [vmem:[#allocation65_spill] sm:$0xff] }
 0x3fe   : > { %v1040_v41 = vld [vmem:[%s6285_s11 + $0x418] sm:$0xff]  ;;  %v1039_v7 = vld [vmem:[%s6285_s11 + $0x410] sm:$0xff]  ;;  %v434_v14 = vld [vmem:[%s6516_s20 + $0x2c8] sm:$0xff] }
 0x3ff   : > { %v2924_v35 = vpop.permute.xlu1 %2923  ;;  %v2922_v11 = vpop.permute.xlu0 %2921  ;;  %v433_v36 = vld [vmem:[%s6516_s20 + $0x2c0] sm:$0xff] }
 0x400   : > { %v3799_v48 = vsel %vm3731_vm2, %v3610_v12, %v2924_v35  ;;  %v3798_v28 = vsel %vm3731_vm2, %v3609_v3, %v2922_v11  ;;  %v3618_v12 = vsel %vm3542_vm1, %v3429_v63, %v8926_v1  ;;  %v3617_v3 = vsel %vm3542_vm1, %v3428_v25, %v8927_v13  ;;  %v8942_v1 = vld [vmem:[#allocation220_spill] sm:$0xff]  ;;  %v8943_v13 = vld [vmem:[#allocation221_spill] sm:$0xff] }
 0x401   : > { %3988 = vst.msk [vmem:[%s6544_s15 + $0x218] sm:$0xff] %vm3920_vm3, %v3799_v48  ;;  %3987 = vst.msk [vmem:[%s6544_s15 + $0x210] sm:$0xff] %vm3920_vm3, %v3798_v28  ;;  %3039 = vrot.lane.b32.xlu1 %v1034_v39, %s4821_s12  ;;  %3037 = vrot.lane.b32.xlu0 %v1033_v50, %s4821_s12  ;;  %v3437_v63 = vsel %vm3353_vm0, %v428_v54, %v8940_v45  ;;  %v3436_v25 = vsel %vm3353_vm0, %v427_v19, %v8941_v46  ;;  %v8956_v45 = vld [vmem:[#allocation66_spill] sm:$0xff]  ;;  %v8957_v46 = vld [vmem:[#allocation67_spill] sm:$0xff] }
 0x402   : > { %v1042_v39 = vld [vmem:[%s6285_s11 + $0x428] sm:$0xff]  ;;  %v1041_v50 = vld [vmem:[%s6285_s11 + $0x420] sm:$0xff]  ;;  %v436_v54 = vld [vmem:[%s6516_s20 + $0x2d8] sm:$0xff] }
 0x403   : > { %v2928_v33 = vpop.permute.xlu1 %2927  ;;  %v2926_v23 = vpop.permute.xlu0 %2925  ;;  %v435_v19 = vld [vmem:[%s6516_s20 + $0x2d0] sm:$0xff] }
 0x404   : > { %v3801_v18 = vsel %vm3731_vm2, %v3612_v53, %v2928_v33  ;;  %v3800_v17 = vsel %vm3731_vm2, %v3611_v32, %v2926_v23  ;;  %v3620_v53 = vsel %vm3542_vm1, %v3431_v31, %v8930_v51  ;;  %v3619_v32 = vsel %vm3542_vm1, %v3430_v57, %v8931_v16  ;;  %v8946_v51 = vld [vmem:[#allocation222_spill] sm:$0xff]  ;;  %v8947_v16 = vld [vmem:[#allocation223_spill] sm:$0xff] }
 0x405   : > { %3990 = vst.msk [vmem:[%s6544_s15 + $0x228] sm:$0xff] %vm3920_vm3, %v3801_v18  ;;  %3989 = vst.msk [vmem:[%s6544_s15 + $0x220] sm:$0xff] %vm3920_vm3, %v3800_v17  ;;  %3043 = vrot.lane.b32.xlu1 %v1036_v43, %s4821_s12  ;;  %3041 = vrot.lane.b32.xlu0 %v1035_v4, %s4821_s12  ;;  %v3439_v31 = vsel %vm3353_vm0, %v430_v61, %v8944_v29  ;;  %v3438_v57 = vsel %vm3353_vm0, %v429_v56, %v8945_v34  ;;  %v8960_v29 = vld [vmem:[#allocation68_spill] sm:$0xff]  ;;  %v8961_v34 = vld [vmem:[#allocation69_spill] sm:$0xff] }
 0x406   : > { %v1044_v43 = vld [vmem:[%s6285_s11 + $0x438] sm:$0xff]  ;;  %v1043_v4 = vld [vmem:[%s6285_s11 + $0x430] sm:$0xff]  ;;  %v438_v61 = vld [vmem:[%s6516_s20 + $0x2e8] sm:$0xff] }
 0x407   : > { %v2932_v60 = vpop.permute.xlu1 %2931  ;;  %v2930_v8 = vpop.permute.xlu0 %2929  ;;  %v437_v56 = vld [vmem:[%s6516_s20 + $0x2e0] sm:$0xff] }
 0x408   : > { %v3803_v20 = vsel %vm3731_vm2, %v3614_v15, %v2932_v60  ;;  %v3802_v21 = vsel %vm3731_vm2, %v3613_v49, %v2930_v8  ;;  %v3622_v15 = vsel %vm3542_vm1, %v3433_v42, %v8934_v37  ;;  %v3621_v49 = vsel %vm3542_vm1, %v3432_v30, %v8935_v2  ;;  %v8950_v37 = vld [vmem:[#allocation224_spill] sm:$0xff]  ;;  %v8951_v2 = vld [vmem:[#allocation225_spill] sm:$0xff] }
 0x409   : > { %3992 = vst.msk [vmem:[%s6544_s15 + $0x238] sm:$0xff] %vm3920_vm3, %v3803_v20  ;;  %3991 = vst.msk [vmem:[%s6544_s15 + $0x230] sm:$0xff] %vm3920_vm3, %v3802_v21  ;;  %3047 = vrot.lane.b32.xlu1 %v1038_v22, %s4821_s12  ;;  %3045 = vrot.lane.b32.xlu0 %v1037_v62, %s4821_s12  ;;  %v3441_v42 = vsel %vm3353_vm0, %v432_v5, %v8948_v55  ;;  %v3440_v30 = vsel %vm3353_vm0, %v431_v10, %v8949_v38  ;;  %v8964_v55 = vld [vmem:[#allocation70_spill] sm:$0xff]  ;;  %v8965_v38 = vld [vmem:[#allocation71_spill] sm:$0xff] }
 0x40a   : > { %v1046_v22 = vld [vmem:[%s6285_s11 + $0x448] sm:$0xff]  ;;  %v1045_v62 = vld [vmem:[%s6285_s11 + $0x440] sm:$0xff]  ;;  %v440_v5 = vld [vmem:[%s6516_s20 + $0x2f8] sm:$0xff] }
 0x40b   : > { %v2936_v6 = vpop.permute.xlu1 %2935  ;;  %v2934_v52 = vpop.permute.xlu0 %2933  ;;  %v439_v10 = vld [vmem:[%s6516_s20 + $0x2f0] sm:$0xff] }
 0x40c   : > { %v3805_v24 = vsel %vm3731_vm2, %v3616_v0, %v2936_v6  ;;  %v3804_v44 = vsel %vm3731_vm2, %v3615_v26, %v2934_v52  ;;  %v3624_v0 = vsel %vm3542_vm1, %v3435_v27, %v8938_v59  ;;  %v3623_v26 = vsel %vm3542_vm1, %v3434_v40, %v8939_v58  ;;  %v8954_v59 = vld [vmem:[#allocation226_spill] sm:$0xff]  ;;  %v8955_v58 = vld [vmem:[#allocation227_spill] sm:$0xff] }
 0x40d   : > { %3994 = vst.msk [vmem:[%s6544_s15 + $0x248] sm:$0xff] %vm3920_vm3, %v3805_v24  ;;  %3993 = vst.msk [vmem:[%s6544_s15 + $0x240] sm:$0xff] %vm3920_vm3, %v3804_v44  ;;  %3051 = vrot.lane.b32.xlu1 %v1040_v41, %s4821_s12  ;;  %3049 = vrot.lane.b32.xlu0 %v1039_v7, %s4821_s12  ;;  %v3443_v27 = vsel %vm3353_vm0, %v434_v14, %v8952_v47  ;;  %v3442_v40 = vsel %vm3353_vm0, %v433_v36, %v8953_v9  ;;  %v8968_v47 = vld [vmem:[#allocation72_spill] sm:$0xff]  ;;  %v8969_v9 = vld [vmem:[#allocation73_spill] sm:$0xff] }
 0x40e   : > { %v1048_v41 = vld [vmem:[%s6285_s11 + $0x458] sm:$0xff]  ;;  %v1047_v7 = vld [vmem:[%s6285_s11 + $0x450] sm:$0xff]  ;;  %v442_v14 = vld [vmem:[%s6516_s20 + $0x308] sm:$0xff] }
 0x40f   : > { %v2940_v35 = vpop.permute.xlu1 %2939  ;;  %v2938_v11 = vpop.permute.xlu0 %2937  ;;  %v441_v36 = vld [vmem:[%s6516_s20 + $0x300] sm:$0xff] }
 0x410   : > { %v3807_v48 = vsel %vm3731_vm2, %v3618_v12, %v2940_v35  ;;  %v3806_v28 = vsel %vm3731_vm2, %v3617_v3, %v2938_v11  ;;  %v3626_v12 = vsel %vm3542_vm1, %v3437_v63, %v8942_v1  ;;  %v3625_v3 = vsel %vm3542_vm1, %v3436_v25, %v8943_v13  ;;  %v8958_v1 = vld [vmem:[#allocation228_spill] sm:$0xff]  ;;  %v8959_v13 = vld [vmem:[#allocation229_spill] sm:$0xff] }
 0x411   : > { %3996 = vst.msk [vmem:[%s6544_s15 + $0x258] sm:$0xff] %vm3920_vm3, %v3807_v48  ;;  %3995 = vst.msk [vmem:[%s6544_s15 + $0x250] sm:$0xff] %vm3920_vm3, %v3806_v28  ;;  %3055 = vrot.lane.b32.xlu1 %v1042_v39, %s4821_s12  ;;  %3053 = vrot.lane.b32.xlu0 %v1041_v50, %s4821_s12  ;;  %v3445_v63 = vsel %vm3353_vm0, %v436_v54, %v8956_v45  ;;  %v3444_v25 = vsel %vm3353_vm0, %v435_v19, %v8957_v46  ;;  %v8972_v45 = vld [vmem:[#allocation74_spill] sm:$0xff]  ;;  %v8973_v46 = vld [vmem:[#allocation75_spill] sm:$0xff] }
 0x412   : > { %v1050_v39 = vld [vmem:[%s6285_s11 + $0x468] sm:$0xff]  ;;  %v1049_v50 = vld [vmem:[%s6285_s11 + $0x460] sm:$0xff]  ;;  %v444_v54 = vld [vmem:[%s6516_s20 + $0x318] sm:$0xff] }
 0x413   : > { %v2944_v33 = vpop.permute.xlu1 %2943  ;;  %v2942_v23 = vpop.permute.xlu0 %2941  ;;  %v443_v19 = vld [vmem:[%s6516_s20 + $0x310] sm:$0xff] }
 0x414   : > { %v3809_v18 = vsel %vm3731_vm2, %v3620_v53, %v2944_v33  ;;  %v3808_v17 = vsel %vm3731_vm2, %v3619_v32, %v2942_v23  ;;  %v3628_v53 = vsel %vm3542_vm1, %v3439_v31, %v8946_v51  ;;  %v3627_v32 = vsel %vm3542_vm1, %v3438_v57, %v8947_v16  ;;  %v8962_v51 = vld [vmem:[#allocation230_spill] sm:$0xff]  ;;  %v8963_v16 = vld [vmem:[#allocation231_spill] sm:$0xff] }
 0x415   : > { %3998 = vst.msk [vmem:[%s6544_s15 + $0x268] sm:$0xff] %vm3920_vm3, %v3809_v18  ;;  %3997 = vst.msk [vmem:[%s6544_s15 + $0x260] sm:$0xff] %vm3920_vm3, %v3808_v17  ;;  %3059 = vrot.lane.b32.xlu1 %v1044_v43, %s4821_s12  ;;  %3057 = vrot.lane.b32.xlu0 %v1043_v4, %s4821_s12  ;;  %v3447_v31 = vsel %vm3353_vm0, %v438_v61, %v8960_v29  ;;  %v3446_v57 = vsel %vm3353_vm0, %v437_v56, %v8961_v34  ;;  %v8976_v29 = vld [vmem:[#allocation76_spill] sm:$0xff]  ;;  %v8977_v34 = vld [vmem:[#allocation77_spill] sm:$0xff] }
 0x416   : > { %v1052_v43 = vld [vmem:[%s6285_s11 + $0x478] sm:$0xff]  ;;  %v1051_v4 = vld [vmem:[%s6285_s11 + $0x470] sm:$0xff]  ;;  %v446_v61 = vld [vmem:[%s6516_s20 + $0x328] sm:$0xff] }
 0x417   : > { %v2948_v60 = vpop.permute.xlu1 %2947  ;;  %v2946_v8 = vpop.permute.xlu0 %2945  ;;  %v445_v56 = vld [vmem:[%s6516_s20 + $0x320] sm:$0xff] }
 0x418   : > { %v3811_v20 = vsel %vm3731_vm2, %v3622_v15, %v2948_v60  ;;  %v3810_v21 = vsel %vm3731_vm2, %v3621_v49, %v2946_v8  ;;  %v3630_v15 = vsel %vm3542_vm1, %v3441_v42, %v8950_v37  ;;  %v3629_v49 = vsel %vm3542_vm1, %v3440_v30, %v8951_v2  ;;  %v8966_v37 = vld [vmem:[#allocation232_spill] sm:$0xff]  ;;  %v8967_v2 = vld [vmem:[#allocation233_spill] sm:$0xff] }
 0x419   : > { %4000 = vst.msk [vmem:[%s6544_s15 + $0x278] sm:$0xff] %vm3920_vm3, %v3811_v20  ;;  %3999 = vst.msk [vmem:[%s6544_s15 + $0x270] sm:$0xff] %vm3920_vm3, %v3810_v21  ;;  %3063 = vrot.lane.b32.xlu1 %v1046_v22, %s4821_s12  ;;  %3061 = vrot.lane.b32.xlu0 %v1045_v62, %s4821_s12  ;;  %v3449_v42 = vsel %vm3353_vm0, %v440_v5, %v8964_v55  ;;  %v3448_v30 = vsel %vm3353_vm0, %v439_v10, %v8965_v38  ;;  %v8980_v55 = vld [vmem:[#allocation78_spill] sm:$0xff]  ;;  %v8981_v38 = vld [vmem:[#allocation79_spill] sm:$0xff] }
 0x41a   : > { %v1054_v22 = vld [vmem:[%s6285_s11 + $0x488] sm:$0xff]  ;;  %v1053_v62 = vld [vmem:[%s6285_s11 + $0x480] sm:$0xff]  ;;  %v448_v5 = vld [vmem:[%s6516_s20 + $0x338] sm:$0xff] }
 0x41b   : > { %v2952_v6 = vpop.permute.xlu1 %2951  ;;  %v2950_v52 = vpop.permute.xlu0 %2949  ;;  %v447_v10 = vld [vmem:[%s6516_s20 + $0x330] sm:$0xff] }
 0x41c   : > { %v3813_v24 = vsel %vm3731_vm2, %v3624_v0, %v2952_v6  ;;  %v3812_v44 = vsel %vm3731_vm2, %v3623_v26, %v2950_v52  ;;  %v3632_v0 = vsel %vm3542_vm1, %v3443_v27, %v8954_v59  ;;  %v3631_v26 = vsel %vm3542_vm1, %v3442_v40, %v8955_v58  ;;  %v8970_v59 = vld [vmem:[#allocation234_spill] sm:$0xff]  ;;  %v8971_v58 = vld [vmem:[#allocation235_spill] sm:$0xff] }
 0x41d   : > { %4002 = vst.msk [vmem:[%s6544_s15 + $0x288] sm:$0xff] %vm3920_vm3, %v3813_v24  ;;  %4001 = vst.msk [vmem:[%s6544_s15 + $0x280] sm:$0xff] %vm3920_vm3, %v3812_v44  ;;  %3067 = vrot.lane.b32.xlu1 %v1048_v41, %s4821_s12  ;;  %3065 = vrot.lane.b32.xlu0 %v1047_v7, %s4821_s12  ;;  %v3451_v27 = vsel %vm3353_vm0, %v442_v14, %v8968_v47  ;;  %v3450_v40 = vsel %vm3353_vm0, %v441_v36, %v8969_v9  ;;  %v8984_v47 = vld [vmem:[#allocation80_spill] sm:$0xff]  ;;  %v8985_v9 = vld [vmem:[#allocation81_spill] sm:$0xff] }
 0x41e   : > { %v1056_v41 = vld [vmem:[%s6285_s11 + $0x498] sm:$0xff]  ;;  %v1055_v7 = vld [vmem:[%s6285_s11 + $0x490] sm:$0xff]  ;;  %v450_v14 = vld [vmem:[%s6516_s20 + $0x348] sm:$0xff] }
 0x41f   : > { %v2956_v35 = vpop.permute.xlu1 %2955  ;;  %v2954_v11 = vpop.permute.xlu0 %2953  ;;  %v449_v36 = vld [vmem:[%s6516_s20 + $0x340] sm:$0xff] }
 0x420   : > { %v3815_v48 = vsel %vm3731_vm2, %v3626_v12, %v2956_v35  ;;  %v3814_v28 = vsel %vm3731_vm2, %v3625_v3, %v2954_v11  ;;  %v3634_v12 = vsel %vm3542_vm1, %v3445_v63, %v8958_v1  ;;  %v3633_v3 = vsel %vm3542_vm1, %v3444_v25, %v8959_v13  ;;  %v8974_v1 = vld [vmem:[#allocation236_spill] sm:$0xff]  ;;  %v8975_v13 = vld [vmem:[#allocation237_spill] sm:$0xff] }
 0x421   : > { %4004 = vst.msk [vmem:[%s6544_s15 + $0x298] sm:$0xff] %vm3920_vm3, %v3815_v48  ;;  %4003 = vst.msk [vmem:[%s6544_s15 + $0x290] sm:$0xff] %vm3920_vm3, %v3814_v28  ;;  %3071 = vrot.lane.b32.xlu1 %v1050_v39, %s4821_s12  ;;  %3069 = vrot.lane.b32.xlu0 %v1049_v50, %s4821_s12  ;;  %v3453_v63 = vsel %vm3353_vm0, %v444_v54, %v8972_v45  ;;  %v3452_v25 = vsel %vm3353_vm0, %v443_v19, %v8973_v46  ;;  %v8988_v45 = vld [vmem:[#allocation82_spill] sm:$0xff]  ;;  %v8989_v46 = vld [vmem:[#allocation83_spill] sm:$0xff] }
 0x422   : > { %v1058_v39 = vld [vmem:[%s6285_s11 + $0x4a8] sm:$0xff]  ;;  %v1057_v50 = vld [vmem:[%s6285_s11 + $0x4a0] sm:$0xff]  ;;  %v452_v54 = vld [vmem:[%s6516_s20 + $0x358] sm:$0xff] }
 0x423   : > { %v2960_v33 = vpop.permute.xlu1 %2959  ;;  %v2958_v23 = vpop.permute.xlu0 %2957  ;;  %v451_v19 = vld [vmem:[%s6516_s20 + $0x350] sm:$0xff] }
 0x424   : > { %v3817_v18 = vsel %vm3731_vm2, %v3628_v53, %v2960_v33  ;;  %v3816_v17 = vsel %vm3731_vm2, %v3627_v32, %v2958_v23  ;;  %v3636_v53 = vsel %vm3542_vm1, %v3447_v31, %v8962_v51  ;;  %v3635_v32 = vsel %vm3542_vm1, %v3446_v57, %v8963_v16  ;;  %v8978_v51 = vld [vmem:[#allocation238_spill] sm:$0xff]  ;;  %v8979_v16 = vld [vmem:[#allocation239_spill] sm:$0xff] }
 0x425   : > { %4006 = vst.msk [vmem:[%s6544_s15 + $0x2a8] sm:$0xff] %vm3920_vm3, %v3817_v18  ;;  %4005 = vst.msk [vmem:[%s6544_s15 + $0x2a0] sm:$0xff] %vm3920_vm3, %v3816_v17  ;;  %3075 = vrot.lane.b32.xlu1 %v1052_v43, %s4821_s12  ;;  %3073 = vrot.lane.b32.xlu0 %v1051_v4, %s4821_s12  ;;  %v3455_v31 = vsel %vm3353_vm0, %v446_v61, %v8976_v29  ;;  %v3454_v57 = vsel %vm3353_vm0, %v445_v56, %v8977_v34  ;;  %v8992_v29 = vld [vmem:[#allocation84_spill] sm:$0xff]  ;;  %v8993_v34 = vld [vmem:[#allocation85_spill] sm:$0xff] }
 0x426   : > { %v1060_v43 = vld [vmem:[%s6285_s11 + $0x4b8] sm:$0xff]  ;;  %v1059_v4 = vld [vmem:[%s6285_s11 + $0x4b0] sm:$0xff]  ;;  %v454_v61 = vld [vmem:[%s6516_s20 + $0x368] sm:$0xff] }
 0x427   : > { %v2964_v60 = vpop.permute.xlu1 %2963  ;;  %v2962_v8 = vpop.permute.xlu0 %2961  ;;  %v453_v56 = vld [vmem:[%s6516_s20 + $0x360] sm:$0xff] }
 0x428   : > { %v3819_v20 = vsel %vm3731_vm2, %v3630_v15, %v2964_v60  ;;  %v3818_v21 = vsel %vm3731_vm2, %v3629_v49, %v2962_v8  ;;  %v3638_v15 = vsel %vm3542_vm1, %v3449_v42, %v8966_v37  ;;  %v3637_v49 = vsel %vm3542_vm1, %v3448_v30, %v8967_v2  ;;  %v8982_v37 = vld [vmem:[#allocation240_spill] sm:$0xff]  ;;  %v8983_v2 = vld [vmem:[#allocation241_spill] sm:$0xff] }
 0x429   : > { %4008 = vst.msk [vmem:[%s6544_s15 + $0x2b8] sm:$0xff] %vm3920_vm3, %v3819_v20  ;;  %4007 = vst.msk [vmem:[%s6544_s15 + $0x2b0] sm:$0xff] %vm3920_vm3, %v3818_v21  ;;  %3079 = vrot.lane.b32.xlu1 %v1054_v22, %s4821_s12  ;;  %3077 = vrot.lane.b32.xlu0 %v1053_v62, %s4821_s12  ;;  %v3457_v42 = vsel %vm3353_vm0, %v448_v5, %v8980_v55  ;;  %v3456_v30 = vsel %vm3353_vm0, %v447_v10, %v8981_v38  ;;  %v8996_v55 = vld [vmem:[#allocation86_spill] sm:$0xff]  ;;  %v8997_v38 = vld [vmem:[#allocation87_spill] sm:$0xff] }
 0x42a   : > { %v1062_v22 = vld [vmem:[%s6285_s11 + $0x4c8] sm:$0xff]  ;;  %v1061_v62 = vld [vmem:[%s6285_s11 + $0x4c0] sm:$0xff]  ;;  %v456_v5 = vld [vmem:[%s6516_s20 + $0x378] sm:$0xff] }
 0x42b   : > { %v2968_v6 = vpop.permute.xlu1 %2967  ;;  %v2966_v52 = vpop.permute.xlu0 %2965  ;;  %v455_v10 = vld [vmem:[%s6516_s20 + $0x370] sm:$0xff] }
 0x42c   : > { %v3821_v24 = vsel %vm3731_vm2, %v3632_v0, %v2968_v6  ;;  %v3820_v44 = vsel %vm3731_vm2, %v3631_v26, %v2966_v52  ;;  %v3640_v0 = vsel %vm3542_vm1, %v3451_v27, %v8970_v59  ;;  %v3639_v26 = vsel %vm3542_vm1, %v3450_v40, %v8971_v58  ;;  %v8986_v59 = vld [vmem:[#allocation242_spill] sm:$0xff]  ;;  %v8987_v58 = vld [vmem:[#allocation243_spill] sm:$0xff] }
 0x42d   : > { %4010 = vst.msk [vmem:[%s6544_s15 + $0x2c8] sm:$0xff] %vm3920_vm3, %v3821_v24  ;;  %4009 = vst.msk [vmem:[%s6544_s15 + $0x2c0] sm:$0xff] %vm3920_vm3, %v3820_v44  ;;  %3083 = vrot.lane.b32.xlu1 %v1056_v41, %s4821_s12  ;;  %3081 = vrot.lane.b32.xlu0 %v1055_v7, %s4821_s12  ;;  %v3459_v27 = vsel %vm3353_vm0, %v450_v14, %v8984_v47  ;;  %v3458_v40 = vsel %vm3353_vm0, %v449_v36, %v8985_v9  ;;  %v9000_v47 = vld [vmem:[#allocation88_spill] sm:$0xff]  ;;  %v9001_v9 = vld [vmem:[#allocation89_spill] sm:$0xff] }
 0x42e   : > { %v1064_v41 = vld [vmem:[%s6285_s11 + $0x4d8] sm:$0xff]  ;;  %v1063_v7 = vld [vmem:[%s6285_s11 + $0x4d0] sm:$0xff]  ;;  %v458_v14 = vld [vmem:[%s6516_s20 + $0x388] sm:$0xff] }
 0x42f   : > { %v2972_v35 = vpop.permute.xlu1 %2971  ;;  %v2970_v11 = vpop.permute.xlu0 %2969  ;;  %v457_v36 = vld [vmem:[%s6516_s20 + $0x380] sm:$0xff] }
 0x430   : > { %v3823_v48 = vsel %vm3731_vm2, %v3634_v12, %v2972_v35  ;;  %v3822_v28 = vsel %vm3731_vm2, %v3633_v3, %v2970_v11  ;;  %v3642_v12 = vsel %vm3542_vm1, %v3453_v63, %v8974_v1  ;;  %v3641_v3 = vsel %vm3542_vm1, %v3452_v25, %v8975_v13  ;;  %v8990_v1 = vld [vmem:[#allocation244_spill] sm:$0xff]  ;;  %v8991_v13 = vld [vmem:[#allocation245_spill] sm:$0xff] }
 0x431   : > { %4012 = vst.msk [vmem:[%s6544_s15 + $0x2d8] sm:$0xff] %vm3920_vm3, %v3823_v48  ;;  %4011 = vst.msk [vmem:[%s6544_s15 + $0x2d0] sm:$0xff] %vm3920_vm3, %v3822_v28  ;;  %3087 = vrot.lane.b32.xlu1 %v1058_v39, %s4821_s12  ;;  %3085 = vrot.lane.b32.xlu0 %v1057_v50, %s4821_s12  ;;  %v3461_v63 = vsel %vm3353_vm0, %v452_v54, %v8988_v45  ;;  %v3460_v25 = vsel %vm3353_vm0, %v451_v19, %v8989_v46  ;;  %v9004_v45 = vld [vmem:[#allocation90_spill] sm:$0xff]  ;;  %v9005_v46 = vld [vmem:[#allocation91_spill] sm:$0xff] }
 0x432   : > { %v1066_v39 = vld [vmem:[%s6285_s11 + $0x4e8] sm:$0xff]  ;;  %v1065_v50 = vld [vmem:[%s6285_s11 + $0x4e0] sm:$0xff]  ;;  %v460_v54 = vld [vmem:[%s6516_s20 + $0x398] sm:$0xff] }
 0x433   : > { %v2976_v33 = vpop.permute.xlu1 %2975  ;;  %v2974_v23 = vpop.permute.xlu0 %2973  ;;  %v459_v19 = vld [vmem:[%s6516_s20 + $0x390] sm:$0xff] }
 0x434   : > { %v3825_v18 = vsel %vm3731_vm2, %v3636_v53, %v2976_v33  ;;  %v3824_v17 = vsel %vm3731_vm2, %v3635_v32, %v2974_v23  ;;  %v3644_v53 = vsel %vm3542_vm1, %v3455_v31, %v8978_v51  ;;  %v3643_v32 = vsel %vm3542_vm1, %v3454_v57, %v8979_v16  ;;  %v8994_v51 = vld [vmem:[#allocation246_spill] sm:$0xff]  ;;  %v8995_v16 = vld [vmem:[#allocation247_spill] sm:$0xff] }
 0x435   : > { %4014 = vst.msk [vmem:[%s6544_s15 + $0x2e8] sm:$0xff] %vm3920_vm3, %v3825_v18  ;;  %4013 = vst.msk [vmem:[%s6544_s15 + $0x2e0] sm:$0xff] %vm3920_vm3, %v3824_v17  ;;  %3091 = vrot.lane.b32.xlu1 %v1060_v43, %s4821_s12  ;;  %3089 = vrot.lane.b32.xlu0 %v1059_v4, %s4821_s12  ;;  %v3463_v31 = vsel %vm3353_vm0, %v454_v61, %v8992_v29  ;;  %v3462_v57 = vsel %vm3353_vm0, %v453_v56, %v8993_v34  ;;  %v9008_v29 = vld [vmem:[#allocation92_spill] sm:$0xff]  ;;  %v9009_v34 = vld [vmem:[#allocation93_spill] sm:$0xff] }
 0x436   : > { %v1068_v43 = vld [vmem:[%s6285_s11 + $0x4f8] sm:$0xff]  ;;  %v1067_v4 = vld [vmem:[%s6285_s11 + $0x4f0] sm:$0xff]  ;;  %v462_v61 = vld [vmem:[%s6516_s20 + $0x3a8] sm:$0xff] }
 0x437   : > { %v2980_v60 = vpop.permute.xlu1 %2979  ;;  %v2978_v8 = vpop.permute.xlu0 %2977  ;;  %v461_v56 = vld [vmem:[%s6516_s20 + $0x3a0] sm:$0xff] }
 0x438   : > { %v3827_v20 = vsel %vm3731_vm2, %v3638_v15, %v2980_v60  ;;  %v3826_v21 = vsel %vm3731_vm2, %v3637_v49, %v2978_v8  ;;  %v3646_v15 = vsel %vm3542_vm1, %v3457_v42, %v8982_v37  ;;  %v3645_v49 = vsel %vm3542_vm1, %v3456_v30, %v8983_v2  ;;  %v8998_v37 = vld [vmem:[#allocation248_spill] sm:$0xff]  ;;  %v8999_v2 = vld [vmem:[#allocation249_spill] sm:$0xff] }
 0x439   : > { %4016 = vst.msk [vmem:[%s6544_s15 + $0x2f8] sm:$0xff] %vm3920_vm3, %v3827_v20  ;;  %4015 = vst.msk [vmem:[%s6544_s15 + $0x2f0] sm:$0xff] %vm3920_vm3, %v3826_v21  ;;  %3095 = vrot.lane.b32.xlu1 %v1062_v22, %s4821_s12  ;;  %3093 = vrot.lane.b32.xlu0 %v1061_v62, %s4821_s12  ;;  %v3465_v42 = vsel %vm3353_vm0, %v456_v5, %v8996_v55  ;;  %v3464_v30 = vsel %vm3353_vm0, %v455_v10, %v8997_v38  ;;  %v9012_v55 = vld [vmem:[#allocation94_spill] sm:$0xff]  ;;  %v9013_v38 = vld [vmem:[#allocation95_spill] sm:$0xff] }
 0x43a   : > { %v1070_v22 = vld [vmem:[%s6285_s11 + $0x508] sm:$0xff]  ;;  %v1069_v62 = vld [vmem:[%s6285_s11 + $0x500] sm:$0xff]  ;;  %v464_v5 = vld [vmem:[%s6516_s20 + $0x3b8] sm:$0xff] }
 0x43b   : > { %v2984_v6 = vpop.permute.xlu1 %2983  ;;  %v2982_v52 = vpop.permute.xlu0 %2981  ;;  %v463_v10 = vld [vmem:[%s6516_s20 + $0x3b0] sm:$0xff] }
 0x43c   : > { %v3829_v24 = vsel %vm3731_vm2, %v3640_v0, %v2984_v6  ;;  %v3828_v44 = vsel %vm3731_vm2, %v3639_v26, %v2982_v52  ;;  %v3648_v0 = vsel %vm3542_vm1, %v3459_v27, %v8986_v59  ;;  %v3647_v26 = vsel %vm3542_vm1, %v3458_v40, %v8987_v58  ;;  %v9002_v59 = vld [vmem:[#allocation250_spill] sm:$0xff]  ;;  %v9003_v58 = vld [vmem:[#allocation251_spill] sm:$0xff] }
 0x43d   : > { %4018 = vst.msk [vmem:[%s6544_s15 + $0x308] sm:$0xff] %vm3920_vm3, %v3829_v24  ;;  %4017 = vst.msk [vmem:[%s6544_s15 + $0x300] sm:$0xff] %vm3920_vm3, %v3828_v44  ;;  %3099 = vrot.lane.b32.xlu1 %v1064_v41, %s4821_s12  ;;  %3097 = vrot.lane.b32.xlu0 %v1063_v7, %s4821_s12  ;;  %v3467_v27 = vsel %vm3353_vm0, %v458_v14, %v9000_v47  ;;  %v3466_v40 = vsel %vm3353_vm0, %v457_v36, %v9001_v9  ;;  %v9016_v47 = vld [vmem:[#allocation96_spill] sm:$0xff]  ;;  %v9017_v9 = vld [vmem:[#allocation97_spill] sm:$0xff] }
 0x43e   : > { %v1072_v41 = vld [vmem:[%s6285_s11 + $0x518] sm:$0xff]  ;;  %v1071_v7 = vld [vmem:[%s6285_s11 + $0x510] sm:$0xff]  ;;  %v466_v14 = vld [vmem:[%s6516_s20 + $0x3c8] sm:$0xff] }
 0x43f   : > { %v2988_v35 = vpop.permute.xlu1 %2987  ;;  %v2986_v11 = vpop.permute.xlu0 %2985  ;;  %v465_v36 = vld [vmem:[%s6516_s20 + $0x3c0] sm:$0xff] }
 0x440   : > { %v3831_v48 = vsel %vm3731_vm2, %v3642_v12, %v2988_v35  ;;  %v3830_v28 = vsel %vm3731_vm2, %v3641_v3, %v2986_v11  ;;  %v3650_v12 = vsel %vm3542_vm1, %v3461_v63, %v8990_v1  ;;  %v3649_v3 = vsel %vm3542_vm1, %v3460_v25, %v8991_v13  ;;  %v9006_v1 = vld [vmem:[#allocation252_spill] sm:$0xff]  ;;  %v9007_v13 = vld [vmem:[#allocation253_spill] sm:$0xff] }
 0x441   : > { %4020 = vst.msk [vmem:[%s6544_s15 + $0x318] sm:$0xff] %vm3920_vm3, %v3831_v48  ;;  %4019 = vst.msk [vmem:[%s6544_s15 + $0x310] sm:$0xff] %vm3920_vm3, %v3830_v28  ;;  %3103 = vrot.lane.b32.xlu1 %v1066_v39, %s4821_s12  ;;  %3101 = vrot.lane.b32.xlu0 %v1065_v50, %s4821_s12  ;;  %v3469_v63 = vsel %vm3353_vm0, %v460_v54, %v9004_v45  ;;  %v3468_v25 = vsel %vm3353_vm0, %v459_v19, %v9005_v46  ;;  %v9020_v45 = vld [vmem:[#allocation98_spill] sm:$0xff]  ;;  %v9021_v46 = vld [vmem:[#allocation99_spill] sm:$0xff] }
 0x442   : > { %v1074_v39 = vld [vmem:[%s6285_s11 + $0x528] sm:$0xff]  ;;  %v1073_v50 = vld [vmem:[%s6285_s11 + $0x520] sm:$0xff]  ;;  %v468_v54 = vld [vmem:[%s6516_s20 + $0x3d8] sm:$0xff] }
 0x443   : > { %v2992_v33 = vpop.permute.xlu1 %2991  ;;  %v2990_v23 = vpop.permute.xlu0 %2989  ;;  %v467_v19 = vld [vmem:[%s6516_s20 + $0x3d0] sm:$0xff] }
 0x444   : > { %v3833_v18 = vsel %vm3731_vm2, %v3644_v53, %v2992_v33  ;;  %v3832_v17 = vsel %vm3731_vm2, %v3643_v32, %v2990_v23  ;;  %v3652_v53 = vsel %vm3542_vm1, %v3463_v31, %v8994_v51  ;;  %v3651_v32 = vsel %vm3542_vm1, %v3462_v57, %v8995_v16  ;;  %v9010_v51 = vld [vmem:[#allocation254_spill] sm:$0xff]  ;;  %v9011_v16 = vld [vmem:[#allocation255_spill] sm:$0xff] }
 0x445   : > { %4022 = vst.msk [vmem:[%s6544_s15 + $0x328] sm:$0xff] %vm3920_vm3, %v3833_v18  ;;  %4021 = vst.msk [vmem:[%s6544_s15 + $0x320] sm:$0xff] %vm3920_vm3, %v3832_v17  ;;  %3107 = vrot.lane.b32.xlu1 %v1068_v43, %s4821_s12  ;;  %3105 = vrot.lane.b32.xlu0 %v1067_v4, %s4821_s12  ;;  %v3471_v31 = vsel %vm3353_vm0, %v462_v61, %v9008_v29  ;;  %v3470_v57 = vsel %vm3353_vm0, %v461_v56, %v9009_v34  ;;  %v9024_v29 = vld [vmem:[#allocation100_spill] sm:$0xff]  ;;  %v9025_v34 = vld [vmem:[#allocation101_spill] sm:$0xff] }
 0x446   : > { %v1076_v43 = vld [vmem:[%s6285_s11 + $0x538] sm:$0xff]  ;;  %v1075_v4 = vld [vmem:[%s6285_s11 + $0x530] sm:$0xff]  ;;  %v470_v61 = vld [vmem:[%s6516_s20 + $0x3e8] sm:$0xff] }
 0x447   : > { %v2996_v60 = vpop.permute.xlu1 %2995  ;;  %v2994_v8 = vpop.permute.xlu0 %2993  ;;  %v469_v56 = vld [vmem:[%s6516_s20 + $0x3e0] sm:$0xff] }
 0x448   : > { %v3835_v20 = vsel %vm3731_vm2, %v3646_v15, %v2996_v60  ;;  %v3834_v21 = vsel %vm3731_vm2, %v3645_v49, %v2994_v8  ;;  %v3654_v15 = vsel %vm3542_vm1, %v3465_v42, %v8998_v37  ;;  %v3653_v49 = vsel %vm3542_vm1, %v3464_v30, %v8999_v2  ;;  %v9014_v37 = vld [vmem:[#allocation256_spill] sm:$0xff]  ;;  %v9015_v2 = vld [vmem:[#allocation257_spill] sm:$0xff] }
 0x449   : > { %4024 = vst.msk [vmem:[%s6544_s15 + $0x338] sm:$0xff] %vm3920_vm3, %v3835_v20  ;;  %4023 = vst.msk [vmem:[%s6544_s15 + $0x330] sm:$0xff] %vm3920_vm3, %v3834_v21  ;;  %3111 = vrot.lane.b32.xlu1 %v1070_v22, %s4821_s12  ;;  %3109 = vrot.lane.b32.xlu0 %v1069_v62, %s4821_s12  ;;  %v3473_v42 = vsel %vm3353_vm0, %v464_v5, %v9012_v55  ;;  %v3472_v30 = vsel %vm3353_vm0, %v463_v10, %v9013_v38  ;;  %v9028_v55 = vld [vmem:[#allocation102_spill] sm:$0xff]  ;;  %v9029_v38 = vld [vmem:[#allocation103_spill] sm:$0xff] }
 0x44a   : > { %v1078_v22 = vld [vmem:[%s6285_s11 + $0x548] sm:$0xff]  ;;  %v1077_v62 = vld [vmem:[%s6285_s11 + $0x540] sm:$0xff]  ;;  %v472_v5 = vld [vmem:[%s6516_s20 + $0x3f8] sm:$0xff] }
 0x44b   : > { %v3000_v6 = vpop.permute.xlu1 %2999  ;;  %v2998_v52 = vpop.permute.xlu0 %2997  ;;  %v471_v10 = vld [vmem:[%s6516_s20 + $0x3f0] sm:$0xff] }
 0x44c   : > { %v3837_v24 = vsel %vm3731_vm2, %v3648_v0, %v3000_v6  ;;  %v3836_v44 = vsel %vm3731_vm2, %v3647_v26, %v2998_v52  ;;  %v3656_v0 = vsel %vm3542_vm1, %v3467_v27, %v9002_v59  ;;  %v3655_v26 = vsel %vm3542_vm1, %v3466_v40, %v9003_v58  ;;  %v9018_v59 = vld [vmem:[#allocation258_spill] sm:$0xff]  ;;  %v9019_v58 = vld [vmem:[#allocation259_spill] sm:$0xff] }
 0x44d   : > { %4026 = vst.msk [vmem:[%s6544_s15 + $0x348] sm:$0xff] %vm3920_vm3, %v3837_v24  ;;  %4025 = vst.msk [vmem:[%s6544_s15 + $0x340] sm:$0xff] %vm3920_vm3, %v3836_v44  ;;  %3115 = vrot.lane.b32.xlu1 %v1072_v41, %s4821_s12  ;;  %3113 = vrot.lane.b32.xlu0 %v1071_v7, %s4821_s12  ;;  %v3475_v27 = vsel %vm3353_vm0, %v466_v14, %v9016_v47  ;;  %v3474_v40 = vsel %vm3353_vm0, %v465_v36, %v9017_v9  ;;  %v9032_v47 = vld [vmem:[#allocation104_spill] sm:$0xff]  ;;  %v9033_v9 = vld [vmem:[#allocation105_spill] sm:$0xff] }
 0x44e   : > { %v1080_v41 = vld [vmem:[%s6285_s11 + $0x558] sm:$0xff]  ;;  %v1079_v7 = vld [vmem:[%s6285_s11 + $0x550] sm:$0xff]  ;;  %v474_v14 = vld [vmem:[%s6516_s20 + $0x408] sm:$0xff] }
 0x44f   : > { %v3004_v35 = vpop.permute.xlu1 %3003  ;;  %v3002_v11 = vpop.permute.xlu0 %3001  ;;  %v473_v36 = vld [vmem:[%s6516_s20 + $0x400] sm:$0xff] }
 0x450   : > { %v3839_v48 = vsel %vm3731_vm2, %v3650_v12, %v3004_v35  ;;  %v3838_v28 = vsel %vm3731_vm2, %v3649_v3, %v3002_v11  ;;  %v3658_v12 = vsel %vm3542_vm1, %v3469_v63, %v9006_v1  ;;  %v3657_v3 = vsel %vm3542_vm1, %v3468_v25, %v9007_v13  ;;  %v9022_v1 = vld [vmem:[#allocation260_spill] sm:$0xff]  ;;  %v9023_v13 = vld [vmem:[#allocation261_spill] sm:$0xff] }
 0x451   : > { %4028 = vst.msk [vmem:[%s6544_s15 + $0x358] sm:$0xff] %vm3920_vm3, %v3839_v48  ;;  %4027 = vst.msk [vmem:[%s6544_s15 + $0x350] sm:$0xff] %vm3920_vm3, %v3838_v28  ;;  %3119 = vrot.lane.b32.xlu1 %v1074_v39, %s4821_s12  ;;  %3117 = vrot.lane.b32.xlu0 %v1073_v50, %s4821_s12  ;;  %v3477_v63 = vsel %vm3353_vm0, %v468_v54, %v9020_v45  ;;  %v3476_v25 = vsel %vm3353_vm0, %v467_v19, %v9021_v46  ;;  %v9036_v45 = vld [vmem:[#allocation106_spill] sm:$0xff]  ;;  %v9037_v46 = vld [vmem:[#allocation107_spill] sm:$0xff] }
 0x452   : > { %v1082_v39 = vld [vmem:[%s6285_s11 + $0x568] sm:$0xff]  ;;  %v1081_v50 = vld [vmem:[%s6285_s11 + $0x560] sm:$0xff]  ;;  %v476_v54 = vld [vmem:[%s6516_s20 + $0x418] sm:$0xff] }
 0x453   : > { %v3008_v33 = vpop.permute.xlu1 %3007  ;;  %v3006_v23 = vpop.permute.xlu0 %3005  ;;  %v475_v19 = vld [vmem:[%s6516_s20 + $0x410] sm:$0xff] }
 0x454   : > { %v3841_v18 = vsel %vm3731_vm2, %v3652_v53, %v3008_v33  ;;  %v3840_v17 = vsel %vm3731_vm2, %v3651_v32, %v3006_v23  ;;  %v3660_v53 = vsel %vm3542_vm1, %v3471_v31, %v9010_v51  ;;  %v3659_v32 = vsel %vm3542_vm1, %v3470_v57, %v9011_v16  ;;  %v9026_v51 = vld [vmem:[#allocation262_spill] sm:$0xff]  ;;  %v9027_v16 = vld [vmem:[#allocation263_spill] sm:$0xff] }
 0x455   : > { %4030 = vst.msk [vmem:[%s6544_s15 + $0x368] sm:$0xff] %vm3920_vm3, %v3841_v18  ;;  %4029 = vst.msk [vmem:[%s6544_s15 + $0x360] sm:$0xff] %vm3920_vm3, %v3840_v17  ;;  %3123 = vrot.lane.b32.xlu1 %v1076_v43, %s4821_s12  ;;  %3121 = vrot.lane.b32.xlu0 %v1075_v4, %s4821_s12  ;;  %v3479_v31 = vsel %vm3353_vm0, %v470_v61, %v9024_v29  ;;  %v3478_v57 = vsel %vm3353_vm0, %v469_v56, %v9025_v34  ;;  %v9038_v61 = vld [vmem:[#allocation268_spill] sm:$0xff]  ;;  %v9041_v29 = vld [vmem:[#allocation109_spill] sm:$0xff] }
 0x456   : > { %v1084_v43 = vld [vmem:[%s6285_s11 + $0x578] sm:$0xff]  ;;  %v1083_v4 = vld [vmem:[%s6285_s11 + $0x570] sm:$0xff] }
 0x457   : > { %v3012_v60 = vpop.permute.xlu1 %3011  ;;  %v3010_v8 = vpop.permute.xlu0 %3009  ;;  %v480_v34 = vld [vmem:[%s6516_s20 + $0x438] sm:$0xff] }
 0x458   : > { %v3843_v20 = vsel %vm3731_vm2, %v3654_v15, %v3012_v60  ;;  %v3842_v21 = vsel %vm3731_vm2, %v3653_v49, %v3010_v8  ;;  %v3662_v15 = vsel %vm3542_vm1, %v3473_v42, %v9014_v37  ;;  %v3661_v49 = vsel %vm3542_vm1, %v3472_v30, %v9015_v2  ;;  %v9030_v37 = vld [vmem:[#allocation264_spill] sm:$0xff]  ;;  %v9031_v2 = vld [vmem:[#allocation265_spill] sm:$0xff] }
 0x459   : > { %4032 = vst.msk [vmem:[%s6544_s15 + $0x378] sm:$0xff] %vm3920_vm3, %v3843_v20  ;;  %4031 = vst.msk [vmem:[%s6544_s15 + $0x370] sm:$0xff] %vm3920_vm3, %v3842_v21  ;;  %3127 = vrot.lane.b32.xlu1 %v1078_v22, %s4821_s12  ;;  %3125 = vrot.lane.b32.xlu0 %v1077_v62, %s4821_s12  ;;  %v3481_v42 = vsel %vm3353_vm0, %v472_v5, %v9028_v55  ;;  %v3480_v30 = vsel %vm3353_vm0, %v471_v10, %v9029_v38  ;;  %v9043_v5 = vld [vmem:[#allocation271_spill] sm:$0xff]  ;;  %v9046_v38 = vld [vmem:[#allocation272_spill] sm:$0xff] }
 0x45a   : > { %v1086_v22 = vld [vmem:[%s6285_s11 + $0x588] sm:$0xff]  ;;  %v1085_v62 = vld [vmem:[%s6285_s11 + $0x580] sm:$0xff] }
 0x45b   : > { %v3016_v6 = vpop.permute.xlu1 %3015  ;;  %v3014_v52 = vpop.permute.xlu0 %3013  ;;  %v482_v55 = vld [vmem:[%s6516_s20 + $0x448] sm:$0xff] }
 0x45c   : > { %v3845_v24 = vsel %vm3731_vm2, %v3656_v0, %v3016_v6  ;;  %v3844_v44 = vsel %vm3731_vm2, %v3655_v26, %v3014_v52  ;;  %v3664_v0 = vsel %vm3542_vm1, %v3475_v27, %v9018_v59  ;;  %v3663_v26 = vsel %vm3542_vm1, %v3474_v40, %v9019_v58  ;;  %v9034_v59 = vld [vmem:[#allocation266_spill] sm:$0xff]  ;;  %v9035_v58 = vld [vmem:[#allocation267_spill] sm:$0xff] }
 0x45d   : > { %4034 = vst.msk [vmem:[%s6544_s15 + $0x388] sm:$0xff] %vm3920_vm3, %v3845_v24  ;;  %4033 = vst.msk [vmem:[%s6544_s15 + $0x380] sm:$0xff] %vm3920_vm3, %v3844_v44  ;;  %3131 = vrot.lane.b32.xlu1 %v1080_v41, %s4821_s12  ;;  %3129 = vrot.lane.b32.xlu0 %v1079_v7, %s4821_s12  ;;  %v3483_v27 = vsel %vm3353_vm0, %v474_v14, %v9032_v47  ;;  %v3482_v40 = vsel %vm3353_vm0, %v473_v36, %v9033_v9  ;;  %v9050_v47 = vld [vmem:[#allocation274_spill] sm:$0xff]  ;;  %v9051_v9 = vld [vmem:[#allocation275_spill] sm:$0xff] }
 0x45e   : > { %v1088_v41 = vld [vmem:[%s6285_s11 + $0x598] sm:$0xff]  ;;  %v1087_v7 = vld [vmem:[%s6285_s11 + $0x590] sm:$0xff] }
 0x45f   : > { %v3020_v35 = vpop.permute.xlu1 %3019  ;;  %v3018_v11 = vpop.permute.xlu0 %3017 }
 0x460   : > { %v3847_v48 = vsel %vm3731_vm2, %v3658_v12, %v3020_v35  ;;  %v3846_v28 = vsel %vm3731_vm2, %v3657_v3, %v3018_v11  ;;  %v3666_v12 = vsel %vm3542_vm1, %v3477_v63, %v9022_v1  ;;  %v3665_v3 = vsel %vm3542_vm1, %v3476_v25, %v9023_v13  ;;  %v9039_v1 = vld [vmem:[#allocation269_spill] sm:$0xff] }
 0x461   : > { %4036 = vst.msk [vmem:[%s6544_s15 + $0x398] sm:$0xff] %vm3920_vm3, %v3847_v48  ;;  %4035 = vst.msk [vmem:[%s6544_s15 + $0x390] sm:$0xff] %vm3920_vm3, %v3846_v28  ;;  %3135 = vrot.lane.b32.xlu1 %v1082_v39, %s4821_s12  ;;  %3133 = vrot.lane.b32.xlu0 %v1081_v50, %s4821_s12  ;;  %v3485_v63 = vsel %vm3353_vm0, %v476_v54, %v9036_v45  ;;  %v3484_v25 = vsel %vm3353_vm0, %v475_v19, %v9037_v46  ;;  %v9055_v45 = vld [vmem:[#allocation277_spill] sm:$0xff] }
 0x462   : > { %v1090_v39 = vld [vmem:[%s6285_s11 + $0x5a8] sm:$0xff]  ;;  %v1089_v50 = vld [vmem:[%s6285_s11 + $0x5a0] sm:$0xff]  ;;  %v3674_v56 = vsel %vm3542_vm1, %v3485_v63, %v9038_v61 }
 0x463   : > { %v3024_v33 = vpop.permute.xlu1 %3023  ;;  %v3022_v23 = vpop.permute.xlu0 %3021  ;;  %v9056_v61 = vld [vmem:[#allocation116_spill] sm:$0xff] }
 0x464   : > { %v3849_v18 = vsel %vm3731_vm2, %v3660_v53, %v3024_v33  ;;  %v3848_v17 = vsel %vm3731_vm2, %v3659_v32, %v3022_v23  ;;  %v3668_v53 = vsel %vm3542_vm1, %v3479_v31, %v9026_v51  ;;  %v3667_v32 = vsel %vm3542_vm1, %v3478_v57, %v9027_v16  ;;  %v479_v57 = vld [vmem:[%s6516_s20 + $0x430] sm:$0xff] }
 0x465   : > { %4038 = vst.msk [vmem:[%s6544_s15 + $0x3a8] sm:$0xff] %vm3920_vm3, %v3849_v18  ;;  %4037 = vst.msk [vmem:[%s6544_s15 + $0x3a0] sm:$0xff] %vm3920_vm3, %v3848_v17  ;;  %3139 = vrot.lane.b32.xlu1 %v1084_v43, %s4821_s12  ;;  %3137 = vrot.lane.b32.xlu0 %v1083_v4, %s4821_s12 }
 0x466   : > { %v1092_v43 = vld [vmem:[%s6285_s11 + $0x5b8] sm:$0xff]  ;;  %v1091_v4 = vld [vmem:[%s6285_s11 + $0x5b0] sm:$0xff] }
 0x467   : > { %v3028_v60 = vpop.permute.xlu1 %3027  ;;  %v3026_v8 = vpop.permute.xlu0 %3025 }
 0x468   : > { %v3851_v20 = vsel %vm3731_vm2, %v3662_v15, %v3028_v60  ;;  %v3850_v21 = vsel %vm3731_vm2, %v3661_v49, %v3026_v8  ;;  %v3670_v15 = vsel %vm3542_vm1, %v3481_v42, %v9030_v37  ;;  %v3669_v49 = vsel %vm3542_vm1, %v3480_v30, %v9031_v2  ;;  %v481_v42 = vld [vmem:[%s6516_s20 + $0x440] sm:$0xff]  ;;  %v9048_v2 = vld [vmem:[#allocation112_spill] sm:$0xff] }
 0x469   : > { %4040 = vst.msk [vmem:[%s6544_s15 + $0x3b8] sm:$0xff] %vm3920_vm3, %v3851_v20  ;;  %4039 = vst.msk [vmem:[%s6544_s15 + $0x3b0] sm:$0xff] %vm3920_vm3, %v3850_v21  ;;  %3143 = vrot.lane.b32.xlu1 %v1086_v22, %s4821_s12  ;;  %3141 = vrot.lane.b32.xlu0 %v1085_v62, %s4821_s12 }
 0x46a   : > { %v1094_v22 = vld [vmem:[%s6285_s11 + $0x5c8] sm:$0xff]  ;;  %v1093_v62 = vld [vmem:[%s6285_s11 + $0x5c0] sm:$0xff] }
 0x46b   : > { %v3032_v6 = vpop.permute.xlu1 %3031  ;;  %v3030_v52 = vpop.permute.xlu0 %3029 }
 0x46c   : > { %v3853_v24 = vsel %vm3731_vm2, %v3664_v0, %v3032_v6  ;;  %v3852_v44 = vsel %vm3731_vm2, %v3663_v26, %v3030_v52  ;;  %v3672_v0 = vsel %vm3542_vm1, %v3483_v27, %v9034_v59  ;;  %v3671_v26 = vsel %vm3542_vm1, %v3482_v40, %v9035_v58  ;;  %v9052_v59 = vld [vmem:[#allocation114_spill] sm:$0xff]  ;;  %v9053_v58 = vld [vmem:[#allocation115_spill] sm:$0xff] }
 0x46d   : > { %4042 = vst.msk [vmem:[%s6544_s15 + $0x3c8] sm:$0xff] %vm3920_vm3, %v3853_v24  ;;  %4041 = vst.msk [vmem:[%s6544_s15 + $0x3c0] sm:$0xff] %vm3920_vm3, %v3852_v44  ;;  %3147 = vrot.lane.b32.xlu1 %v1088_v41, %s4821_s12  ;;  %3145 = vrot.lane.b32.xlu0 %v1087_v7, %s4821_s12 }
 0x46e   : > { %v1096_v41 = vld [vmem:[%s6285_s11 + $0x5d8] sm:$0xff]  ;;  %v1095_v7 = vld [vmem:[%s6285_s11 + $0x5d0] sm:$0xff] }
 0x46f   : > { %v3036_v35 = vpop.permute.xlu1 %3035  ;;  %v3034_v11 = vpop.permute.xlu0 %3033 }
 0x470   : > { %v3855_v48 = vsel %vm3731_vm2, %v3666_v12, %v3036_v35  ;;  %v3854_v28 = vsel %vm3731_vm2, %v3665_v3, %v3034_v11  ;;  %v3673_v12 = vsel %vm3542_vm1, %v3484_v25, %v9039_v1  ;;  %v9057_v1 = vld [vmem:[#allocation117_spill] sm:$0xff] }
 0x471   : > { %4044 = vst.msk [vmem:[%s6544_s15 + $0x3d8] sm:$0xff] %vm3920_vm3, %v3855_v48  ;;  %4043 = vst.msk [vmem:[%s6544_s15 + $0x3d0] sm:$0xff] %vm3920_vm3, %v3854_v28  ;;  %3151 = vrot.lane.b32.xlu1 %v1090_v39, %s4821_s12  ;;  %3149 = vrot.lane.b32.xlu0 %v1089_v50, %s4821_s12  ;;  %v9040_v48 = vld [vmem:[#allocation108_spill] sm:$0xff] }
 0x472   : > { %v478_v39 = vld [vmem:[%s6516_s20 + $0x428] sm:$0xff]  ;;  %v477_v50 = vld [vmem:[%s6516_s20 + $0x420] sm:$0xff] }
 0x473   : > { %v3040_v33 = vpop.permute.xlu1 %3039  ;;  %v3038_v23 = vpop.permute.xlu0 %3037  ;;  %v3487_v28 = vsel %vm3353_vm0, %v478_v39, %v9040_v48  ;;  %v3486_v31 = vsel %vm3353_vm0, %v477_v50, %v9041_v29  ;;  %v9059_v48 = vld [vmem:[#allocation279_spill] sm:$0xff] }
 0x474   : > { %v3857_v18 = vsel %vm3731_vm2, %v3668_v53, %v3040_v33  ;;  %v3856_v17 = vsel %vm3731_vm2, %v3667_v32, %v3038_v23  ;;  %v3675_v10 = vsel %vm3542_vm1, %v3486_v31, %v9043_v5  ;;  %v9044_v33 = vld [vmem:[#allocation110_spill] sm:$0xff]  ;;  %v9061_v5 = vld [vmem:[#allocation119_spill] sm:$0xff] }
 0x475   : > { %4046 = vst.msk [vmem:[%s6544_s15 + $0x3e8] sm:$0xff] %vm3920_vm3, %v3857_v18  ;;  %4045 = vst.msk [vmem:[%s6544_s15 + $0x3e0] sm:$0xff] %vm3920_vm3, %v3856_v17  ;;  %3155 = vrot.lane.b32.xlu1 %v1092_v43, %s4821_s12  ;;  %3153 = vrot.lane.b32.xlu0 %v1091_v4, %s4821_s12  ;;  %v9042_v43 = vld [vmem:[#allocation270_spill] sm:$0xff]  ;;  %v3489_v23 = vsel %vm3353_vm0, %v480_v34, %v9044_v33  ;;  %v9045_v18 = vld [vmem:[#allocation111_spill] sm:$0xff] }
 0x476   : > { %v3676_v4 = vsel %vm3542_vm1, %v3487_v28, %v9042_v43  ;;  %v3488_v17 = vsel %vm3353_vm0, %v479_v57, %v9045_v18  ;;  %v3678_v30 = vsel %vm3542_vm1, %v3489_v23, %v9046_v38  ;;  %v9060_v43 = vld [vmem:[#allocation118_spill] sm:$0xff]  ;;  %v9063_v33 = vld [vmem:[#allocation281_spill] sm:$0xff]  ;;  %v9064_v38 = vld [vmem:[#allocation120_spill] sm:$0xff] }
 0x477   : > { %v3044_v60 = vpop.permute.xlu1 %3043  ;;  %v3042_v8 = vpop.permute.xlu0 %3041 }
 0x478   : > { %v3859_v20 = vsel %vm3731_vm2, %v3670_v15, %v3044_v60  ;;  %v3858_v21 = vsel %vm3731_vm2, %v3669_v49, %v3042_v8  ;;  %v3491_v49 = vsel %vm3353_vm0, %v482_v55, %v9048_v2  ;;  %v9049_v60 = vld [vmem:[#allocation113_spill] sm:$0xff]  ;;  %v9067_v2 = vld [vmem:[#allocation283_spill] sm:$0xff] }
 0x479   : > { %4048 = vst.msk [vmem:[%s6544_s15 + $0x3f8] sm:$0xff] %vm3920_vm3, %v3859_v20  ;;  %4047 = vst.msk [vmem:[%s6544_s15 + $0x3f0] sm:$0xff] %vm3920_vm3, %v3858_v21  ;;  %3159 = vrot.lane.b32.xlu1 %v1094_v22, %s4821_s12  ;;  %3157 = vrot.lane.b32.xlu0 %v1093_v62, %s4821_s12  ;;  %v9047_v22 = vld [vmem:[#allocation273_spill] sm:$0xff]  ;;  %v3490_v8 = vsel %vm3353_vm0, %v481_v42, %v9049_v60  ;;  %v3680_v27 = vsel %vm3542_vm1, %v3491_v49, %v9050_v47  ;;  %v9068_v47 = vld [vmem:[#allocation122_spill] sm:$0xff] }
 0x47a   : > { %v3677_v62 = vsel %vm3542_vm1, %v3488_v17, %v9047_v22  ;;  %v484_v20 = vld [vmem:[%s6516_s20 + $0x458] sm:$0xff]  ;;  %v483_v21 = vld [vmem:[%s6516_s20 + $0x450] sm:$0xff]  ;;  %v3679_v40 = vsel %vm3542_vm1, %v3490_v8, %v9051_v9  ;;  %v9069_v9 = vld [vmem:[#allocation123_spill] sm:$0xff] }
 0x47b   : > { %v3048_v6 = vpop.permute.xlu1 %3047  ;;  %v3046_v52 = vpop.permute.xlu0 %3045  ;;  %v9065_v22 = vld [vmem:[#allocation121_spill] sm:$0xff] }
 0x47c   : > { %v3861_v24 = vsel %vm3731_vm2, %v3672_v0, %v3048_v6  ;;  %v3860_v44 = vsel %vm3731_vm2, %v3671_v26, %v3046_v52  ;;  %v3493_v0 = vsel %vm3353_vm0, %v484_v20, %v9052_v59  ;;  %v3492_v26 = vsel %vm3353_vm0, %v483_v21, %v9053_v58  ;;  %v486_v6 = vld [vmem:[%s6516_s20 + $0x468] sm:$0xff]  ;;  %v485_v52 = vld [vmem:[%s6516_s20 + $0x460] sm:$0xff]  ;;  %v9071_v59 = vld [vmem:[#allocation285_spill] sm:$0xff] }
 0x47d   : > { %4050 = vst.msk [vmem:[%s6544_s15 + $0x408] sm:$0xff] %vm3920_vm3, %v3861_v24  ;;  %4049 = vst.msk [vmem:[%s6544_s15 + $0x400] sm:$0xff] %vm3920_vm3, %v3860_v44  ;;  %3163 = vrot.lane.b32.xlu1 %v1096_v41, %s4821_s12  ;;  %3161 = vrot.lane.b32.xlu0 %v1095_v7, %s4821_s12  ;;  %v9054_v24 = vld [vmem:[#allocation276_spill] sm:$0xff]  ;;  %v3681_v63 = vsel %vm3542_vm1, %v3492_v26, %v9055_v45  ;;  %v9073_v45 = vld [vmem:[#allocation125_spill] sm:$0xff] }
 0x47e   : > { %v3682_v44 = vsel %vm3542_vm1, %v3493_v0, %v9054_v24  ;;  %v9072_v24 = vld [vmem:[#allocation124_spill] sm:$0xff] }
 0x47f   : > { %v3052_v13 = vpop.permute.xlu1 %3051  ;;  %v3050_v3 = vpop.permute.xlu0 %3049 }
 0x480   : > { %v3863_v35 = vsel %vm3731_vm2, %v3674_v56, %v3052_v13  ;;  %v3862_v11 = vsel %vm3731_vm2, %v3673_v12, %v3050_v3  ;;  %v3495_v56 = vsel %vm3353_vm0, %v486_v6, %v9056_v61  ;;  %v3494_v12 = vsel %vm3353_vm0, %v485_v52, %v9057_v1  ;;  %v488_v13 = vld [vmem:[%s6516_s20 + $0x478] sm:$0xff]  ;;  %v487_v3 = vld [vmem:[%s6516_s20 + $0x470] sm:$0xff]  ;;  %v9075_v61 = vld [vmem:[#allocation287_spill] sm:$0xff] }
 0x481   : > { %4052 = vst.msk [vmem:[%s6544_s15 + $0x418] sm:$0xff] %vm3920_vm3, %v3863_v35  ;;  %4051 = vst.msk [vmem:[%s6544_s15 + $0x410] sm:$0xff] %vm3920_vm3, %v3862_v11  ;;  %v9058_v35 = vld [vmem:[#allocation278_spill] sm:$0xff]  ;;  %v3683_v28 = vsel %vm3542_vm1, %v3494_v12, %v9059_v48  ;;  %v9077_v48 = vld [vmem:[#allocation127_spill] sm:$0xff] }
 0x482   : > { %v3684_v11 = vsel %vm3542_vm1, %v3495_v56, %v9058_v35  ;;  %v9076_v35 = vld [vmem:[#allocation126_spill] sm:$0xff] }
 0x483   : > { %v3056_v51 = vpop.permute.xlu1 %3055  ;;  %v3054_v53 = vpop.permute.xlu0 %3053 }
 0x484   : > { %v3865_v16 = vsel %vm3731_vm2, %v3676_v4, %v3056_v51  ;;  %v3864_v32 = vsel %vm3731_vm2, %v3675_v10, %v3054_v53  ;;  %v3497_v4 = vsel %vm3353_vm0, %v488_v13, %v9060_v43  ;;  %v3496_v10 = vsel %vm3353_vm0, %v487_v3, %v9061_v5  ;;  %v490_v51 = vld [vmem:[%s6516_s20 + $0x488] sm:$0xff]  ;;  %v489_v53 = vld [vmem:[%s6516_s20 + $0x480] sm:$0xff]  ;;  %v9079_v43 = vld [vmem:[#allocation289_spill] sm:$0xff] }
 0x485   : > { %4054 = vst.msk [vmem:[%s6544_s15 + $0x428] sm:$0xff] %vm3920_vm3, %v3865_v16  ;;  %4053 = vst.msk [vmem:[%s6544_s15 + $0x420] sm:$0xff] %vm3920_vm3, %v3864_v32  ;;  %v9062_v16 = vld [vmem:[#allocation280_spill] sm:$0xff]  ;;  %v3685_v23 = vsel %vm3542_vm1, %v3496_v10, %v9063_v33  ;;  %v9081_v33 = vld [vmem:[#allocation129_spill] sm:$0xff] }
 0x486   : > { %v3686_v32 = vsel %vm3542_vm1, %v3497_v4, %v9062_v16  ;;  %v9080_v16 = vld [vmem:[#allocation128_spill] sm:$0xff] }
 0x487   : > { %v3060_v14 = vpop.permute.xlu1 %3059  ;;  %v3058_v36 = vpop.permute.xlu0 %3057 }
 0x488   : > { %v3867_v37 = vsel %vm3731_vm2, %v3678_v30, %v3060_v14  ;;  %v3866_v15 = vsel %vm3731_vm2, %v3677_v62, %v3058_v36  ;;  %v3499_v30 = vsel %vm3353_vm0, %v490_v51, %v9064_v38  ;;  %v3498_v62 = vsel %vm3353_vm0, %v489_v53, %v9065_v22  ;;  %v492_v14 = vld [vmem:[%s6516_s20 + $0x498] sm:$0xff]  ;;  %v491_v36 = vld [vmem:[%s6516_s20 + $0x490] sm:$0xff]  ;;  %v9083_v38 = vld [vmem:[#allocation291_spill] sm:$0xff] }
 0x489   : > { %4056 = vst.msk [vmem:[%s6544_s15 + $0x438] sm:$0xff] %vm3920_vm3, %v3867_v37  ;;  %4055 = vst.msk [vmem:[%s6544_s15 + $0x430] sm:$0xff] %vm3920_vm3, %v3866_v15  ;;  %v9066_v37 = vld [vmem:[#allocation282_spill] sm:$0xff]  ;;  %v3687_v49 = vsel %vm3542_vm1, %v3498_v62, %v9067_v2  ;;  %v9085_v2 = vld [vmem:[#allocation131_spill] sm:$0xff] }
 0x48a   : > { %v3688_v15 = vsel %vm3542_vm1, %v3499_v30, %v9066_v37  ;;  %v9084_v37 = vld [vmem:[#allocation130_spill] sm:$0xff] }
 0x48b   : > { %v3064_v41 = vpop.permute.xlu1 %3063  ;;  %v3062_v7 = vpop.permute.xlu0 %3061 }
 0x48c   : > { %v3869_v54 = vsel %vm3731_vm2, %v3680_v27, %v3064_v41  ;;  %v3868_v19 = vsel %vm3731_vm2, %v3679_v40, %v3062_v7  ;;  %v3501_v27 = vsel %vm3353_vm0, %v492_v14, %v9068_v47  ;;  %v3500_v40 = vsel %vm3353_vm0, %v491_v36, %v9069_v9  ;;  %v494_v41 = vld [vmem:[%s6516_s20 + $0x4a8] sm:$0xff]  ;;  %v493_v7 = vld [vmem:[%s6516_s20 + $0x4a0] sm:$0xff]  ;;  %v9087_v47 = vld [vmem:[#allocation293_spill] sm:$0xff] }
 0x48d   : > { %4058 = vst.msk [vmem:[%s6544_s15 + $0x448] sm:$0xff] %vm3920_vm3, %v3869_v54  ;;  %4057 = vst.msk [vmem:[%s6544_s15 + $0x440] sm:$0xff] %vm3920_vm3, %v3868_v19  ;;  %v9070_v54 = vld [vmem:[#allocation284_spill] sm:$0xff]  ;;  %v3689_v0 = vsel %vm3542_vm1, %v3500_v40, %v9071_v59  ;;  %v9089_v59 = vld [vmem:[#allocation133_spill] sm:$0xff] }
 0x48e   : > { %v3690_v19 = vsel %vm3542_vm1, %v3501_v27, %v9070_v54  ;;  %v9088_v54 = vld [vmem:[#allocation132_spill] sm:$0xff] }
 0x48f   : > { %v3068_v46 = vpop.permute.xlu1 %3067  ;;  %v3066_v25 = vpop.permute.xlu0 %3065 }
 0x490   : > { %v3871_v39 = vsel %vm3731_vm2, %v3682_v44, %v3068_v46  ;;  %v3870_v50 = vsel %vm3731_vm2, %v3681_v63, %v3066_v25  ;;  %v3503_v44 = vsel %vm3353_vm0, %v494_v41, %v9072_v24  ;;  %v3502_v63 = vsel %vm3353_vm0, %v493_v7, %v9073_v45  ;;  %v496_v46 = vld [vmem:[%s6516_s20 + $0x4b8] sm:$0xff]  ;;  %v495_v25 = vld [vmem:[%s6516_s20 + $0x4b0] sm:$0xff]  ;;  %v9091_v24 = vld [vmem:[#allocation295_spill] sm:$0xff] }
 0x491   : > { %4060 = vst.msk [vmem:[%s6544_s15 + $0x458] sm:$0xff] %vm3920_vm3, %v3871_v39  ;;  %4059 = vst.msk [vmem:[%s6544_s15 + $0x450] sm:$0xff] %vm3920_vm3, %v3870_v50  ;;  %v9074_v39 = vld [vmem:[#allocation286_spill] sm:$0xff]  ;;  %v3691_v56 = vsel %vm3542_vm1, %v3502_v63, %v9075_v61  ;;  %v9093_v61 = vld [vmem:[#allocation135_spill] sm:$0xff] }
 0x492   : > { %v3692_v50 = vsel %vm3542_vm1, %v3503_v44, %v9074_v39  ;;  %v9092_v39 = vld [vmem:[#allocation134_spill] sm:$0xff] }
 0x493   : > { %v3072_v29 = vpop.permute.xlu1 %3071  ;;  %v3070_v31 = vpop.permute.xlu0 %3069 }
 0x494   : > { %v3873_v34 = vsel %vm3731_vm2, %v3684_v11, %v3072_v29  ;;  %v3872_v57 = vsel %vm3731_vm2, %v3683_v28, %v3070_v31  ;;  %v3505_v11 = vsel %vm3353_vm0, %v496_v46, %v9076_v35  ;;  %v3504_v28 = vsel %vm3353_vm0, %v495_v25, %v9077_v48  ;;  %v498_v29 = vld [vmem:[%s6516_s20 + $0x4c8] sm:$0xff]  ;;  %v497_v31 = vld [vmem:[%s6516_s20 + $0x4c0] sm:$0xff]  ;;  %v9095_v35 = vld [vmem:[#allocation297_spill] sm:$0xff] }
 0x495   : > { %4062 = vst.msk [vmem:[%s6544_s15 + $0x468] sm:$0xff] %vm3920_vm3, %v3873_v34  ;;  %4061 = vst.msk [vmem:[%s6544_s15 + $0x460] sm:$0xff] %vm3920_vm3, %v3872_v57  ;;  %v9078_v34 = vld [vmem:[#allocation288_spill] sm:$0xff]  ;;  %v3693_v4 = vsel %vm3542_vm1, %v3504_v28, %v9079_v43  ;;  %v9097_v43 = vld [vmem:[#allocation137_spill] sm:$0xff] }
 0x496   : > { %v3694_v57 = vsel %vm3542_vm1, %v3505_v11, %v9078_v34  ;;  %v9096_v34 = vld [vmem:[#allocation136_spill] sm:$0xff] }
 0x497   : > { %v3076_v18 = vpop.permute.xlu1 %3075  ;;  %v3074_v17 = vpop.permute.xlu0 %3073 }
 0x498   : > { %v3875_v55 = vsel %vm3731_vm2, %v3686_v32, %v3076_v18  ;;  %v3874_v42 = vsel %vm3731_vm2, %v3685_v23, %v3074_v17  ;;  %v3507_v32 = vsel %vm3353_vm0, %v498_v29, %v9080_v16  ;;  %v3506_v23 = vsel %vm3353_vm0, %v497_v31, %v9081_v33  ;;  %v500_v18 = vld [vmem:[%s6516_s20 + $0x4d8] sm:$0xff]  ;;  %v499_v17 = vld [vmem:[%s6516_s20 + $0x4d0] sm:$0xff]  ;;  %v9099_v16 = vld [vmem:[#allocation299_spill] sm:$0xff] }
 0x499   : > { %4064 = vst.msk [vmem:[%s6544_s15 + $0x478] sm:$0xff] %vm3920_vm3, %v3875_v55  ;;  %4063 = vst.msk [vmem:[%s6544_s15 + $0x470] sm:$0xff] %vm3920_vm3, %v3874_v42  ;;  %v9082_v55 = vld [vmem:[#allocation290_spill] sm:$0xff]  ;;  %v3695_v30 = vsel %vm3542_vm1, %v3506_v23, %v9083_v38  ;;  %v9101_v38 = vld [vmem:[#allocation139_spill] sm:$0xff] }
 0x49a   : > { %v3696_v42 = vsel %vm3542_vm1, %v3507_v32, %v9082_v55  ;;  %v9100_v55 = vld [vmem:[#allocation138_spill] sm:$0xff] }
 0x49b   : > { %v3080_v60 = vpop.permute.xlu1 %3079  ;;  %v3078_v8 = vpop.permute.xlu0 %3077 }
 0x49c   : > { %v3877_v20 = vsel %vm3731_vm2, %v3688_v15, %v3080_v60  ;;  %v3876_v21 = vsel %vm3731_vm2, %v3687_v49, %v3078_v8  ;;  %v3509_v15 = vsel %vm3353_vm0, %v500_v18, %v9084_v37  ;;  %v3508_v49 = vsel %vm3353_vm0, %v499_v17, %v9085_v2  ;;  %v502_v60 = vld [vmem:[%s6516_s20 + $0x4e8] sm:$0xff]  ;;  %v501_v8 = vld [vmem:[%s6516_s20 + $0x4e0] sm:$0xff]  ;;  %v9103_v37 = vld [vmem:[#allocation301_spill] sm:$0xff] }
 0x49d   : > { %4066 = vst.msk [vmem:[%s6544_s15 + $0x488] sm:$0xff] %vm3920_vm3, %v3877_v20  ;;  %4065 = vst.msk [vmem:[%s6544_s15 + $0x480] sm:$0xff] %vm3920_vm3, %v3876_v21  ;;  %v9086_v20 = vld [vmem:[#allocation292_spill] sm:$0xff]  ;;  %v3697_v27 = vsel %vm3542_vm1, %v3508_v49, %v9087_v47  ;;  %v9105_v47 = vld [vmem:[#allocation141_spill] sm:$0xff] }
 0x49e   : > { %v3698_v21 = vsel %vm3542_vm1, %v3509_v15, %v9086_v20  ;;  %v9104_v20 = vld [vmem:[#allocation140_spill] sm:$0xff] }
 0x49f   : > { %v3084_v58 = vpop.permute.xlu1 %3083  ;;  %v3082_v26 = vpop.permute.xlu0 %3081 }
 0x4a0   : > { %v3879_v6 = vsel %vm3731_vm2, %v3690_v19, %v3084_v58  ;;  %v3878_v52 = vsel %vm3731_vm2, %v3689_v0, %v3082_v26  ;;  %v3511_v19 = vsel %vm3353_vm0, %v502_v60, %v9088_v54  ;;  %v3510_v0 = vsel %vm3353_vm0, %v501_v8, %v9089_v59  ;;  %v504_v58 = vld [vmem:[%s6516_s20 + $0x4f8] sm:$0xff]  ;;  %v503_v26 = vld [vmem:[%s6516_s20 + $0x4f0] sm:$0xff]  ;;  %v9107_v54 = vld [vmem:[#allocation303_spill] sm:$0xff] }
 0x4a1   : > { %4068 = vst.msk [vmem:[%s6544_s15 + $0x498] sm:$0xff] %vm3920_vm3, %v3879_v6  ;;  %4067 = vst.msk [vmem:[%s6544_s15 + $0x490] sm:$0xff] %vm3920_vm3, %v3878_v52  ;;  %v9090_v6 = vld [vmem:[#allocation294_spill] sm:$0xff]  ;;  %v3699_v44 = vsel %vm3542_vm1, %v3510_v0, %v9091_v24  ;;  %v9109_v24 = vld [vmem:[#allocation143_spill] sm:$0xff] }
 0x4a2   : > { %v3700_v52 = vsel %vm3542_vm1, %v3511_v19, %v9090_v6  ;;  %v9108_v6 = vld [vmem:[#allocation142_spill] sm:$0xff] }
 0x4a3   : > { %v3088_v1 = vpop.permute.xlu1 %3087  ;;  %v3086_v12 = vpop.permute.xlu0 %3085 }
 0x4a4   : > { %v3881_v13 = vsel %vm3731_vm2, %v3692_v50, %v3088_v1  ;;  %v3880_v3 = vsel %vm3731_vm2, %v3691_v56, %v3086_v12  ;;  %v3513_v50 = vsel %vm3353_vm0, %v504_v58, %v9092_v39  ;;  %v3512_v56 = vsel %vm3353_vm0, %v503_v26, %v9093_v61  ;;  %v506_v1 = vld [vmem:[%s6516_s20 + $0x508] sm:$0xff]  ;;  %v505_v12 = vld [vmem:[%s6516_s20 + $0x500] sm:$0xff]  ;;  %v9111_v39 = vld [vmem:[#allocation305_spill] sm:$0xff] }
 0x4a5   : > { %4070 = vst.msk [vmem:[%s6544_s15 + $0x4a8] sm:$0xff] %vm3920_vm3, %v3881_v13  ;;  %4069 = vst.msk [vmem:[%s6544_s15 + $0x4a0] sm:$0xff] %vm3920_vm3, %v3880_v3  ;;  %v9094_v13 = vld [vmem:[#allocation296_spill] sm:$0xff]  ;;  %v3701_v11 = vsel %vm3542_vm1, %v3512_v56, %v9095_v35  ;;  %v9113_v35 = vld [vmem:[#allocation145_spill] sm:$0xff] }
 0x4a6   : > { %v3702_v3 = vsel %vm3542_vm1, %v3513_v50, %v9094_v13  ;;  %v9112_v13 = vld [vmem:[#allocation144_spill] sm:$0xff] }
 0x4a7   : > { %v3092_v5 = vpop.permute.xlu1 %3091  ;;  %v3090_v10 = vpop.permute.xlu0 %3089 }
 0x4a8   : > { %v3883_v51 = vsel %vm3731_vm2, %v3694_v57, %v3092_v5  ;;  %v3882_v53 = vsel %vm3731_vm2, %v3693_v4, %v3090_v10  ;;  %v3515_v57 = vsel %vm3353_vm0, %v506_v1, %v9096_v34  ;;  %v3514_v4 = vsel %vm3353_vm0, %v505_v12, %v9097_v43  ;;  %v508_v5 = vld [vmem:[%s6516_s20 + $0x518] sm:$0xff]  ;;  %v507_v10 = vld [vmem:[%s6516_s20 + $0x510] sm:$0xff]  ;;  %v9115_v34 = vld [vmem:[#allocation307_spill] sm:$0xff] }
 0x4a9   : > { %4072 = vst.msk [vmem:[%s6544_s15 + $0x4b8] sm:$0xff] %vm3920_vm3, %v3883_v51  ;;  %4071 = vst.msk [vmem:[%s6544_s15 + $0x4b0] sm:$0xff] %vm3920_vm3, %v3882_v53  ;;  %v9098_v51 = vld [vmem:[#allocation298_spill] sm:$0xff]  ;;  %v3703_v32 = vsel %vm3542_vm1, %v3514_v4, %v9099_v16  ;;  %v9117_v16 = vld [vmem:[#allocation147_spill] sm:$0xff] }
 0x4aa   : > { %v3704_v53 = vsel %vm3542_vm1, %v3515_v57, %v9098_v51  ;;  %v9116_v51 = vld [vmem:[#allocation146_spill] sm:$0xff] }
 0x4ab   : > { %v3096_v22 = vpop.permute.xlu1 %3095  ;;  %v3094_v62 = vpop.permute.xlu0 %3093 }
 0x4ac   : > { %v3885_v14 = vsel %vm3731_vm2, %v3696_v42, %v3096_v22  ;;  %v3884_v36 = vsel %vm3731_vm2, %v3695_v30, %v3094_v62  ;;  %v3517_v42 = vsel %vm3353_vm0, %v508_v5, %v9100_v55  ;;  %v3516_v30 = vsel %vm3353_vm0, %v507_v10, %v9101_v38  ;;  %v510_v22 = vld [vmem:[%s6516_s20 + $0x528] sm:$0xff]  ;;  %v509_v62 = vld [vmem:[%s6516_s20 + $0x520] sm:$0xff]  ;;  %v9119_v55 = vld [vmem:[#allocation309_spill] sm:$0xff] }
 0x4ad   : > { %4074 = vst.msk [vmem:[%s6544_s15 + $0x4c8] sm:$0xff] %vm3920_vm3, %v3885_v14  ;;  %4073 = vst.msk [vmem:[%s6544_s15 + $0x4c0] sm:$0xff] %vm3920_vm3, %v3884_v36  ;;  %v9102_v14 = vld [vmem:[#allocation300_spill] sm:$0xff]  ;;  %v3705_v15 = vsel %vm3542_vm1, %v3516_v30, %v9103_v37  ;;  %v9121_v37 = vld [vmem:[#allocation149_spill] sm:$0xff] }
 0x4ae   : > { %v3706_v36 = vsel %vm3542_vm1, %v3517_v42, %v9102_v14  ;;  %v9120_v14 = vld [vmem:[#allocation148_spill] sm:$0xff] }
 0x4af   : > { %v3100_v9 = vpop.permute.xlu1 %3099  ;;  %v3098_v40 = vpop.permute.xlu0 %3097 }
 0x4b0   : > { %v3887_v41 = vsel %vm3731_vm2, %v3698_v21, %v3100_v9  ;;  %v3886_v7 = vsel %vm3731_vm2, %v3697_v27, %v3098_v40  ;;  %v3519_v21 = vsel %vm3353_vm0, %v510_v22, %v9104_v20  ;;  %v3518_v27 = vsel %vm3353_vm0, %v509_v62, %v9105_v47  ;;  %v512_v9 = vld [vmem:[%s6516_s20 + $0x538] sm:$0xff]  ;;  %v511_v40 = vld [vmem:[%s6516_s20 + $0x530] sm:$0xff]  ;;  %v9123_v20 = vld [vmem:[#allocation311_spill] sm:$0xff] }
 0x4b1   : > { %4076 = vst.msk [vmem:[%s6544_s15 + $0x4d8] sm:$0xff] %vm3920_vm3, %v3887_v41  ;;  %4075 = vst.msk [vmem:[%s6544_s15 + $0x4d0] sm:$0xff] %vm3920_vm3, %v3886_v7  ;;  %v9106_v41 = vld [vmem:[#allocation302_spill] sm:$0xff]  ;;  %v3707_v19 = vsel %vm3542_vm1, %v3518_v27, %v9107_v54  ;;  %v9125_v54 = vld [vmem:[#allocation151_spill] sm:$0xff] }
 0x4b2   : > { %v3708_v7 = vsel %vm3542_vm1, %v3519_v21, %v9106_v41  ;;  %v9124_v41 = vld [vmem:[#allocation150_spill] sm:$0xff] }
 0x4b3   : > { %v3104_v45 = vpop.permute.xlu1 %3103  ;;  %v3102_v63 = vpop.permute.xlu0 %3101 }
 0x4b4   : > { %v3889_v46 = vsel %vm3731_vm2, %v3700_v52, %v3104_v45  ;;  %v3888_v25 = vsel %vm3731_vm2, %v3699_v44, %v3102_v63  ;;  %v3521_v52 = vsel %vm3353_vm0, %v512_v9, %v9108_v6  ;;  %v3520_v44 = vsel %vm3353_vm0, %v511_v40, %v9109_v24  ;;  %v514_v45 = vld [vmem:[%s6516_s20 + $0x548] sm:$0xff]  ;;  %v513_v63 = vld [vmem:[%s6516_s20 + $0x540] sm:$0xff]  ;;  %v9127_v6 = vld [vmem:[#allocation313_spill] sm:$0xff] }
 0x4b5   : > { %4078 = vst.msk [vmem:[%s6544_s15 + $0x4e8] sm:$0xff] %vm3920_vm3, %v3889_v46  ;;  %4077 = vst.msk [vmem:[%s6544_s15 + $0x4e0] sm:$0xff] %vm3920_vm3, %v3888_v25  ;;  %v9110_v46 = vld [vmem:[#allocation304_spill] sm:$0xff]  ;;  %v3709_v50 = vsel %vm3542_vm1, %v3520_v44, %v9111_v39  ;;  %v9129_v39 = vld [vmem:[#allocation153_spill] sm:$0xff] }
 0x4b6   : > { %v3710_v25 = vsel %vm3542_vm1, %v3521_v52, %v9110_v46  ;;  %v9128_v46 = vld [vmem:[#allocation152_spill] sm:$0xff] }
 0x4b7   : > { %v3108_v48 = vpop.permute.xlu1 %3107  ;;  %v3106_v28 = vpop.permute.xlu0 %3105 }
 0x4b8   : > { %v3891_v29 = vsel %vm3731_vm2, %v3702_v3, %v3108_v48  ;;  %v3890_v31 = vsel %vm3731_vm2, %v3701_v11, %v3106_v28  ;;  %v3523_v3 = vsel %vm3353_vm0, %v514_v45, %v9112_v13  ;;  %v3522_v11 = vsel %vm3353_vm0, %v513_v63, %v9113_v35  ;;  %v516_v48 = vld [vmem:[%s6516_s20 + $0x558] sm:$0xff]  ;;  %v515_v28 = vld [vmem:[%s6516_s20 + $0x550] sm:$0xff]  ;;  %v9131_v13 = vld [vmem:[#allocation315_spill] sm:$0xff] }
 0x4b9   : > { %4080 = vst.msk [vmem:[%s6544_s15 + $0x4f8] sm:$0xff] %vm3920_vm3, %v3891_v29  ;;  %4079 = vst.msk [vmem:[%s6544_s15 + $0x4f0] sm:$0xff] %vm3920_vm3, %v3890_v31  ;;  %v9114_v29 = vld [vmem:[#allocation306_spill] sm:$0xff]  ;;  %v3711_v57 = vsel %vm3542_vm1, %v3522_v11, %v9115_v34  ;;  %v9133_v34 = vld [vmem:[#allocation155_spill] sm:$0xff] }
 0x4ba   : > { %v3712_v31 = vsel %vm3542_vm1, %v3523_v3, %v9114_v29  ;;  %v9132_v29 = vld [vmem:[#allocation154_spill] sm:$0xff] }
 0x4bb   : > { %v3112_v33 = vpop.permute.xlu1 %3111  ;;  %v3110_v23 = vpop.permute.xlu0 %3109 }
 0x4bc   : > { %v3893_v18 = vsel %vm3731_vm2, %v3704_v53, %v3112_v33  ;;  %v3892_v17 = vsel %vm3731_vm2, %v3703_v32, %v3110_v23  ;;  %v3525_v53 = vsel %vm3353_vm0, %v516_v48, %v9116_v51  ;;  %v3524_v32 = vsel %vm3353_vm0, %v515_v28, %v9117_v16  ;;  %v518_v33 = vld [vmem:[%s6516_s20 + $0x568] sm:$0xff]  ;;  %v517_v23 = vld [vmem:[%s6516_s20 + $0x560] sm:$0xff]  ;;  %v9135_v51 = vld [vmem:[#allocation317_spill] sm:$0xff] }
 0x4bd   : > { %4082 = vst.msk [vmem:[%s6544_s15 + $0x508] sm:$0xff] %vm3920_vm3, %v3893_v18  ;;  %4081 = vst.msk [vmem:[%s6544_s15 + $0x500] sm:$0xff] %vm3920_vm3, %v3892_v17  ;;  %v9118_v18 = vld [vmem:[#allocation308_spill] sm:$0xff]  ;;  %v3713_v42 = vsel %vm3542_vm1, %v3524_v32, %v9119_v55  ;;  %v9137_v55 = vld [vmem:[#allocation157_spill] sm:$0xff] }
 0x4be   : > { %v3714_v17 = vsel %vm3542_vm1, %v3525_v53, %v9118_v18  ;;  %v9136_v18 = vld [vmem:[#allocation156_spill] sm:$0xff] }
 0x4bf   : > { %v3116_v2 = vpop.permute.xlu1 %3115  ;;  %v3114_v49 = vpop.permute.xlu0 %3113 }
 0x4c0   : > { %v3895_v60 = vsel %vm3731_vm2, %v3706_v36, %v3116_v2  ;;  %v3894_v8 = vsel %vm3731_vm2, %v3705_v15, %v3114_v49  ;;  %v3527_v36 = vsel %vm3353_vm0, %v518_v33, %v9120_v14  ;;  %v3526_v15 = vsel %vm3353_vm0, %v517_v23, %v9121_v37  ;;  %v520_v2 = vld [vmem:[%s6516_s20 + $0x578] sm:$0xff]  ;;  %v519_v49 = vld [vmem:[%s6516_s20 + $0x570] sm:$0xff]  ;;  %v9139_v14 = vld [vmem:[#allocation319_spill] sm:$0xff] }
 0x4c1   : > { %4084 = vst.msk [vmem:[%s6544_s15 + $0x518] sm:$0xff] %vm3920_vm3, %v3895_v60  ;;  %4083 = vst.msk [vmem:[%s6544_s15 + $0x510] sm:$0xff] %vm3920_vm3, %v3894_v8  ;;  %v9122_v60 = vld [vmem:[#allocation310_spill] sm:$0xff]  ;;  %v3715_v21 = vsel %vm3542_vm1, %v3526_v15, %v9123_v20  ;;  %v9141_v20 = vld [vmem:[#allocation159_spill] sm:$0xff] }
 0x4c2   : > { %v3716_v8 = vsel %vm3542_vm1, %v3527_v36, %v9122_v60  ;;  %v9140_v60 = vld [vmem:[#allocation158_spill] sm:$0xff] }
 0x4c3   : > { %v3120_v59 = vpop.permute.xlu1 %3119  ;;  %v3118_v0 = vpop.permute.xlu0 %3117 }
 0x4c4   : > { %v3897_v58 = vsel %vm3731_vm2, %v3708_v7, %v3120_v59  ;;  %v3896_v26 = vsel %vm3731_vm2, %v3707_v19, %v3118_v0  ;;  %v3529_v7 = vsel %vm3353_vm0, %v520_v2, %v9124_v41  ;;  %v3528_v19 = vsel %vm3353_vm0, %v519_v49, %v9125_v54  ;;  %v522_v59 = vld [vmem:[%s6516_s20 + $0x588] sm:$0xff]  ;;  %v521_v0 = vld [vmem:[%s6516_s20 + $0x580] sm:$0xff]  ;;  %v9143_v41 = vld [vmem:[#allocation321_spill] sm:$0xff] }
 0x4c5   : > { %4086 = vst.msk [vmem:[%s6544_s15 + $0x528] sm:$0xff] %vm3920_vm3, %v3897_v58  ;;  %4085 = vst.msk [vmem:[%s6544_s15 + $0x520] sm:$0xff] %vm3920_vm3, %v3896_v26  ;;  %v9126_v58 = vld [vmem:[#allocation312_spill] sm:$0xff]  ;;  %v3717_v52 = vsel %vm3542_vm1, %v3528_v19, %v9127_v6  ;;  %v9145_v6 = vld [vmem:[#allocation161_spill] sm:$0xff] }
 0x4c6   : > { %v3718_v26 = vsel %vm3542_vm1, %v3529_v7, %v9126_v58  ;;  %v9144_v58 = vld [vmem:[#allocation160_spill] sm:$0xff] }
 0x4c7   : > { %v3124_v61 = vpop.permute.xlu1 %3123  ;;  %v3122_v56 = vpop.permute.xlu0 %3121 }
 0x4c8   : > { %v3899_v1 = vsel %vm3731_vm2, %v3710_v25, %v3124_v61  ;;  %v3898_v12 = vsel %vm3731_vm2, %v3709_v50, %v3122_v56  ;;  %v3531_v25 = vsel %vm3353_vm0, %v522_v59, %v9128_v46  ;;  %v3530_v50 = vsel %vm3353_vm0, %v521_v0, %v9129_v39  ;;  %v524_v61 = vld [vmem:[%s6516_s20 + $0x598] sm:$0xff]  ;;  %v523_v56 = vld [vmem:[%s6516_s20 + $0x590] sm:$0xff]  ;;  %v9147_v46 = vld [vmem:[#allocation323_spill] sm:$0xff] }
 0x4c9   : > { %4088 = vst.msk [vmem:[%s6544_s15 + $0x538] sm:$0xff] %vm3920_vm3, %v3899_v1  ;;  %4087 = vst.msk [vmem:[%s6544_s15 + $0x530] sm:$0xff] %vm3920_vm3, %v3898_v12  ;;  %v9130_v1 = vld [vmem:[#allocation314_spill] sm:$0xff]  ;;  %v3719_v3 = vsel %vm3542_vm1, %v3530_v50, %v9131_v13  ;;  %v9149_v13 = vld [vmem:[#allocation163_spill] sm:$0xff] }
 0x4ca   : > { %v3720_v12 = vsel %vm3542_vm1, %v3531_v25, %v9130_v1  ;;  %v9148_v1 = vld [vmem:[#allocation162_spill] sm:$0xff] }
 0x4cb   : > { %v3128_v43 = vpop.permute.xlu1 %3127  ;;  %v3126_v4 = vpop.permute.xlu0 %3125 }
 0x4cc   : > { %v3901_v5 = vsel %vm3731_vm2, %v3712_v31, %v3128_v43  ;;  %v3900_v10 = vsel %vm3731_vm2, %v3711_v57, %v3126_v4  ;;  %v3533_v31 = vsel %vm3353_vm0, %v524_v61, %v9132_v29  ;;  %v3532_v57 = vsel %vm3353_vm0, %v523_v56, %v9133_v34  ;;  %v526_v43 = vld [vmem:[%s6516_s20 + $0x5a8] sm:$0xff]  ;;  %v525_v4 = vld [vmem:[%s6516_s20 + $0x5a0] sm:$0xff] }
 0x4cd   : > { %4090 = vst.msk [vmem:[%s6544_s15 + $0x548] sm:$0xff] %vm3920_vm3, %v3901_v5  ;;  %4089 = vst.msk [vmem:[%s6544_s15 + $0x540] sm:$0xff] %vm3920_vm3, %v3900_v10  ;;  %v9134_v5 = vld [vmem:[#allocation316_spill] sm:$0xff]  ;;  %v3721_v53 = vsel %vm3542_vm1, %v3532_v57, %v9135_v51 }
 0x4ce   : > { %v3722_v10 = vsel %vm3542_vm1, %v3533_v31, %v9134_v5 }
 0x4cf   : > { %v3132_v38 = vpop.permute.xlu1 %3131  ;;  %v3130_v30 = vpop.permute.xlu0 %3129 }
 0x4d0   : > { %v3903_v22 = vsel %vm3731_vm2, %v3714_v17, %v3132_v38  ;;  %v3902_v62 = vsel %vm3731_vm2, %v3713_v42, %v3130_v30  ;;  %v3535_v17 = vsel %vm3353_vm0, %v526_v43, %v9136_v18  ;;  %v3534_v42 = vsel %vm3353_vm0, %v525_v4, %v9137_v55  ;;  %v528_v38 = vld [vmem:[%s6516_s20 + $0x5b8] sm:$0xff]  ;;  %v527_v30 = vld [vmem:[%s6516_s20 + $0x5b0] sm:$0xff] }
 0x4d1   : > { %4092 = vst.msk [vmem:[%s6544_s15 + $0x558] sm:$0xff] %vm3920_vm3, %v3903_v22  ;;  %4091 = vst.msk [vmem:[%s6544_s15 + $0x550] sm:$0xff] %vm3920_vm3, %v3902_v62  ;;  %v9138_v22 = vld [vmem:[#allocation318_spill] sm:$0xff]  ;;  %v3723_v36 = vsel %vm3542_vm1, %v3534_v42, %v9139_v14 }
 0x4d2   : > { %v3724_v62 = vsel %vm3542_vm1, %v3535_v17, %v9138_v22 }
 0x4d3   : > { %v3136_v47 = vpop.permute.xlu1 %3135  ;;  %v3134_v27 = vpop.permute.xlu0 %3133 }
 0x4d4   : > { %v3905_v9 = vsel %vm3731_vm2, %v3716_v8, %v3136_v47  ;;  %v3904_v40 = vsel %vm3731_vm2, %v3715_v21, %v3134_v27  ;;  %v3537_v8 = vsel %vm3353_vm0, %v528_v38, %v9140_v60  ;;  %v3536_v21 = vsel %vm3353_vm0, %v527_v30, %v9141_v20  ;;  %v530_v47 = vld [vmem:[%s6516_s20 + $0x5c8] sm:$0xff]  ;;  %v529_v27 = vld [vmem:[%s6516_s20 + $0x5c0] sm:$0xff] }
 0x4d5   : > { %4094 = vst.msk [vmem:[%s6544_s15 + $0x568] sm:$0xff] %vm3920_vm3, %v3905_v9  ;;  %4093 = vst.msk [vmem:[%s6544_s15 + $0x560] sm:$0xff] %vm3920_vm3, %v3904_v40  ;;  %v9142_v9 = vld [vmem:[#allocation320_spill] sm:$0xff]  ;;  %v3725_v7 = vsel %vm3542_vm1, %v3536_v21, %v9143_v41 }
 0x4d6   : > { %v3726_v40 = vsel %vm3542_vm1, %v3537_v8, %v9142_v9 }
 0x4d7   : > { %v3140_v24 = vpop.permute.xlu1 %3139  ;;  %v3138_v44 = vpop.permute.xlu0 %3137 }
 0x4d8   : > { %v3907_v45 = vsel %vm3731_vm2, %v3718_v26, %v3140_v24  ;;  %v3906_v63 = vsel %vm3731_vm2, %v3717_v52, %v3138_v44  ;;  %v3539_v26 = vsel %vm3353_vm0, %v530_v47, %v9144_v58  ;;  %v3538_v52 = vsel %vm3353_vm0, %v529_v27, %v9145_v6  ;;  %v532_v24 = vld [vmem:[%s6516_s20 + $0x5d8] sm:$0xff]  ;;  %v531_v44 = vld [vmem:[%s6516_s20 + $0x5d0] sm:$0xff] }
 0x4d9   : > { %4096 = vst.msk [vmem:[%s6544_s15 + $0x578] sm:$0xff] %vm3920_vm3, %v3907_v45  ;;  %4095 = vst.msk [vmem:[%s6544_s15 + $0x570] sm:$0xff] %vm3920_vm3, %v3906_v63  ;;  %v9146_v45 = vld [vmem:[#allocation322_spill] sm:$0xff]  ;;  %v3727_v25 = vsel %vm3542_vm1, %v3538_v52, %v9147_v46 }
 0x4da   : > { %v3728_v63 = vsel %vm3542_vm1, %v3539_v26, %v9146_v45 }
 0x4db   : > { %v3144_v35 = vpop.permute.xlu1 %3143  ;;  %v3142_v11 = vpop.permute.xlu0 %3141 }
 0x4dc   : > { %v3909_v48 = vsel %vm3731_vm2, %v3720_v12, %v3144_v35  ;;  %v3908_v28 = vsel %vm3731_vm2, %v3719_v3, %v3142_v11  ;;  %v3541_v12 = vsel %vm3353_vm0, %v532_v24, %v9148_v1  ;;  %v3540_v3 = vsel %vm3353_vm0, %v531_v44, %v9149_v13  ;;  %v9150_v35 = vld [vmem:[#allocation324_spill] sm:$0xff] }
 0x4dd   : > { %4098 = vst.msk [vmem:[%s6544_s15 + $0x588] sm:$0xff] %vm3920_vm3, %v3909_v48  ;;  %4097 = vst.msk [vmem:[%s6544_s15 + $0x580] sm:$0xff] %vm3920_vm3, %v3908_v28  ;;  %v3730_v11 = vsel %vm3542_vm1, %v3541_v12, %v9150_v35  ;;  %v9151_v48 = vld [vmem:[#allocation325_spill] sm:$0xff] }
 0x4de   : > { %v3729_v28 = vsel %vm3542_vm1, %v3540_v3, %v9151_v48 }
 0x4df   : > { %v3148_v16 = vpop.permute.xlu1 %3147  ;;  %v3146_v32 = vpop.permute.xlu0 %3145 }
 0x4e0   : > { %v3911_v33 = vsel %vm3731_vm2, %v3722_v10, %v3148_v16  ;;  %v3910_v23 = vsel %vm3731_vm2, %v3721_v53, %v3146_v32 }
 0x4e1   : > { %4100 = vst.msk [vmem:[%s6544_s15 + $0x598] sm:$0xff] %vm3920_vm3, %v3911_v33  ;;  %4099 = vst.msk [vmem:[%s6544_s15 + $0x590] sm:$0xff] %vm3920_vm3, %v3910_v23 }
 0x4e3   : > { %v3152_v37 = vpop.permute.xlu1 %3151  ;;  %v3150_v15 = vpop.permute.xlu0 %3149 }
 0x4e4   : > { %v3913_v2 = vsel %vm3731_vm2, %v3724_v62, %v3152_v37  ;;  %v3912_v49 = vsel %vm3731_vm2, %v3723_v36, %v3150_v15 }
 0x4e5   : > { %4102 = vst.msk [vmem:[%s6544_s15 + $0x5a8] sm:$0xff] %vm3920_vm3, %v3913_v2  ;;  %4101 = vst.msk [vmem:[%s6544_s15 + $0x5a0] sm:$0xff] %vm3920_vm3, %v3912_v49 }
 0x4e7   : > { %v3156_v54 = vpop.permute.xlu1 %3155  ;;  %v3154_v19 = vpop.permute.xlu0 %3153 }
 0x4e8   : > { %v3915_v59 = vsel %vm3731_vm2, %v3726_v40, %v3156_v54  ;;  %v3914_v0 = vsel %vm3731_vm2, %v3725_v7, %v3154_v19 }
 0x4e9   : > { %4104 = vst.msk [vmem:[%s6544_s15 + $0x5b8] sm:$0xff] %vm3920_vm3, %v3915_v59  ;;  %4103 = vst.msk [vmem:[%s6544_s15 + $0x5b0] sm:$0xff] %vm3920_vm3, %v3914_v0 }
 0x4eb   : > { %v3160_v39 = vpop.permute.xlu1 %3159  ;;  %v3158_v50 = vpop.permute.xlu0 %3157 }
 0x4ec   : > { %v3917_v61 = vsel %vm3731_vm2, %v3728_v63, %v3160_v39  ;;  %v3916_v56 = vsel %vm3731_vm2, %v3727_v25, %v3158_v50 }
 0x4ed   : > { %4106 = vst.msk [vmem:[%s6544_s15 + $0x5c8] sm:$0xff] %vm3920_vm3, %v3917_v61  ;;  %4105 = vst.msk [vmem:[%s6544_s15 + $0x5c0] sm:$0xff] %vm3920_vm3, %v3916_v56  ;;  %4115 = sbr.rel (!%p4872_p4) target bundleno = 1330 (0x532), region = 40 }
 0x4ef   : > { %v3164_v29 = vpop.permute.xlu1 %3163  ;;  %v3162_v31 = vpop.permute.xlu0 %3161 }
 0x4f0   : > { %v3919_v34 = vsel %vm3731_vm2, %v3730_v11, %v3164_v29  ;;  %v3918_v57 = vsel %vm3731_vm2, %v3729_v28, %v3162_v31 }
 0x4f1   : > { %4108 = vst.msk [vmem:[%s6544_s15 + $0x5d8] sm:$0xff] %vm3920_vm3, %v3919_v34  ;;  %4107 = vst.msk [vmem:[%s6544_s15 + $0x5d0] sm:$0xff] %vm3920_vm3, %v3918_v57 }
 0x4f2   : > { %s9161_s25 = smov (!%p4118_p8, %s4117_s25), 188 }
 0x4f3   : > { %s4621_s30 = sshll.u32 %s9161_s25, 7 }
 0x4f4   : > { %p4624_p9 = scmp.eq.s32.totalorder %s4621_s30, 0 }
 0x4f5   : > { %s8307_s5 = sshrl.u32 (!%p4624_p9), %s9161_s25, 6 }
 0x4f6   : > { %4126 = sbr.rel (%p4624_p9) target bundleno = 1330 (0x532), region = 44  ;;  %p4625_p10 = scmp.le.s32.totalorder (!%p4624_p9), %s8307_s5, 0 }
 0x4fb   : > { %4551 = sbr.rel (%p4625_p10) target bundleno = 1313 (0x521), region = 129  ;;  %s9152_s18 = smov (!%p4625_p10), %s8301_s29 }
 0x4fc   : > { %s9153_s23 = smov (!%p4625_p10), %s6544_s15  ;;  %s8316_s24 = smov (!%p4625_p10), 0  }
 0x4fd   : > { %s8318_s6 = smov (!%p4625_p10), 0  }
 0x500 LB: >> { %v4315_v43 = vld [vmem:[%s4793_s23] sm:$0xff]  ;;  %v4317_v4 = vld [vmem:[%s4793_s23 + $0x8] sm:$0xff]  ;;  %v4319_v5 = vld [vmem:[%s4793_s23 + $0x10] sm:$0xff]  ;;  %s4443_s7 = sadd.s32 1, %s4797_s24  ;;  %s4309_s6 = sadd.s32 1, %s4801_s6   ;;  %s4801_s6 = sphi %s8318_s6, %s4309_s6   ;;  %s4797_s24 = sphi %s8316_s24, %s9156_s24   ;;  %s4793_s23 = sphi %s9153_s23, %s9155_s23   ;;  %s4789_s18 = sphi %s9152_s18, %s9154_s18  }
 0x501   : >> { %4316 = vst [vmem:[%s4789_s18] sm:$0xff] %v4315_v43  ;;  %4318 = vst [vmem:[%s4789_s18 + $0x8] sm:$0xff] %v4317_v4  ;;  %v4321_v10 = vld [vmem:[%s4793_s23 + $0x18] sm:$0xff]  ;;  %v4323_v51 = vld [vmem:[%s4793_s23 + $0x20] sm:$0xff]  ;;  %p4444_p11 = scmp.ge.s32.totalorder %s4443_s7, %s8307_s5  ;;  %p4308_p12 = scmp.ge.s32.totalorder %s4309_s6, %s8307_s5 }
 0x502   : >> { %4320 = vst [vmem:[%s4789_s18 + $0x10] sm:$0xff] %v4319_v5  ;;  %v4325_v53 = vld [vmem:[%s4793_s23 + $0x28] sm:$0xff]  ;;  %4322 = vst [vmem:[%s4789_s18 + $0x18] sm:$0xff] %v4321_v10  ;;  %v4327_v16 = vld [vmem:[%s4793_s23 + $0x30] sm:$0xff] }
 0x503   : >> { %4324 = vst [vmem:[%s4789_s18 + $0x20] sm:$0xff] %v4323_v51  ;;  %4326 = vst [vmem:[%s4789_s18 + $0x28] sm:$0xff] %v4325_v53  ;;  %v4329_v32 = vld [vmem:[%s4793_s23 + $0x38] sm:$0xff]  ;;  %v4331_v33 = vld [vmem:[%s4793_s23 + $0x40] sm:$0xff]  ;;  %s9163_s7 = smov (%p4444_p11, %s4443_s7), 0 }
 0x504   : >> { %4328 = vst [vmem:[%s4789_s18 + $0x30] sm:$0xff] %v4327_v16  ;;  %4330 = vst [vmem:[%s4789_s18 + $0x38] sm:$0xff] %v4329_v32  ;;  %v4333_v23 = vld [vmem:[%s4793_s23 + $0x48] sm:$0xff]  ;;  %v4335_v18 = vld [vmem:[%s4793_s23 + $0x50] sm:$0xff]  ;;  %s4626_s8 = sshll.u32 %s9163_s7, 9  ;;  %s9156_s24 = smov %s9163_s7 }
 0x505   : >> { %4332 = vst [vmem:[%s4789_s18 + $0x40] sm:$0xff] %v4331_v33  ;;  %v4337_v17 = vld [vmem:[%s4793_s23 + $0x58] sm:$0xff]  ;;  %4334 = vst [vmem:[%s4789_s18 + $0x48] sm:$0xff] %v4333_v23  ;;  %v4339_v55 = vld [vmem:[%s4793_s23 + $0x60] sm:$0xff]  ;;  %s8374_s9 = scalar_lea.vmem %s6544_s15, %s4626_s8 [#allocation2]   ;;  %s8377_s10 = scalar_lea.vmem %s8301_s29, %s4626_s8  }
 0x506   : >> { %4336 = vst [vmem:[%s4789_s18 + $0x50] sm:$0xff] %v4335_v18  ;;  %4338 = vst [vmem:[%s4789_s18 + $0x58] sm:$0xff] %v4337_v17  ;;  %v4341_v42 = vld [vmem:[%s4793_s23 + $0x68] sm:$0xff]  ;;  %v4343_v38 = vld [vmem:[%s4793_s23 + $0x70] sm:$0xff] }
 0x507   : >> { %4340 = vst [vmem:[%s4789_s18 + $0x60] sm:$0xff] %v4339_v55  ;;  %4342 = vst [vmem:[%s4789_s18 + $0x68] sm:$0xff] %v4341_v42  ;;  %v4345_v30 = vld [vmem:[%s4793_s23 + $0x78] sm:$0xff]  ;;  %v4347_v22 = vld [vmem:[%s4793_s23 + $0x80] sm:$0xff] }
 0x508   : >> { %4344 = vst [vmem:[%s4789_s18 + $0x70] sm:$0xff] %v4343_v38  ;;  %v4349_v62 = vld [vmem:[%s4793_s23 + $0x88] sm:$0xff]  ;;  %4346 = vst [vmem:[%s4789_s18 + $0x78] sm:$0xff] %v4345_v30  ;;  %v4351_v14 = vld [vmem:[%s4793_s23 + $0x90] sm:$0xff] }
 0x509   : >> { %4348 = vst [vmem:[%s4789_s18 + $0x80] sm:$0xff] %v4347_v22  ;;  %4350 = vst [vmem:[%s4789_s18 + $0x88] sm:$0xff] %v4349_v62  ;;  %v4353_v36 = vld [vmem:[%s4793_s23 + $0x98] sm:$0xff]  ;;  %v4355_v37 = vld [vmem:[%s4793_s23 + $0xa0] sm:$0xff] }
 0x50a   : >> { %4352 = vst [vmem:[%s4789_s18 + $0x90] sm:$0xff] %v4351_v14  ;;  %4354 = vst [vmem:[%s4789_s18 + $0x98] sm:$0xff] %v4353_v36  ;;  %v4357_v15 = vld [vmem:[%s4793_s23 + $0xa8] sm:$0xff]  ;;  %v4359_v2 = vld [vmem:[%s4793_s23 + $0xb0] sm:$0xff] }
 0x50b   : >> { %4356 = vst [vmem:[%s4789_s18 + $0xa0] sm:$0xff] %v4355_v37  ;;  %v4361_v49 = vld [vmem:[%s4793_s23 + $0xb8] sm:$0xff]  ;;  %4358 = vst [vmem:[%s4789_s18 + $0xa8] sm:$0xff] %v4357_v15  ;;  %v4363_v60 = vld [vmem:[%s4793_s23 + $0xc0] sm:$0xff] }
 0x50c   : >> { %4360 = vst [vmem:[%s4789_s18 + $0xb0] sm:$0xff] %v4359_v2  ;;  %4362 = vst [vmem:[%s4789_s18 + $0xb8] sm:$0xff] %v4361_v49  ;;  %v4365_v8 = vld [vmem:[%s4793_s23 + $0xc8] sm:$0xff]  ;;  %v4367_v20 = vld [vmem:[%s4793_s23 + $0xd0] sm:$0xff] }
 0x50d   : >> { %4364 = vst [vmem:[%s4789_s18 + $0xc0] sm:$0xff] %v4363_v60  ;;  %4366 = vst [vmem:[%s4789_s18 + $0xc8] sm:$0xff] %v4365_v8  ;;  %v4369_v21 = vld [vmem:[%s4793_s23 + $0xd8] sm:$0xff]  ;;  %v4371_v47 = vld [vmem:[%s4793_s23 + $0xe0] sm:$0xff] }
 0x50e   : >> { %4368 = vst [vmem:[%s4789_s18 + $0xd0] sm:$0xff] %v4367_v20  ;;  %v4373_v27 = vld [vmem:[%s4793_s23 + $0xe8] sm:$0xff]  ;;  %4370 = vst [vmem:[%s4789_s18 + $0xd8] sm:$0xff] %v4369_v21  ;;  %v4375_v9 = vld [vmem:[%s4793_s23 + $0xf0] sm:$0xff] }
 0x50f   : >> { %4372 = vst [vmem:[%s4789_s18 + $0xe0] sm:$0xff] %v4371_v47  ;;  %4374 = vst [vmem:[%s4789_s18 + $0xe8] sm:$0xff] %v4373_v27  ;;  %v4377_v40 = vld [vmem:[%s4793_s23 + $0xf8] sm:$0xff]  ;;  %v4379_v41 = vld [vmem:[%s4793_s23 + $0x100] sm:$0xff] }
 0x510   : >> { %4376 = vst [vmem:[%s4789_s18 + $0xf0] sm:$0xff] %v4375_v9  ;;  %4378 = vst [vmem:[%s4789_s18 + $0xf8] sm:$0xff] %v4377_v40  ;;  %v4381_v7 = vld [vmem:[%s4793_s23 + $0x108] sm:$0xff]  ;;  %v4383_v54 = vld [vmem:[%s4793_s23 + $0x110] sm:$0xff] }
 0x511   : >> { %4380 = vst [vmem:[%s4789_s18 + $0x100] sm:$0xff] %v4379_v41  ;;  %v4385_v19 = vld [vmem:[%s4793_s23 + $0x118] sm:$0xff]  ;;  %4382 = vst [vmem:[%s4789_s18 + $0x108] sm:$0xff] %v4381_v7  ;;  %v4387_v59 = vld [vmem:[%s4793_s23 + $0x120] sm:$0xff] }
 0x512   : >> { %4384 = vst [vmem:[%s4789_s18 + $0x110] sm:$0xff] %v4383_v54  ;;  %4386 = vst [vmem:[%s4789_s18 + $0x118] sm:$0xff] %v4385_v19  ;;  %v4389_v0 = vld [vmem:[%s4793_s23 + $0x128] sm:$0xff]  ;;  %v4391_v58 = vld [vmem:[%s4793_s23 + $0x130] sm:$0xff] }
 0x513   : >> { %4388 = vst [vmem:[%s4789_s18 + $0x120] sm:$0xff] %v4387_v59  ;;  %4390 = vst [vmem:[%s4789_s18 + $0x128] sm:$0xff] %v4389_v0  ;;  %v4393_v26 = vld [vmem:[%s4793_s23 + $0x138] sm:$0xff]  ;;  %v4395_v6 = vld [vmem:[%s4793_s23 + $0x140] sm:$0xff] }
 0x514   : >> { %4392 = vst [vmem:[%s4789_s18 + $0x130] sm:$0xff] %v4391_v58  ;;  %v4397_v52 = vld [vmem:[%s4793_s23 + $0x148] sm:$0xff]  ;;  %4394 = vst [vmem:[%s4789_s18 + $0x138] sm:$0xff] %v4393_v26  ;;  %v4399_v24 = vld [vmem:[%s4793_s23 + $0x150] sm:$0xff] }
 0x515   : >> { %4396 = vst [vmem:[%s4789_s18 + $0x140] sm:$0xff] %v4395_v6  ;;  %4398 = vst [vmem:[%s4789_s18 + $0x148] sm:$0xff] %v4397_v52  ;;  %v4401_v44 = vld [vmem:[%s4793_s23 + $0x158] sm:$0xff]  ;;  %v4403_v45 = vld [vmem:[%s4793_s23 + $0x160] sm:$0xff] }
 0x516   : >> { %4400 = vst [vmem:[%s4789_s18 + $0x150] sm:$0xff] %v4399_v24  ;;  %4402 = vst [vmem:[%s4789_s18 + $0x158] sm:$0xff] %v4401_v44  ;;  %v4405_v63 = vld [vmem:[%s4793_s23 + $0x168] sm:$0xff]  ;;  %v4407_v46 = vld [vmem:[%s4793_s23 + $0x170] sm:$0xff] }
 0x517   : >> { %4404 = vst [vmem:[%s4789_s18 + $0x160] sm:$0xff] %v4403_v45  ;;  %v4409_v25 = vld [vmem:[%s4793_s23 + $0x178] sm:$0xff]  ;;  %4406 = vst [vmem:[%s4789_s18 + $0x168] sm:$0xff] %v4405_v63  ;;  %v4411_v39 = vld [vmem:[%s4793_s23 + $0x180] sm:$0xff] }
 0x518   : >> { %4408 = vst [vmem:[%s4789_s18 + $0x170] sm:$0xff] %v4407_v46  ;;  %4410 = vst [vmem:[%s4789_s18 + $0x178] sm:$0xff] %v4409_v25  ;;  %v4413_v50 = vld [vmem:[%s4793_s23 + $0x188] sm:$0xff]  ;;  %v4415_v61 = vld [vmem:[%s4793_s23 + $0x190] sm:$0xff] }
 0x519   : >> { %4412 = vst [vmem:[%s4789_s18 + $0x180] sm:$0xff] %v4411_v39  ;;  %4414 = vst [vmem:[%s4789_s18 + $0x188] sm:$0xff] %v4413_v50  ;;  %v4417_v56 = vld [vmem:[%s4793_s23 + $0x198] sm:$0xff]  ;;  %v4419_v1 = vld [vmem:[%s4793_s23 + $0x1a0] sm:$0xff] }
 0x51a   : >> { %4416 = vst [vmem:[%s4789_s18 + $0x190] sm:$0xff] %v4415_v61  ;;  %v4421_v12 = vld [vmem:[%s4793_s23 + $0x1a8] sm:$0xff]  ;;  %4418 = vst [vmem:[%s4789_s18 + $0x198] sm:$0xff] %v4417_v56  ;;  %v4423_v13 = vld [vmem:[%s4793_s23 + $0x1b0] sm:$0xff] }
 0x51b   : >> { %4420 = vst [vmem:[%s4789_s18 + $0x1a0] sm:$0xff] %v4419_v1  ;;  %4422 = vst [vmem:[%s4789_s18 + $0x1a8] sm:$0xff] %v4421_v12  ;;  %v4425_v3 = vld [vmem:[%s4793_s23 + $0x1b8] sm:$0xff]  ;;  %v4427_v35 = vld [vmem:[%s4793_s23 + $0x1c0] sm:$0xff] }
 0x51c   : >> { %4424 = vst [vmem:[%s4789_s18 + $0x1b0] sm:$0xff] %v4423_v13  ;;  %4426 = vst [vmem:[%s4789_s18 + $0x1b8] sm:$0xff] %v4425_v3  ;;  %v4429_v11 = vld [vmem:[%s4793_s23 + $0x1c8] sm:$0xff]  ;;  %v4431_v48 = vld [vmem:[%s4793_s23 + $0x1d0] sm:$0xff]  ;;  %4311 = sbr.rel (!%p4308_p12) target bundleno = 1280 (0x500), region = 135 }
 0x51d   : >> { %4428 = vst [vmem:[%s4789_s18 + $0x1c0] sm:$0xff] %v4427_v35  ;;  %v4433_v28 = vld [vmem:[%s4793_s23 + $0x1d8] sm:$0xff]  ;;  %4430 = vst [vmem:[%s4789_s18 + $0x1c8] sm:$0xff] %v4429_v11  ;;  %v4435_v29 = vld [vmem:[%s4793_s23 + $0x1e0] sm:$0xff] }
 0x51e   : >> { %4432 = vst [vmem:[%s4789_s18 + $0x1d0] sm:$0xff] %v4431_v48  ;;  %4434 = vst [vmem:[%s4789_s18 + $0x1d8] sm:$0xff] %v4433_v28  ;;  %v4437_v31 = vld [vmem:[%s4793_s23 + $0x1e8] sm:$0xff]  ;;  %v4439_v34 = vld [vmem:[%s4793_s23 + $0x1f0] sm:$0xff] }
 0x51f   : >> { %4436 = vst [vmem:[%s4789_s18 + $0x1e0] sm:$0xff] %v4435_v29  ;;  %4438 = vst [vmem:[%s4789_s18 + $0x1e8] sm:$0xff] %v4437_v31  ;;  %v4441_v57 = vld [vmem:[%s4793_s23 + $0x1f8] sm:$0xff]  ;;  %s9155_s23 = smov %s8374_s9 }
 0x520   : >> { %4440 = vst [vmem:[%s4789_s18 + $0x1f0] sm:$0xff] %v4439_v34  ;;  %4442 = vst [vmem:[%s4789_s18 + $0x1f8] sm:$0xff] %v4441_v57  ;;  %s9154_s18 = smov %s8377_s10 }
 0x521 PF: > { %s8482_s11 = sand.u32 63, %s9161_s25   ;;  %s4637_s12 = sshll.u32 %s8307_s5, 9 }
 0x522   : > { %s4454_s13 = scalar_lea.vmem %s6544_s15, %s4637_s12 [#allocation2]   ;;  %s4456_s14 = scalar_lea.vmem %s8301_s29, %s4637_s12  }
 0x523   : > { %p4631_p13 = scmp.le.s32.totalorder %s8482_s11, 0 }
 0x524   : > { %s4803_s17 = smov (!%p4631_p13), %s4456_s14   ;;  %s4807_s20 = smov (!%p4631_p13), %s4454_s13  }
 0x525   : > { %4565 = sbr.rel (%p4631_p13) target bundleno = 1330 (0x532), region = 140  ;;  %s4811_s21 = smov (!%p4631_p13), 0  }
 0x526   : > { %s4815_s26 = smov (!%p4631_p13), 0  }
 0x52a LB: >> { %v4466_v43 = vld [vmem:[%s4809_s20] sm:$0xff]  ;;  %s4468_s25 = sadd.s32 1, %s4813_s21  ;;  %s4460_s26 = sadd.s32 1, %s4817_s26   ;;  %s4817_s26 = sphi %s4815_s26, %s4460_s26   ;;  %s4813_s21 = sphi %s4811_s21, %s4812_s21   ;;  %s4809_s20 = sphi %s4807_s20, %s4473_s20   ;;  %s4805_s17 = sphi %s4803_s17, %s4474_s17  }
 0x52b   : >> { %4467 = vst [vmem:[%s4805_s17] sm:$0xff] %v4466_v43  ;;  %p4469_p0 = scmp.ge.s32.totalorder %s4468_s25, %s8482_s11  ;;  %p4459_p1 = scmp.ge.s32.totalorder %s4460_s26, %s8482_s11 }
 0x52d   : >> { %s9165_s25 = smov (%p4469_p0, %s4468_s25), 0  ;;  %4462 = sbr.rel (!%p4459_p1) target bundleno = 1322 (0x52a), region = 146 }
 0x52e   : >> { %s4632_s15 = sshll.u32 %s9165_s25, 3  ;;  %s4812_s21 = smov %s9165_s25  }
 0x52f   : >> { %s4473_s20 = scalar_lea.vmem %s4454_s13, %s4632_s15 [#allocation2]   ;;  %s4474_s17 = scalar_lea.vmem %s4456_s14, %s4632_s15  }
 0x532 PF: > { %p11_p2 = scmp.ge.s32.totalorder %s4862_s19, 6   ;;  %s9157_s15 = smov %s4781_s16 }
 0x533   : > { %s9158_s16 = smov %s4870_s22  ;;  %s9159_s17 = smov %s4862_s19 }
 0x534   :  { %13 = sbr.rel (!%p11_p2) target bundleno = 2 (0x2), region = 157 }

</bundles_post_ra>
